<compile_context>
chip_gen: v7x
topology: tpu7x:2x2x1
jax: 0.10.0
libtpu: 0.0.40
codegen_flags: <defaults>
</compile_context>

<pallas_src>
import jax
import jax.numpy as jnp
from jax.experimental import pallas as pl
from jax.experimental.pallas import tpu as pltpu

WEIGHT_DTYPE = jnp.bfloat16   # MXU-native operand dtype on v5e/v6e/v7x
BATCH_BLOCK = 8               # sublane-aligned batch tile (B padded up to this)


def lstm_kernel(x_ref, wih_ref, whh_ref, b_ref, fcw_ref, fcb_ref,
                score_ref, hlast_ref):
    """One batch block: full T-step LSTM recurrence + final FC + sigmoid.

    x_ref    : (T, Bb, F)  time-major input block (bf16)
    wih_ref  : (F, 4H)     W_ih^T, g-gate columns pre-scaled by 2 (bf16)
    whh_ref  : (H, 4H)     W_hh^T, g-gate columns pre-scaled by 2 (bf16)
    b_ref    : (1, 4H)     (b_ih + b_hh), g block pre-scaled by 2 (f32)
    fcw_ref  : (1, H)      final linear weight row                (f32)
    fcb_ref  : (1, 1)      final linear bias                      (f32)
    score_ref: (Bb, 1)     sigmoid(fc(h_T))             [output, f32]
    hlast_ref: (Bb, H)     h_T == lstm_output[:, -1, :] [output, f32]
    """
    T, Bb, F = x_ref.shape
    H = whh_ref.shape[0]
    cdt = whh_ref.dtype  # MXU operand dtype (bf16)

    # ---- hoisted input projection: one bf16 matmul + f32 bias for all T ----
    x_all = x_ref[...].reshape(T * Bb, F).astype(cdt)                # (T*Bb, F)
    xw = jnp.dot(x_all, wih_ref[...],
                 preferred_element_type=jnp.float32) + b_ref[...]    # f32
    xw = xw.reshape(T, Bb, 4 * H)   # time-major: xw[t] is a leading-axis select

    whh = whh_ref[...]                                               # (H, 4H) bf16
    h = jnp.zeros((Bb, H), jnp.float32)
    c = jnp.zeros((Bb, H), jnp.float32)

    # ---- fully unrolled recurrence: only h@W_hh^T is on the serial path ----
    for t in range(T):
        gates = xw[t] + jnp.dot(h.astype(cdt), whh,
                                preferred_element_type=jnp.float32)  # (Bb,4H) f32
        # One EUP pass over all 4 gates. PyTorch gate order: i, f, g, o.
        # The g block was pre-scaled by 2 in the wrapper, so
        # tanh(z) = 2*sigmoid(2z) - 1 comes out of the same sigmoid.
        act = jax.nn.sigmoid(gates)
        i_g = act[:, 0 * H:1 * H]
        f_g = act[:, 1 * H:2 * H]
        g_g = 2.0 * act[:, 2 * H:3 * H] - 1.0
        o_g = act[:, 3 * H:4 * H]
        c = f_g * c + i_g * g_g
        h = o_g * jnp.tanh(c)

    hlast_ref[...] = h.astype(hlast_ref.dtype)
    # N=1 output column: VPU multiply + cross-lane reduce (an MXU matmul would
    # waste 127/128 output lanes and still pay full push/pop latency).
    logit = jnp.sum(h * fcw_ref[...], axis=-1, keepdims=True) + fcb_ref[...]
    score_ref[...] = jax.nn.sigmoid(logit).astype(score_ref.dtype)


def lstm_final_forward(x, w_ih, w_hh, b_ih, b_hh, fc_w, fc_b):
    """x: (B, T, F) batch_first like PyTorch. Returns (score (B,1), h_last (B,H))."""
    B, T, F = x.shape
    H = w_hh.shape[1]

    # Pre-scale the g-gate block (3rd of i,f,g,o) by 2 so a single sigmoid over
    # the full (Bb,4H) gates tensor also yields tanh via 2*sigmoid(2z)-1.
    # (x2 is exact in both f32 and bf16.)
    scale = jnp.concatenate([
        jnp.ones((2 * H,), jnp.float32),
        jnp.full((H,), 2.0, jnp.float32),
        jnp.ones((H,), jnp.float32),
    ])
    wih_t = (w_ih.T * scale[None, :]).astype(WEIGHT_DTYPE)            # (F, 4H)
    whh_t = (w_hh.T * scale[None, :]).astype(WEIGHT_DTYPE)            # (H, 4H)
    bias = ((b_ih + b_hh) * scale).astype(jnp.float32).reshape(1, 4 * H)
    fcw = fc_w.reshape(1, H).astype(jnp.float32)                      # (1, H)
    fcb = fc_b.reshape(1, 1).astype(jnp.float32)                      # (1, 1)

    # Layout plumbing in the wrapper: time-major x, batch padded to a
    # sublane-aligned block, bf16 operands (halves x DMA too).
    Bb = BATCH_BLOCK
    B_pad = ((B + Bb - 1) // Bb) * Bb
    x_tm = jnp.transpose(x, (1, 0, 2))                                # (T, B, F)
    if B_pad != B:
        x_tm = jnp.pad(x_tm, ((0, 0), (0, B_pad - B), (0, 0)))
    x_tm = x_tm.astype(WEIGHT_DTYPE)

    n_blk = B_pad // Bb
    score_p, h_p = pl.pallas_call(
        lstm_kernel,
        out_shape=(
            jax.ShapeDtypeStruct((B_pad, 1), jnp.float32),
            jax.ShapeDtypeStruct((B_pad, H), jnp.float32),
        ),
        grid_spec=pltpu.PrefetchScalarGridSpec(
            num_scalar_prefetch=0,
            grid=(n_blk,),
            in_specs=[
                pl.BlockSpec((T, Bb, F), lambda i: (0, i, 0)),
                pl.BlockSpec((F, 4 * H), lambda i: (0, 0)),
                pl.BlockSpec((H, 4 * H), lambda i: (0, 0)),
                pl.BlockSpec((1, 4 * H), lambda i: (0, 0)),
                pl.BlockSpec((1, H), lambda i: (0, 0)),
                pl.BlockSpec((1, 1), lambda i: (0, 0)),
            ],
            out_specs=(
                pl.BlockSpec((Bb, 1), lambda i: (i, 0)),
                pl.BlockSpec((Bb, H), lambda i: (i, 0)),
            ),
        ),
        compiler_params=pltpu.CompilerParams(
            dimension_semantics=("parallel",)),
    )(x_tm, wih_t, whh_t, bias, fcw, fcb)
    return score_p[:B], h_p[:B]


def lstm_final_reference(x, w_ih, w_hh, b_ih, b_hh, fc_w, fc_b):
    """Pure-JAX f32 reference matching torch.nn.LSTM(batch_first=True) + Linear + Sigmoid."""
    B, T, F = x.shape
    H = w_hh.shape[1]
    h0 = jnp.zeros((B, H), jnp.float32)
    c0 = jnp.zeros((B, H), jnp.float32)
    bias = b_ih + b_hh

    def step(carry, x_t):
        h, c = carry
        gates = x_t @ w_ih.T + h @ w_hh.T + bias
        i = jax.nn.sigmoid(gates[:, 0 * H:1 * H])
        f = jax.nn.sigmoid(gates[:, 1 * H:2 * H])
        g = jnp.tanh(gates[:, 2 * H:3 * H])
        o = jax.nn.sigmoid(gates[:, 3 * H:4 * H])
        c = f * c + i * g
        h = o * jnp.tanh(c)
        return (h, c), None

    (h_T, _), _ = jax.lax.scan(step, (h0, c0), jnp.transpose(x, (1, 0, 2)))
    score = jax.nn.sigmoid(h_T @ fc_w.T + fc_b)
    return score, h_T


if __name__ == "__main__":
    # Small shapes: batch=2, seq=8, features_dim=32, hidden=256 (as in the module).
    B, T, F, H = 2, 8, 32, 256

    key = jax.random.PRNGKey(0)
    k = jax.random.split(key, 8)
    bound = 1.0 / jnp.sqrt(H)

    x = jax.random.normal(k[0], (B, T, F), jnp.float32)
    w_ih = jax.random.uniform(k[1], (4 * H, F), jnp.float32, -bound, bound)
    w_hh = jax.random.uniform(k[2], (4 * H, H), jnp.float32, -bound, bound)
    b_ih = jax.random.uniform(k[3], (4 * H,), jnp.float32, -bound, bound)
    b_hh = jax.random.uniform(k[4], (4 * H,), jnp.float32, -bound, bound)
    fc_w = jax.random.uniform(k[5], (1, H), jnp.float32, -bound, bound)
    fc_b = jax.random.uniform(k[6], (1,), jnp.float32, -bound, bound)

    score, h_last = jax.jit(lstm_final_forward)(x, w_ih, w_hh, b_ih, b_hh, fc_w, fc_b)
    jax.block_until_ready((score, h_last))

    score_ref, h_ref = lstm_final_reference(x, w_ih, w_hh, b_ih, b_hh, fc_w, fc_b)
    assert score.shape == (B, 1) and h_last.shape == (B, H)

    # dtype-aware tolerances: bf16 operands (f32 accumulate) vs exact f32 ref.
    if WEIGHT_DTYPE == jnp.bfloat16:
        rtol, atol = 5e-2, 2e-2
    else:
        rtol, atol = 1e-4, 1e-5
    assert jnp.allclose(score, score_ref, rtol=rtol, atol=atol)
    assert jnp.allclose(h_last, h_ref, rtol=rtol, atol=atol)

    print("KERNEL_OK")
</pallas_src>

<mosaic_0001>
module attributes {stable_mosaic.version = 11 : i64} {
  func.func @lstm_kernel(%arg0: i32, %arg1: memref<8x8x32xbf16, #tpu.memory_space<vmem>>, %arg2: memref<32x1024xbf16, #tpu.memory_space<vmem>>, %arg3: memref<256x1024xbf16, #tpu.memory_space<vmem>>, %arg4: memref<1x1024xf32, #tpu.memory_space<vmem>>, %arg5: memref<1x256xf32, #tpu.memory_space<vmem>>, %arg6: memref<1x1xf32, #tpu.memory_space<vmem>>, %arg7: memref<8x1xf32, #tpu.memory_space<vmem>>, %arg8: memref<8x256xf32, #tpu.memory_space<vmem>>) attributes {dimension_semantics = [#tpu.dimension_semantics<parallel>], iteration_bounds = array<i64: 1>, scalar_prefetch = 0 : i64, scratch_operands = 0 : i64, tpu.core_type = #tpu.core_type<tc>, window_params = [{transform_indices = @transform_0, window_bounds = array<i64: 8, 8, 32>}, {pipeline_mode = #tpu.pipeline_mode<synchronous>, transform_indices = @transform_1, window_bounds = array<i64: 32, 1024>}, {pipeline_mode = #tpu.pipeline_mode<synchronous>, transform_indices = @transform_2, window_bounds = array<i64: 256, 1024>}, {pipeline_mode = #tpu.pipeline_mode<synchronous>, transform_indices = @transform_3, window_bounds = array<i64: 1, 1024>}, {pipeline_mode = #tpu.pipeline_mode<synchronous>, transform_indices = @transform_4, window_bounds = array<i64: 1, 256>}, {pipeline_mode = #tpu.pipeline_mode<synchronous>, transform_indices = @transform_5, window_bounds = array<i64: 1, 1>}, {transform_indices = @transform_6, window_bounds = array<i64: 8, 1>}, {transform_indices = @transform_7, window_bounds = array<i64: 8, 256>}]} {
    %c0 = arith.constant 0 : index
    %c0_0 = arith.constant 0 : index
    %c0_1 = arith.constant 0 : index
    %0 = vector.load %arg1[%c0, %c0_0, %c0_1] : memref<8x8x32xbf16, #tpu.memory_space<vmem>>, vector<8x8x32xbf16>
    %1 = vector.shape_cast %0 : vector<8x8x32xbf16> to vector<64x32xbf16>
    %c0_2 = arith.constant 0 : index
    %c0_3 = arith.constant 0 : index
    %2 = vector.load %arg2[%c0_2, %c0_3] : memref<32x1024xbf16, #tpu.memory_space<vmem>>, vector<32x1024xbf16>
    %cst = arith.constant dense<0.000000e+00> : vector<64x1024xf32>
    %3 = tpu.matmul %1, %2, %cst {dimension_numbers = #tpu.dot_dimension_numbers<[1], [0], [0], [1], [0, 0, 1, 1], [], []>} : vector<64x32xbf16>, vector<32x1024xbf16>, vector<64x1024xf32> -> vector<64x1024xf32>
    %c0_4 = arith.constant 0 : index
    %c0_5 = arith.constant 0 : index
    %4 = vector.load %arg4[%c0_4, %c0_5] : memref<1x1024xf32, #tpu.memory_space<vmem>>, vector<1x1024xf32>
    %5 = vector.broadcast %4 : vector<1x1024xf32> to vector<64x1024xf32>
    %6 = arith.addf %3, %5 : vector<64x1024xf32>
    %7 = vector.shape_cast %6 : vector<64x1024xf32> to vector<8x8x1024xf32>
    %c0_6 = arith.constant 0 : index
    %c0_7 = arith.constant 0 : index
    %8 = vector.load %arg3[%c0_6, %c0_7] : memref<256x1024xbf16, #tpu.memory_space<vmem>>, vector<256x1024xbf16>
    %cst_8 = arith.constant 0.000000e+00 : f32
    %9 = vector.broadcast %cst_8 : f32 to vector<8x256xf32>
    %cst_9 = arith.constant 0.000000e+00 : f32
    %10 = vector.broadcast %cst_9 : f32 to vector<8x256xf32>
    %11 = vector.extract_strided_slice %7 {offsets = [0, 0, 0], sizes = [1, 8, 1024], strides = [1, 1, 1]} : vector<8x8x1024xf32> to vector<1x8x1024xf32>
    %12 = vector.shape_cast %11 : vector<1x8x1024xf32> to vector<8x1024xf32>
    %13 = arith.truncf %9 : vector<8x256xf32> to vector<8x256xbf16>
    %cst_10 = arith.constant dense<0.000000e+00> : vector<8x1024xf32>
    %14 = tpu.matmul %13, %8, %cst_10 {dimension_numbers = #tpu.dot_dimension_numbers<[1], [0], [0], [1], [0, 0, 1, 1], [], []>} : vector<8x256xbf16>, vector<256x1024xbf16>, vector<8x1024xf32> -> vector<8x1024xf32>
    %15 = arith.addf %12, %14 : vector<8x1024xf32>
    %16 = arith.negf %15 : vector<8x1024xf32>
    %17 = math.exp %16 : vector<8x1024xf32>
    %cst_11 = arith.constant 1.000000e+00 : f32
    %18 = vector.broadcast %cst_11 : f32 to vector<8x1024xf32>
    %19 = arith.addf %18, %17 : vector<8x1024xf32>
    %20 = arith.divf %18, %19 : vector<8x1024xf32>
    %21 = vector.extract_strided_slice %20 {offsets = [0, 0], sizes = [8, 256], strides = [1, 1]} : vector<8x1024xf32> to vector<8x256xf32>
    %22 = vector.extract_strided_slice %20 {offsets = [0, 256], sizes = [8, 256], strides = [1, 1]} : vector<8x1024xf32> to vector<8x256xf32>
    %23 = vector.extract_strided_slice %20 {offsets = [0, 512], sizes = [8, 256], strides = [1, 1]} : vector<8x1024xf32> to vector<8x256xf32>
    %cst_12 = arith.constant 2.000000e+00 : f32
    %24 = vector.broadcast %cst_12 : f32 to vector<8x256xf32>
    %25 = arith.mulf %24, %23 : vector<8x256xf32>
    %cst_13 = arith.constant 1.000000e+00 : f32
    %26 = vector.broadcast %cst_13 : f32 to vector<8x256xf32>
    %27 = arith.subf %25, %26 : vector<8x256xf32>
    %28 = vector.extract_strided_slice %20 {offsets = [0, 768], sizes = [8, 256], strides = [1, 1]} : vector<8x1024xf32> to vector<8x256xf32>
    %29 = arith.mulf %22, %10 : vector<8x256xf32>
    %30 = arith.mulf %21, %27 : vector<8x256xf32>
    %31 = arith.addf %29, %30 : vector<8x256xf32>
    %32 = math.tanh %31 : vector<8x256xf32>
    %33 = arith.mulf %28, %32 : vector<8x256xf32>
    %34 = vector.extract_strided_slice %7 {offsets = [1, 0, 0], sizes = [1, 8, 1024], strides = [1, 1, 1]} : vector<8x8x1024xf32> to vector<1x8x1024xf32>
    %35 = vector.shape_cast %34 : vector<1x8x1024xf32> to vector<8x1024xf32>
    %36 = arith.truncf %33 : vector<8x256xf32> to vector<8x256xbf16>
    %cst_14 = arith.constant dense<0.000000e+00> : vector<8x1024xf32>
    %37 = tpu.matmul %36, %8, %cst_14 {dimension_numbers = #tpu.dot_dimension_numbers<[1], [0], [0], [1], [0, 0, 1, 1], [], []>} : vector<8x256xbf16>, vector<256x1024xbf16>, vector<8x1024xf32> -> vector<8x1024xf32>
    %38 = arith.addf %35, %37 : vector<8x1024xf32>
    %39 = arith.negf %38 : vector<8x1024xf32>
    %40 = math.exp %39 : vector<8x1024xf32>
    %cst_15 = arith.constant 1.000000e+00 : f32
    %41 = vector.broadcast %cst_15 : f32 to vector<8x1024xf32>
    %42 = arith.addf %41, %40 : vector<8x1024xf32>
    %43 = arith.divf %41, %42 : vector<8x1024xf32>
    %44 = vector.extract_strided_slice %43 {offsets = [0, 0], sizes = [8, 256], strides = [1, 1]} : vector<8x1024xf32> to vector<8x256xf32>
    %45 = vector.extract_strided_slice %43 {offsets = [0, 256], sizes = [8, 256], strides = [1, 1]} : vector<8x1024xf32> to vector<8x256xf32>
    %46 = vector.extract_strided_slice %43 {offsets = [0, 512], sizes = [8, 256], strides = [1, 1]} : vector<8x1024xf32> to vector<8x256xf32>
    %cst_16 = arith.constant 2.000000e+00 : f32
    %47 = vector.broadcast %cst_16 : f32 to vector<8x256xf32>
    %48 = arith.mulf %47, %46 : vector<8x256xf32>
    %cst_17 = arith.constant 1.000000e+00 : f32
    %49 = vector.broadcast %cst_17 : f32 to vector<8x256xf32>
    %50 = arith.subf %48, %49 : vector<8x256xf32>
    %51 = vector.extract_strided_slice %43 {offsets = [0, 768], sizes = [8, 256], strides = [1, 1]} : vector<8x1024xf32> to vector<8x256xf32>
    %52 = arith.mulf %45, %31 : vector<8x256xf32>
    %53 = arith.mulf %44, %50 : vector<8x256xf32>
    %54 = arith.addf %52, %53 : vector<8x256xf32>
    %55 = math.tanh %54 : vector<8x256xf32>
    %56 = arith.mulf %51, %55 : vector<8x256xf32>
    %57 = vector.extract_strided_slice %7 {offsets = [2, 0, 0], sizes = [1, 8, 1024], strides = [1, 1, 1]} : vector<8x8x1024xf32> to vector<1x8x1024xf32>
    %58 = vector.shape_cast %57 : vector<1x8x1024xf32> to vector<8x1024xf32>
    %59 = arith.truncf %56 : vector<8x256xf32> to vector<8x256xbf16>
    %cst_18 = arith.constant dense<0.000000e+00> : vector<8x1024xf32>
    %60 = tpu.matmul %59, %8, %cst_18 {dimension_numbers = #tpu.dot_dimension_numbers<[1], [0], [0], [1], [0, 0, 1, 1], [], []>} : vector<8x256xbf16>, vector<256x1024xbf16>, vector<8x1024xf32> -> vector<8x1024xf32>
    %61 = arith.addf %58, %60 : vector<8x1024xf32>
    %62 = arith.negf %61 : vector<8x1024xf32>
    %63 = math.exp %62 : vector<8x1024xf32>
    %cst_19 = arith.constant 1.000000e+00 : f32
    %64 = vector.broadcast %cst_19 : f32 to vector<8x1024xf32>
    %65 = arith.addf %64, %63 : vector<8x1024xf32>
    %66 = arith.divf %64, %65 : vector<8x1024xf32>
    %67 = vector.extract_strided_slice %66 {offsets = [0, 0], sizes = [8, 256], strides = [1, 1]} : vector<8x1024xf32> to vector<8x256xf32>
    %68 = vector.extract_strided_slice %66 {offsets = [0, 256], sizes = [8, 256], strides = [1, 1]} : vector<8x1024xf32> to vector<8x256xf32>
    %69 = vector.extract_strided_slice %66 {offsets = [0, 512], sizes = [8, 256], strides = [1, 1]} : vector<8x1024xf32> to vector<8x256xf32>
    %cst_20 = arith.constant 2.000000e+00 : f32
    %70 = vector.broadcast %cst_20 : f32 to vector<8x256xf32>
    %71 = arith.mulf %70, %69 : vector<8x256xf32>
    %cst_21 = arith.constant 1.000000e+00 : f32
    %72 = vector.broadcast %cst_21 : f32 to vector<8x256xf32>
    %73 = arith.subf %71, %72 : vector<8x256xf32>
    %74 = vector.extract_strided_slice %66 {offsets = [0, 768], sizes = [8, 256], strides = [1, 1]} : vector<8x1024xf32> to vector<8x256xf32>
    %75 = arith.mulf %68, %54 : vector<8x256xf32>
    %76 = arith.mulf %67, %73 : vector<8x256xf32>
    %77 = arith.addf %75, %76 : vector<8x256xf32>
    %78 = math.tanh %77 : vector<8x256xf32>
    %79 = arith.mulf %74, %78 : vector<8x256xf32>
    %80 = vector.extract_strided_slice %7 {offsets = [3, 0, 0], sizes = [1, 8, 1024], strides = [1, 1, 1]} : vector<8x8x1024xf32> to vector<1x8x1024xf32>
    %81 = vector.shape_cast %80 : vector<1x8x1024xf32> to vector<8x1024xf32>
    %82 = arith.truncf %79 : vector<8x256xf32> to vector<8x256xbf16>
    %cst_22 = arith.constant dense<0.000000e+00> : vector<8x1024xf32>
    %83 = tpu.matmul %82, %8, %cst_22 {dimension_numbers = #tpu.dot_dimension_numbers<[1], [0], [0], [1], [0, 0, 1, 1], [], []>} : vector<8x256xbf16>, vector<256x1024xbf16>, vector<8x1024xf32> -> vector<8x1024xf32>
    %84 = arith.addf %81, %83 : vector<8x1024xf32>
    %85 = arith.negf %84 : vector<8x1024xf32>
    %86 = math.exp %85 : vector<8x1024xf32>
    %cst_23 = arith.constant 1.000000e+00 : f32
    %87 = vector.broadcast %cst_23 : f32 to vector<8x1024xf32>
    %88 = arith.addf %87, %86 : vector<8x1024xf32>
    %89 = arith.divf %87, %88 : vector<8x1024xf32>
    %90 = vector.extract_strided_slice %89 {offsets = [0, 0], sizes = [8, 256], strides = [1, 1]} : vector<8x1024xf32> to vector<8x256xf32>
    %91 = vector.extract_strided_slice %89 {offsets = [0, 256], sizes = [8, 256], strides = [1, 1]} : vector<8x1024xf32> to vector<8x256xf32>
    %92 = vector.extract_strided_slice %89 {offsets = [0, 512], sizes = [8, 256], strides = [1, 1]} : vector<8x1024xf32> to vector<8x256xf32>
    %cst_24 = arith.constant 2.000000e+00 : f32
    %93 = vector.broadcast %cst_24 : f32 to vector<8x256xf32>
    %94 = arith.mulf %93, %92 : vector<8x256xf32>
    %cst_25 = arith.constant 1.000000e+00 : f32
    %95 = vector.broadcast %cst_25 : f32 to vector<8x256xf32>
    %96 = arith.subf %94, %95 : vector<8x256xf32>
    %97 = vector.extract_strided_slice %89 {offsets = [0, 768], sizes = [8, 256], strides = [1, 1]} : vector<8x1024xf32> to vector<8x256xf32>
    %98 = arith.mulf %91, %77 : vector<8x256xf32>
    %99 = arith.mulf %90, %96 : vector<8x256xf32>
    %100 = arith.addf %98, %99 : vector<8x256xf32>
    %101 = math.tanh %100 : vector<8x256xf32>
    %102 = arith.mulf %97, %101 : vector<8x256xf32>
    %103 = vector.extract_strided_slice %7 {offsets = [4, 0, 0], sizes = [1, 8, 1024], strides = [1, 1, 1]} : vector<8x8x1024xf32> to vector<1x8x1024xf32>
    %104 = vector.shape_cast %103 : vector<1x8x1024xf32> to vector<8x1024xf32>
    %105 = arith.truncf %102 : vector<8x256xf32> to vector<8x256xbf16>
    %cst_26 = arith.constant dense<0.000000e+00> : vector<8x1024xf32>
    %106 = tpu.matmul %105, %8, %cst_26 {dimension_numbers = #tpu.dot_dimension_numbers<[1], [0], [0], [1], [0, 0, 1, 1], [], []>} : vector<8x256xbf16>, vector<256x1024xbf16>, vector<8x1024xf32> -> vector<8x1024xf32>
    %107 = arith.addf %104, %106 : vector<8x1024xf32>
    %108 = arith.negf %107 : vector<8x1024xf32>
    %109 = math.exp %108 : vector<8x1024xf32>
    %cst_27 = arith.constant 1.000000e+00 : f32
    %110 = vector.broadcast %cst_27 : f32 to vector<8x1024xf32>
    %111 = arith.addf %110, %109 : vector<8x1024xf32>
    %112 = arith.divf %110, %111 : vector<8x1024xf32>
    %113 = vector.extract_strided_slice %112 {offsets = [0, 0], sizes = [8, 256], strides = [1, 1]} : vector<8x1024xf32> to vector<8x256xf32>
    %114 = vector.extract_strided_slice %112 {offsets = [0, 256], sizes = [8, 256], strides = [1, 1]} : vector<8x1024xf32> to vector<8x256xf32>
    %115 = vector.extract_strided_slice %112 {offsets = [0, 512], sizes = [8, 256], strides = [1, 1]} : vector<8x1024xf32> to vector<8x256xf32>
    %cst_28 = arith.constant 2.000000e+00 : f32
    %116 = vector.broadcast %cst_28 : f32 to vector<8x256xf32>
    %117 = arith.mulf %116, %115 : vector<8x256xf32>
    %cst_29 = arith.constant 1.000000e+00 : f32
    %118 = vector.broadcast %cst_29 : f32 to vector<8x256xf32>
    %119 = arith.subf %117, %118 : vector<8x256xf32>
    %120 = vector.extract_strided_slice %112 {offsets = [0, 768], sizes = [8, 256], strides = [1, 1]} : vector<8x1024xf32> to vector<8x256xf32>
    %121 = arith.mulf %114, %100 : vector<8x256xf32>
    %122 = arith.mulf %113, %119 : vector<8x256xf32>
    %123 = arith.addf %121, %122 : vector<8x256xf32>
    %124 = math.tanh %123 : vector<8x256xf32>
    %125 = arith.mulf %120, %124 : vector<8x256xf32>
    %126 = vector.extract_strided_slice %7 {offsets = [5, 0, 0], sizes = [1, 8, 1024], strides = [1, 1, 1]} : vector<8x8x1024xf32> to vector<1x8x1024xf32>
    %127 = vector.shape_cast %126 : vector<1x8x1024xf32> to vector<8x1024xf32>
    %128 = arith.truncf %125 : vector<8x256xf32> to vector<8x256xbf16>
    %cst_30 = arith.constant dense<0.000000e+00> : vector<8x1024xf32>
    %129 = tpu.matmul %128, %8, %cst_30 {dimension_numbers = #tpu.dot_dimension_numbers<[1], [0], [0], [1], [0, 0, 1, 1], [], []>} : vector<8x256xbf16>, vector<256x1024xbf16>, vector<8x1024xf32> -> vector<8x1024xf32>
    %130 = arith.addf %127, %129 : vector<8x1024xf32>
    %131 = arith.negf %130 : vector<8x1024xf32>
    %132 = math.exp %131 : vector<8x1024xf32>
    %cst_31 = arith.constant 1.000000e+00 : f32
    %133 = vector.broadcast %cst_31 : f32 to vector<8x1024xf32>
    %134 = arith.addf %133, %132 : vector<8x1024xf32>
    %135 = arith.divf %133, %134 : vector<8x1024xf32>
    %136 = vector.extract_strided_slice %135 {offsets = [0, 0], sizes = [8, 256], strides = [1, 1]} : vector<8x1024xf32> to vector<8x256xf32>
    %137 = vector.extract_strided_slice %135 {offsets = [0, 256], sizes = [8, 256], strides = [1, 1]} : vector<8x1024xf32> to vector<8x256xf32>
    %138 = vector.extract_strided_slice %135 {offsets = [0, 512], sizes = [8, 256], strides = [1, 1]} : vector<8x1024xf32> to vector<8x256xf32>
    %cst_32 = arith.constant 2.000000e+00 : f32
    %139 = vector.broadcast %cst_32 : f32 to vector<8x256xf32>
    %140 = arith.mulf %139, %138 : vector<8x256xf32>
    %cst_33 = arith.constant 1.000000e+00 : f32
    %141 = vector.broadcast %cst_33 : f32 to vector<8x256xf32>
    %142 = arith.subf %140, %141 : vector<8x256xf32>
    %143 = vector.extract_strided_slice %135 {offsets = [0, 768], sizes = [8, 256], strides = [1, 1]} : vector<8x1024xf32> to vector<8x256xf32>
    %144 = arith.mulf %137, %123 : vector<8x256xf32>
    %145 = arith.mulf %136, %142 : vector<8x256xf32>
    %146 = arith.addf %144, %145 : vector<8x256xf32>
    %147 = math.tanh %146 : vector<8x256xf32>
    %148 = arith.mulf %143, %147 : vector<8x256xf32>
    %149 = vector.extract_strided_slice %7 {offsets = [6, 0, 0], sizes = [1, 8, 1024], strides = [1, 1, 1]} : vector<8x8x1024xf32> to vector<1x8x1024xf32>
    %150 = vector.shape_cast %149 : vector<1x8x1024xf32> to vector<8x1024xf32>
    %151 = arith.truncf %148 : vector<8x256xf32> to vector<8x256xbf16>
    %cst_34 = arith.constant dense<0.000000e+00> : vector<8x1024xf32>
    %152 = tpu.matmul %151, %8, %cst_34 {dimension_numbers = #tpu.dot_dimension_numbers<[1], [0], [0], [1], [0, 0, 1, 1], [], []>} : vector<8x256xbf16>, vector<256x1024xbf16>, vector<8x1024xf32> -> vector<8x1024xf32>
    %153 = arith.addf %150, %152 : vector<8x1024xf32>
    %154 = arith.negf %153 : vector<8x1024xf32>
    %155 = math.exp %154 : vector<8x1024xf32>
    %cst_35 = arith.constant 1.000000e+00 : f32
    %156 = vector.broadcast %cst_35 : f32 to vector<8x1024xf32>
    %157 = arith.addf %156, %155 : vector<8x1024xf32>
    %158 = arith.divf %156, %157 : vector<8x1024xf32>
    %159 = vector.extract_strided_slice %158 {offsets = [0, 0], sizes = [8, 256], strides = [1, 1]} : vector<8x1024xf32> to vector<8x256xf32>
    %160 = vector.extract_strided_slice %158 {offsets = [0, 256], sizes = [8, 256], strides = [1, 1]} : vector<8x1024xf32> to vector<8x256xf32>
    %161 = vector.extract_strided_slice %158 {offsets = [0, 512], sizes = [8, 256], strides = [1, 1]} : vector<8x1024xf32> to vector<8x256xf32>
    %cst_36 = arith.constant 2.000000e+00 : f32
    %162 = vector.broadcast %cst_36 : f32 to vector<8x256xf32>
    %163 = arith.mulf %162, %161 : vector<8x256xf32>
    %cst_37 = arith.constant 1.000000e+00 : f32
    %164 = vector.broadcast %cst_37 : f32 to vector<8x256xf32>
    %165 = arith.subf %163, %164 : vector<8x256xf32>
    %166 = vector.extract_strided_slice %158 {offsets = [0, 768], sizes = [8, 256], strides = [1, 1]} : vector<8x1024xf32> to vector<8x256xf32>
    %167 = arith.mulf %160, %146 : vector<8x256xf32>
    %168 = arith.mulf %159, %165 : vector<8x256xf32>
    %169 = arith.addf %167, %168 : vector<8x256xf32>
    %170 = math.tanh %169 : vector<8x256xf32>
    %171 = arith.mulf %166, %170 : vector<8x256xf32>
    %172 = vector.extract_strided_slice %7 {offsets = [7, 0, 0], sizes = [1, 8, 1024], strides = [1, 1, 1]} : vector<8x8x1024xf32> to vector<1x8x1024xf32>
    %173 = vector.shape_cast %172 : vector<1x8x1024xf32> to vector<8x1024xf32>
    %174 = arith.truncf %171 : vector<8x256xf32> to vector<8x256xbf16>
    %cst_38 = arith.constant dense<0.000000e+00> : vector<8x1024xf32>
    %175 = tpu.matmul %174, %8, %cst_38 {dimension_numbers = #tpu.dot_dimension_numbers<[1], [0], [0], [1], [0, 0, 1, 1], [], []>} : vector<8x256xbf16>, vector<256x1024xbf16>, vector<8x1024xf32> -> vector<8x1024xf32>
    %176 = arith.addf %173, %175 : vector<8x1024xf32>
    %177 = arith.negf %176 : vector<8x1024xf32>
    %178 = math.exp %177 : vector<8x1024xf32>
    %cst_39 = arith.constant 1.000000e+00 : f32
    %179 = vector.broadcast %cst_39 : f32 to vector<8x1024xf32>
    %180 = arith.addf %179, %178 : vector<8x1024xf32>
    %181 = arith.divf %179, %180 : vector<8x1024xf32>
    %182 = vector.extract_strided_slice %181 {offsets = [0, 0], sizes = [8, 256], strides = [1, 1]} : vector<8x1024xf32> to vector<8x256xf32>
    %183 = vector.extract_strided_slice %181 {offsets = [0, 256], sizes = [8, 256], strides = [1, 1]} : vector<8x1024xf32> to vector<8x256xf32>
    %184 = vector.extract_strided_slice %181 {offsets = [0, 512], sizes = [8, 256], strides = [1, 1]} : vector<8x1024xf32> to vector<8x256xf32>
    %cst_40 = arith.constant 2.000000e+00 : f32
    %185 = vector.broadcast %cst_40 : f32 to vector<8x256xf32>
    %186 = arith.mulf %185, %184 : vector<8x256xf32>
    %cst_41 = arith.constant 1.000000e+00 : f32
    %187 = vector.broadcast %cst_41 : f32 to vector<8x256xf32>
    %188 = arith.subf %186, %187 : vector<8x256xf32>
    %189 = vector.extract_strided_slice %181 {offsets = [0, 768], sizes = [8, 256], strides = [1, 1]} : vector<8x1024xf32> to vector<8x256xf32>
    %190 = arith.mulf %183, %169 : vector<8x256xf32>
    %191 = arith.mulf %182, %188 : vector<8x256xf32>
    %192 = arith.addf %190, %191 : vector<8x256xf32>
    %193 = math.tanh %192 : vector<8x256xf32>
    %194 = arith.mulf %189, %193 : vector<8x256xf32>
    %c0_42 = arith.constant 0 : index
    %c0_43 = arith.constant 0 : index
    %195 = vector.load %arg8[%c0_42, %c0_43] : memref<8x256xf32, #tpu.memory_space<vmem>>, vector<8x256xf32>
    tpu.vector_store %arg8[%c0_42, %c0_43], %194 {strides = array<i32>} : memref<8x256xf32, #tpu.memory_space<vmem>>, vector<8x256xf32>,
    %c0_44 = arith.constant 0 : index
    %c0_45 = arith.constant 0 : index
    %196 = vector.load %arg5[%c0_44, %c0_45] : memref<1x256xf32, #tpu.memory_space<vmem>>, vector<1x256xf32>
    %197 = vector.broadcast %196 : vector<1x256xf32> to vector<8x256xf32>
    %198 = arith.mulf %194, %197 : vector<8x256xf32>
    %cst_46 = arith.constant dense<0.000000e+00> : vector<8xf32>
    %199 = vector.multi_reduction <add>, %198, %cst_46 [1] : vector<8x256xf32> to vector<8xf32>
    %200 = vector.shape_cast %199 : vector<8xf32> to vector<8x1xf32>
    %c0_47 = arith.constant 0 : index
    %c0_48 = arith.constant 0 : index
    %201 = vector.load %arg6[%c0_47, %c0_48] : memref<1x1xf32, #tpu.memory_space<vmem>>, vector<1x1xf32>
    %202 = vector.broadcast %201 : vector<1x1xf32> to vector<8x1xf32>
    %203 = arith.addf %200, %202 : vector<8x1xf32>
    %204 = arith.negf %203 : vector<8x1xf32>
    %205 = math.exp %204 : vector<8x1xf32>
    %cst_49 = arith.constant 1.000000e+00 : f32
    %206 = vector.broadcast %cst_49 : f32 to vector<8x1xf32>
    %207 = arith.addf %206, %205 : vector<8x1xf32>
    %208 = arith.divf %206, %207 : vector<8x1xf32>
    %c0_50 = arith.constant 0 : index
    %c0_51 = arith.constant 0 : index
    %209 = vector.load %arg7[%c0_50, %c0_51] : memref<8x1xf32, #tpu.memory_space<vmem>>, vector<8x1xf32>
    tpu.vector_store %arg7[%c0_50, %c0_51], %208 {strides = array<i32>} : memref<8x1xf32, #tpu.memory_space<vmem>>, vector<8x1xf32>,
    return
  }
  func.func @transform_0(%arg0: i32) -> (i32, i32, i32) {
    %c0_i32 = arith.constant 0 : i32
    %c0_i32_0 = arith.constant 0 : i32
    %c0_i32_1 = arith.constant 0 : i32
    return %c0_i32, %arg0, %c0_i32_0 : i32, i32, i32
  }
  func.func @transform_1(%arg0: i32) -> (i32, i32) {
    %c0_i32 = arith.constant 0 : i32
    %c0_i32_0 = arith.constant 0 : i32
    %c0_i32_1 = arith.constant 0 : i32
    return %c0_i32, %c0_i32_0 : i32, i32
  }
  func.func @transform_2(%arg0: i32) -> (i32, i32) {
    %c0_i32 = arith.constant 0 : i32
    %c0_i32_0 = arith.constant 0 : i32
    %c0_i32_1 = arith.constant 0 : i32
    return %c0_i32, %c0_i32_0 : i32, i32
  }
  func.func @transform_3(%arg0: i32) -> (i32, i32) {
    %c0_i32 = arith.constant 0 : i32
    %c0_i32_0 = arith.constant 0 : i32
    %c0_i32_1 = arith.constant 0 : i32
    return %c0_i32, %c0_i32_0 : i32, i32
  }
  func.func @transform_4(%arg0: i32) -> (i32, i32) {
    %c0_i32 = arith.constant 0 : i32
    %c0_i32_0 = arith.constant 0 : i32
    %c0_i32_1 = arith.constant 0 : i32
    return %c0_i32, %c0_i32_0 : i32, i32
  }
  func.func @transform_5(%arg0: i32) -> (i32, i32) {
    %c0_i32 = arith.constant 0 : i32
    %c0_i32_0 = arith.constant 0 : i32
    %c0_i32_1 = arith.constant 0 : i32
    return %c0_i32, %c0_i32_0 : i32, i32
  }
  func.func @transform_6(%arg0: i32) -> (i32, i32) {
    %c0_i32 = arith.constant 0 : i32
    %c0_i32_0 = arith.constant 0 : i32
    return %arg0, %c0_i32 : i32, i32
  }
  func.func @transform_7(%arg0: i32) -> (i32, i32) {
    %c0_i32 = arith.constant 0 : i32
    %c0_i32_0 = arith.constant 0 : i32
    return %arg0, %c0_i32 : i32, i32
  }
}

</mosaic_0001>

<bundles_post_ra>
// kernel: lstm_final_forward.1
= control target key start
LH: loop header
LB: loop body
LE: loop exit
PB: predicated region body
PF: predicated region fallthrough
CT: control target
= control target key end

     0   :  { %v5992_v3 = vmov 0   ;;  %vm194_vm0 = vcmask 261120   ;;  %vm3186_vm1 = vcmask 7168   ;;  %s5984_s1 = inlined_call_operand.vmem [shape: bf16[32,1024], index: 1, kind: input, shape index: {}]   ;;  %s5985_s0 = inlined_call_operand.vmem [shape: bf16[8,8,32], index: 0, kind: input, shape index: {}]   ;;  %s5986_s2 = inlined_call_operand.vmem [shape: bf16[256,1024], index: 2, kind: input, shape index: {}]   ;;  %s5987_s3 = inlined_call_operand.vmem [shape: f32[1,1024], index: 3, kind: input, shape index: {}]   ;;  %s5988_s5 = inlined_call_operand.<no memory space> [shape: f32[1,1], index: 5, kind: input, shape index: {}]   ;;  %s5989_s4 = inlined_call_operand.vmem [shape: f32[1,256], index: 4, kind: input, shape index: {}]   ;;  %s5990_s7 = inlined_call_operand.vmem [shape: f32[8,256], index: 7, kind: output, shape index: {1}]   ;;  %s5991_s6 = inlined_call_operand.vmem [shape: f32[8,1], index: 6, kind: output, shape index: {0}]  }
   0x1   :  { %v36_v0 = vld [vmem:[%s5984_s1] sm:$0xff]  ;;  %v37_v2 = vld [vmem:[%s5984_s1 + $0x8] sm:$0xff]  ;;  %239 = vmatprep.mubr.bf16.mxu0 %v5992_v3  ;;  %312 = vmatprep.mubr.bf16.mxu1 %v5992_v3  ;;  %v38_v15 = vld [vmem:[%s5984_s1 + $0x10] sm:$0xff] }
   0x2   :  { %v40_v1 = vld [vmem:[%s5984_s1 + $0x20] sm:$0xff]  ;;  %v41_v5 = vld [vmem:[%s5984_s1 + $0x28] sm:$0xff]  ;;  %v42_v17 = vld [vmem:[%s5984_s1 + $0x30] sm:$0xff] }
   0x3   :  { %v3201_v4 = vcombine.high %v36_v0, %v40_v1  ;;  %v3200_v6 = vcombine.low %v36_v0, %v40_v1  ;;  %v44_v7 = vld [vmem:[%s5984_s1 + $0x40] sm:$0xff]  ;;  %v3203_v9 = vcombine.high %v37_v2, %v41_v5  ;;  %v3202_v10 = vcombine.low %v37_v2, %v41_v5  ;;  %v45_v12 = vld [vmem:[%s5984_s1 + $0x48] sm:$0xff]  ;;  %v46_v21 = vld [vmem:[%s5984_s1 + $0x50] sm:$0xff] }
   0x4   :  { %v48_v8 = vld [vmem:[%s5984_s1 + $0x60] sm:$0xff]  ;;  %v49_v13 = vld [vmem:[%s5984_s1 + $0x68] sm:$0xff]  ;;  %v3205_v19 = vcombine.high %v38_v15, %v42_v17  ;;  %v50_v22 = vld [vmem:[%s5984_s1 + $0x70] sm:$0xff]  ;;  %v3204_v25 = vcombine.low %v38_v15, %v42_v17 }
   0x5   :  { %v3209_v11 = vcombine.high %v44_v7, %v48_v8  ;;  %207 = vmatprep.subr.bf16.mxu0 %v3201_v4  ;;  %v3211_v14 = vcombine.high %v45_v12, %v49_v13  ;;  %280 = vmatprep.subr.bf16.mxu1 %v3203_v9  ;;  %v3208_v16 = vcombine.low %v44_v7, %v48_v8  ;;  %v3815_v20 = vld [vmem:[%s5985_s0] sm:$0xff]   ;;  %v39_v23 = vld [vmem:[%s5984_s1 + $0x18] sm:$0xff]  ;;  %v500_v35 = vld [vmem:[%s5986_s2 + $0x8] sm:$0xff] }
   0x6   :  { %208 = vmatpush1.bf16.msra.mxu0 %v3200_v6  ;;  %281 = vmatpush1.bf16.msra.mxu1 %v3202_v10  ;;  %v3210_v18 = vcombine.low %v45_v12, %v49_v13  ;;  %v43_v24 = vld [vmem:[%s5984_s1 + $0x38] sm:$0xff]  ;;  %v3213_v29 = vcombine.high %v46_v21, %v50_v22  ;;  %v499_v31 = vld [vmem:[%s5986_s2] sm:$0xff]  ;;  %v3212_v34 = vcombine.low %v46_v21, %v50_v22  ;;  %v504_v36 = vld [vmem:[%s5986_s2 + $0x28] sm:$0xff] }
   0x7   :  { %209 = vmatprep.subr.bf16.mxu0 %v3209_v11  ;;  %282 = vmatprep.subr.bf16.mxu1 %v3211_v14  ;;  %v3207_v26 = vcombine.high %v39_v23, %v43_v24  ;;  %v47_v27 = vld [vmem:[%s5984_s1 + $0x58] sm:$0xff]  ;;  %v3206_v30 = vcombine.low %v39_v23, %v43_v24  ;;  %v503_v32 = vld [vmem:[%s5986_s2 + $0x20] sm:$0xff]  ;;  %v3858_v39 = vld [vmem:[%s5985_s0 + $0x8] sm:$0xff]   ;;  %v3860_v40 = vcombine.high %v500_v35, %v504_v36 }
   0x8   :  { %v51_v28 = vld [vmem:[%s5984_s1 + $0x78] sm:$0xff]  ;;  %v3853_v37 = vcombine.high %v499_v31, %v503_v32  ;;  %v3873_v41 = vld [vmem:[%s5985_s0 + $0x10] sm:$0xff]   ;;  %v507_v43 = vld [vmem:[%s5986_s2 + $0x40] sm:$0xff]  ;;  %v3904_v47 = vcombine.low %v499_v31, %v503_v32  ;;  %v3906_v48 = vcombine.low %v500_v35, %v504_v36 }
   0x9   :  { %v3215_v33 = vcombine.high %v47_v27, %v51_v28  ;;  %v3214_v38 = vcombine.low %v47_v27, %v51_v28  ;;  %6266 = vst [vmem:[#allocation4_spill] sm:$0xff] %v3860_v40  ;;  %v3884_v42 = vld [vmem:[%s5985_s0 + $0x18] sm:$0xff]   ;;  %v511_v44 = vld [vmem:[%s5986_s2 + $0x60] sm:$0xff]  ;;  %v508_v45 = vld [vmem:[%s5986_s2 + $0x48] sm:$0xff] }
   0xa   :  { %210 = vmatpush1.bf16.msra.mxu0 %v3208_v16  ;;  %283 = vmatpush1.bf16.msra.mxu1 %v3210_v18  ;;  %6265 = vst [vmem:[#allocation3_spill] sm:$0xff] %v3853_v37  ;;  %v512_v46 = vld [vmem:[%s5986_s2 + $0x68] sm:$0xff]  ;;  %6267 = vst [vmem:[#allocation5_spill] sm:$0xff] %v3904_v47  ;;  %v3908_v49 = vcombine.high %v507_v43, %v511_v44  ;;  %v515_v51 = vld [vmem:[%s5986_s2 + $0x80] sm:$0xff]  ;;  %v3929_v55 = vcombine.low %v507_v43, %v511_v44 }
   0xb   :  { %353 = vmatprep.subr.bf16.mxu0 %v3205_v19  ;;  %426 = vmatprep.subr.bf16.mxu1 %v3207_v26  ;;  %6268 = vst [vmem:[#allocation6_spill] sm:$0xff] %v3906_v48  ;;  %v3910_v50 = vcombine.high %v508_v45, %v512_v46  ;;  %v519_v52 = vld [vmem:[%s5986_s2 + $0xa0] sm:$0xff]  ;;  %v516_v53 = vld [vmem:[%s5986_s2 + $0x88] sm:$0xff]  ;;  %v3933_v56 = vcombine.low %v508_v45, %v512_v46 }
   0xc   :  { %6269 = vst [vmem:[#allocation7_spill] sm:$0xff] %v3908_v49  ;;  %v520_v54 = vld [vmem:[%s5986_s2 + $0xa8] sm:$0xff]  ;;  %6271 = vst [vmem:[#allocation9_spill] sm:$0xff] %v3929_v55  ;;  %v3935_v57 = vcombine.high %v515_v51, %v519_v52  ;;  %v523_v59 = vld [vmem:[%s5986_s2 + $0xc0] sm:$0xff]  ;;  %v3955_v63 = vcombine.low %v515_v51, %v519_v52 }
   0xd   :  { %3216 = vmatmul.mubr.msk.bf16.vlgmr.msra.gmra.mrb[0].mxu0 %vm194_vm0, %v3815_v20  ;;  %3220 = vmatmul.mubr.msk.bf16.vlgmr.msra.gmra.mrb[0].mxu1 %vm194_vm0, %v3815_v20  ;;  %6270 = vst [vmem:[#allocation8_spill] sm:$0xff] %v3910_v50  ;;  %6272 = vst [vmem:[#allocation10_spill] sm:$0xff] %v3933_v56  ;;  %v3938_v58 = vcombine.high %v516_v53, %v520_v54  ;;  %v527_v60 = vld [vmem:[%s5986_s2 + $0xe0] sm:$0xff]  ;;  %v524_v61 = vld [vmem:[%s5986_s2 + $0xc8] sm:$0xff]  ;;  %v3959_v0 = vcombine.low %v516_v53, %v520_v54 }
   0xe   :  { %354 = vmatpush1.bf16.msra.mxu0 %v3204_v25  ;;  %249 = vmatprep.mubr.bf16.mxu0 %v5992_v3  ;;  %6273 = vst [vmem:[#allocation11_spill] sm:$0xff] %v3935_v57  ;;  %v528_v62 = vld [vmem:[%s5986_s2 + $0xe8] sm:$0xff]  ;;  %6275 = vst [vmem:[#allocation13_spill] sm:$0xff] %v3955_v63  ;;  %v3961_v1 = vcombine.high %v523_v59, %v527_v60  ;;  %v531_v4 = vld [vmem:[%s5986_s2 + $0x100] sm:$0xff]  ;;  %v3981_v8 = vcombine.low %v523_v59, %v527_v60 }
   0xf   :  { %322 = vmatprep.mubr.bf16.mxu1 %v5992_v3  ;;  %355 = vmatprep.subr.bf16.mxu0 %v3213_v29  ;;  %6274 = vst [vmem:[#allocation12_spill] sm:$0xff] %v3938_v58  ;;  %6276 = vst [vmem:[#allocation14_spill] sm:$0xff] %v3959_v0  ;;  %v3964_v2 = vcombine.high %v524_v61, %v528_v62  ;;  %v535_v5 = vld [vmem:[%s5986_s2 + $0x120] sm:$0xff]  ;;  %v532_v6 = vld [vmem:[%s5986_s2 + $0x108] sm:$0xff]  ;;  %v3987_v9 = vcombine.low %v524_v61, %v528_v62 }
  0x10   :  { %427 = vmatpush1.bf16.msra.mxu1 %v3206_v30  ;;  %6277 = vst [vmem:[#allocation15_spill] sm:$0xff] %v3961_v1  ;;  %v536_v7 = vld [vmem:[%s5986_s2 + $0x128] sm:$0xff]  ;;  %6279 = vst [vmem:[#allocation17_spill] sm:$0xff] %v3981_v8  ;;  %v3989_v10 = vcombine.high %v531_v4, %v535_v5  ;;  %v539_v12 = vld [vmem:[%s5986_s2 + $0x140] sm:$0xff]  ;;  %v4009_v16 = vcombine.low %v531_v4, %v535_v5 }
  0x11   :  { %428 = vmatprep.subr.bf16.mxu1 %v3215_v33  ;;  %6278 = vst [vmem:[#allocation16_spill] sm:$0xff] %v3964_v2  ;;  %6280 = vst [vmem:[#allocation18_spill] sm:$0xff] %v3987_v9  ;;  %v3992_v11 = vcombine.high %v532_v6, %v536_v7  ;;  %v543_v13 = vld [vmem:[%s5986_s2 + $0x160] sm:$0xff]  ;;  %v540_v14 = vld [vmem:[%s5986_s2 + $0x148] sm:$0xff]  ;;  %v4013_v17 = vcombine.low %v532_v6, %v536_v7 }
  0x12   :  { %356 = vmatpush1.bf16.msra.mxu0 %v3212_v34  ;;  %6281 = vst [vmem:[#allocation19_spill] sm:$0xff] %v3989_v10  ;;  %v544_v15 = vld [vmem:[%s5986_s2 + $0x168] sm:$0xff]  ;;  %6283 = vst [vmem:[#allocation21_spill] sm:$0xff] %v4009_v16  ;;  %v4015_v18 = vcombine.high %v539_v12, %v543_v13  ;;  %v551_v21 = vld [vmem:[%s5986_s2 + $0x1a0] sm:$0xff]  ;;  %v4035_v24 = vcombine.low %v539_v12, %v543_v13 }
  0x13   :  { %1267 = vmatprep.subr.bf16.mxu0 %v3853_v37  ;;  %6282 = vst [vmem:[#allocation20_spill] sm:$0xff] %v3992_v11  ;;  %6284 = vst [vmem:[#allocation22_spill] sm:$0xff] %v4013_v17  ;;  %v4018_v19 = vcombine.high %v540_v14, %v544_v15  ;;  %v548_v22 = vld [vmem:[%s5986_s2 + $0x188] sm:$0xff]  ;;  %v4041_v25 = vcombine.low %v540_v14, %v544_v15  ;;  %v555_v28 = vld [vmem:[%s5986_s2 + $0x1c0] sm:$0xff] }
  0x14   :  { %429 = vmatpush1.bf16.msra.mxu1 %v3214_v38  ;;  %6285 = vst [vmem:[#allocation23_spill] sm:$0xff] %v4015_v18  ;;  %v552_v23 = vld [vmem:[%s5986_s2 + $0x1a8] sm:$0xff]  ;;  %6287 = vst [vmem:[#allocation25_spill] sm:$0xff] %v4035_v24  ;;  %v559_v29 = vld [vmem:[%s5986_s2 + $0x1e0] sm:$0xff] }
  0x15   :  { %3217 = vmatmul.mubr.msk.bf16.gmra.mrb[4].mxu0 %vm194_vm0, %v3858_v39  ;;  %1308 = vmatprep.subr.bf16.mxu1 %v3860_v40  ;;  %6286 = vst [vmem:[#allocation24_spill] sm:$0xff] %v4018_v19  ;;  %6288 = vst [vmem:[#allocation26_spill] sm:$0xff] %v4041_v25  ;;  %v4046_v27 = vcombine.high %v548_v22, %v552_v23  ;;  %v556_v30 = vld [vmem:[%s5986_s2 + $0x1c8] sm:$0xff]  ;;  %v4067_v33 = vcombine.low %v548_v22, %v552_v23  ;;  %v563_v36 = vld [vmem:[%s5986_s2 + $0x200] sm:$0xff] }
  0x16   :  { %3221 = vmatmul.mubr.msk.bf16.gmra.mrb[4].mxu1 %vm194_vm0, %v3858_v39  ;;  %259 = vmatprep.mubr.bf16.mxu0 %v5992_v3  ;;  %v560_v31 = vld [vmem:[%s5986_s2 + $0x1e8] sm:$0xff]  ;;  %v4069_v34 = vcombine.high %v555_v28, %v559_v29  ;;  %v567_v38 = vld [vmem:[%s5986_s2 + $0x220] sm:$0xff]  ;;  %v4089_v43 = vcombine.low %v555_v28, %v559_v29 }
  0x17   :  { %332 = vmatprep.mubr.bf16.mxu1 %v5992_v3  ;;  %6290 = vst [vmem:[#allocation28_spill] sm:$0xff] %v4046_v27  ;;  %6292 = vst [vmem:[#allocation30_spill] sm:$0xff] %v4067_v33  ;;  %v4072_v35 = vcombine.high %v556_v30, %v560_v31  ;;  %v4095_v44 = vcombine.low %v556_v30, %v560_v31  ;;  %v4097_v45 = vcombine.high %v563_v36, %v567_v38  ;;  %v571_v51 = vld [vmem:[%s5986_s2 + $0x240] sm:$0xff]  ;;  %v572_v52 = vld [vmem:[%s5986_s2 + $0x248] sm:$0xff] }
  0x18   :  { %6293 = vst [vmem:[#allocation31_spill] sm:$0xff] %v4069_v34  ;;  %6295 = vst [vmem:[#allocation33_spill] sm:$0xff] %v4089_v43  ;;  %v576_v53 = vld [vmem:[%s5986_s2 + $0x268] sm:$0xff]  ;;  %v4117_v54 = vcombine.low %v563_v36, %v567_v38  ;;  %v579_v62 = vld [vmem:[%s5986_s2 + $0x280] sm:$0xff] }
  0x19   :  { %6294 = vst [vmem:[#allocation32_spill] sm:$0xff] %v4072_v35  ;;  %6296 = vst [vmem:[#allocation34_spill] sm:$0xff] %v4095_v44  ;;  %v4126_v61 = vcombine.high %v572_v52, %v576_v53  ;;  %v583_v4 = vld [vmem:[%s5986_s2 + $0x2a0] sm:$0xff]  ;;  %v580_v5 = vld [vmem:[%s5986_s2 + $0x288] sm:$0xff]  ;;  %v4145_v12 = vcombine.low %v572_v52, %v576_v53 }
  0x1a   :  { %6297 = vst [vmem:[#allocation35_spill] sm:$0xff] %v4097_v45  ;;  %6299 = vst [vmem:[#allocation37_spill] sm:$0xff] %v4117_v54  ;;  %v584_v6 = vld [vmem:[%s5986_s2 + $0x2a8] sm:$0xff]  ;;  %v4147_v13 = vcombine.high %v579_v62, %v583_v4  ;;  %v587_v15 = vld [vmem:[%s5986_s2 + $0x2c0] sm:$0xff]  ;;  %v4165_v23 = vcombine.low %v579_v62, %v583_v4 }
  0x1b   :  { %6302 = vst [vmem:[#allocation40_spill] sm:$0xff] %v4126_v61  ;;  %6304 = vst [vmem:[#allocation42_spill] sm:$0xff] %v4145_v12  ;;  %v4150_v14 = vcombine.high %v580_v5, %v584_v6  ;;  %v592_v22 = vld [vmem:[%s5986_s2 + $0x2e8] sm:$0xff]  ;;  %v4169_v28 = vcombine.low %v580_v5, %v584_v6  ;;  %v595_v31 = vld [vmem:[%s5986_s2 + $0x300] sm:$0xff] }
  0x1c   :  { %6305 = vst [vmem:[#allocation43_spill] sm:$0xff] %v4147_v13  ;;  %6307 = vst [vmem:[#allocation45_spill] sm:$0xff] %v4165_v23  ;;  %v599_v36 = vld [vmem:[%s5986_s2 + $0x320] sm:$0xff]  ;;  %v596_v38 = vld [vmem:[%s5986_s2 + $0x308] sm:$0xff] }
  0x1d   :  { %3218 = vmatmul.mubr.msk.bf16.gmra.mrb[8].mxu0 %vm194_vm0, %v3873_v41  ;;  %6306 = vst [vmem:[#allocation44_spill] sm:$0xff] %v4150_v14  ;;  %6308 = vst [vmem:[#allocation46_spill] sm:$0xff] %v4169_v28  ;;  %v603_v53 = vld [vmem:[%s5986_s2 + $0x340] sm:$0xff]  ;;  %v604_v4 = vld [vmem:[%s5986_s2 + $0x348] sm:$0xff]  ;;  %v4213_v6 = vcombine.low %v595_v31, %v599_v36 }
  0x1e   :  { %3222 = vmatmul.mubr.msk.bf16.gmra.mrb[8].mxu1 %vm194_vm0, %v3873_v41  ;;  %269 = vmatprep.mubr.bf16.mxu0 %v5992_v3  ;;  %v607_v62 = vld [vmem:[%s5986_s2 + $0x360] sm:$0xff]  ;;  %v608_v5 = vld [vmem:[%s5986_s2 + $0x368] sm:$0xff] }
  0x1f   :  { %342 = vmatprep.mubr.bf16.mxu1 %v5992_v3  ;;  %6315 = vst [vmem:[#allocation53_spill] sm:$0xff] %v4213_v6 }
  0x25   :  { %3219 = vmatmul.mubr.msk.bf16.gmra.mrb[12].mxu0 %vm194_vm0, %v3884_v42 }
  0x26   :  { %3223 = vmatmul.mubr.msk.bf16.gmra.mrb[12].mxu1 %vm194_vm0, %v3884_v42  ;;  %385 = vmatprep.mubr.bf16.mxu0 %v5992_v3 }
  0x27   :  { %458 = vmatprep.mubr.bf16.mxu1 %v5992_v3 }
  0x2d   :  { %3224 = vmatmul.mubr.msk.bf16.vlgmr.msra.gmra.mrb[16].mxu0 %vm194_vm0, %v3815_v20 }
  0x2e   :  { %3228 = vmatmul.mubr.msk.bf16.vlgmr.msra.gmra.mrb[16].mxu1 %vm194_vm0, %v3815_v20  ;;  %1268 = vmatpush1.bf16.msra.mxu0 %v3904_v47  ;;  %v547_v20 = vld [vmem:[%s5986_s2 + $0x180] sm:$0xff] }
  0x2f   :  { %1309 = vmatpush1.bf16.msra.mxu1 %v3906_v48  ;;  %1269 = vmatprep.subr.bf16.mxu0 %v3908_v49  ;;  %v4043_v26 = vcombine.high %v547_v20, %v551_v21  ;;  %v4063_v32 = vcombine.low %v547_v20, %v551_v21  ;;  %v591_v20 = vld [vmem:[%s5986_s2 + $0x2e0] sm:$0xff]  ;;  %v588_v21 = vld [vmem:[%s5986_s2 + $0x2c8] sm:$0xff] }
  0x30   :  { %1310 = vmatprep.subr.bf16.mxu1 %v3910_v50  ;;  %395 = vmatprep.mubr.bf16.mxu0 %v5992_v3  ;;  %v4171_v29 = vcombine.high %v587_v15, %v591_v20  ;;  %v4174_v30 = vcombine.high %v588_v21, %v592_v22 }
  0x31   :  { %468 = vmatprep.mubr.bf16.mxu1 %v5992_v3  ;;  %6289 = vst [vmem:[#allocation27_spill] sm:$0xff] %v4043_v26  ;;  %6291 = vst [vmem:[#allocation29_spill] sm:$0xff] %v4063_v32 }
  0x32   :  { %1270 = vmatpush1.bf16.msra.mxu0 %v3929_v55  ;;  %6309 = vst [vmem:[#allocation47_spill] sm:$0xff] %v4171_v29  ;;  %6310 = vst [vmem:[#allocation48_spill] sm:$0xff] %v4174_v30 }
  0x33   :  { %1311 = vmatpush1.bf16.msra.mxu1 %v3933_v56  ;;  %1271 = vmatprep.subr.bf16.mxu0 %v3935_v57 }
  0x34   :  { %1312 = vmatprep.subr.bf16.mxu1 %v3938_v58 }
  0x35   :  { %3225 = vmatmul.mubr.msk.bf16.gmra.mrb[20].mxu0 %vm194_vm0, %v3858_v39 }
  0x36   :  { %1272 = vmatpush1.bf16.msra.mxu0 %v3955_v63  ;;  %3229 = vmatmul.mubr.msk.bf16.gmra.mrb[20].mxu1 %vm194_vm0, %v3858_v39  ;;  %v564_v39 = vld [vmem:[%s5986_s2 + $0x208] sm:$0xff] }
  0x37   :  { %1313 = vmatpush1.bf16.msra.mxu1 %v3959_v0  ;;  %1273 = vmatprep.subr.bf16.mxu0 %v3961_v1 }
  0x38   :  { %1314 = vmatprep.subr.bf16.mxu1 %v3964_v2  ;;  %405 = vmatprep.mubr.bf16.mxu0 %v5992_v3 }
  0x39   :  { %478 = vmatprep.mubr.bf16.mxu1 %v5992_v3 }
  0x3a   :  { %1274 = vmatpush1.bf16.msra.mxu0 %v3981_v8 }
  0x3b   :  { %1315 = vmatpush1.bf16.msra.mxu1 %v3987_v9  ;;  %1275 = vmatprep.subr.bf16.mxu0 %v3989_v10 }
  0x3c   :  { %1316 = vmatprep.subr.bf16.mxu1 %v3992_v11 }
  0x3d   :  { %3226 = vmatmul.mubr.msk.bf16.gmra.mrb[24].mxu0 %vm194_vm0, %v3873_v41 }
  0x3e   :  { %1276 = vmatpush1.bf16.msra.mxu0 %v4009_v16  ;;  %3230 = vmatmul.mubr.msk.bf16.gmra.mrb[24].mxu1 %vm194_vm0, %v3873_v41  ;;  %v568_v41 = vld [vmem:[%s5986_s2 + $0x228] sm:$0xff] }
  0x3f   :  { %1317 = vmatpush1.bf16.msra.mxu1 %v4013_v17  ;;  %1277 = vmatprep.subr.bf16.mxu0 %v4015_v18  ;;  %v4100_v46 = vcombine.high %v564_v39, %v568_v41  ;;  %v4121_v59 = vcombine.low %v564_v39, %v568_v41  ;;  %v600_v39 = vld [vmem:[%s5986_s2 + $0x328] sm:$0xff]  ;;  %v4189_v41 = vcombine.low %v587_v15, %v591_v20 }
  0x40   :  { %1318 = vmatprep.subr.bf16.mxu1 %v4018_v19  ;;  %415 = vmatprep.mubr.bf16.mxu0 %v5992_v3  ;;  %v4198_v52 = vcombine.high %v596_v38, %v600_v39  ;;  %v4217_v15 = vcombine.low %v596_v38, %v600_v39  ;;  %v4219_v20 = vcombine.high %v603_v53, %v607_v62  ;;  %v616_v38 = vld [vmem:[%s5986_s2 + $0x3a8] sm:$0xff] }
  0x41   :  { %488 = vmatprep.mubr.bf16.mxu1 %v5992_v3  ;;  %6298 = vst [vmem:[#allocation36_spill] sm:$0xff] %v4100_v46  ;;  %6300 = vst [vmem:[#allocation38_spill] sm:$0xff] %v4121_v59  ;;  %v4237_v39 = vcombine.low %v603_v53, %v607_v62  ;;  %v623_v53 = vld [vmem:[%s5986_s2 + $0x3e0] sm:$0xff]  ;;  %v620_v62 = vld [vmem:[%s5986_s2 + $0x3c8] sm:$0xff] }
  0x42   :  { %1278 = vmatpush1.bf16.msra.mxu0 %v4035_v24  ;;  %6311 = vst [vmem:[#allocation49_spill] sm:$0xff] %v4189_v41  ;;  %6314 = vst [vmem:[#allocation52_spill] sm:$0xff] %v4198_v52 }
  0x43   :  { %1319 = vmatpush1.bf16.msra.mxu1 %v4041_v25  ;;  %1279 = vmatprep.subr.bf16.mxu0 %v4043_v26  ;;  %6316 = vst [vmem:[#allocation54_spill] sm:$0xff] %v4217_v15  ;;  %6317 = vst [vmem:[#allocation55_spill] sm:$0xff] %v4219_v20 }
  0x44   :  { %1320 = vmatprep.subr.bf16.mxu1 %v4046_v27  ;;  %6319 = vst [vmem:[#allocation57_spill] sm:$0xff] %v4237_v39 }
  0x45   :  { %3227 = vmatmul.mubr.msk.bf16.gmra.mrb[28].mxu0 %vm194_vm0, %v3884_v42 }
  0x46   :  { %1280 = vmatpush1.bf16.msra.mxu0 %v4063_v32  ;;  %3231 = vmatmul.mubr.msk.bf16.gmra.mrb[28].mxu1 %vm194_vm0, %v3884_v42  ;;  %v575_v42 = vld [vmem:[%s5986_s2 + $0x260] sm:$0xff] }
  0x47   :  { %1321 = vmatpush1.bf16.msra.mxu1 %v4067_v33  ;;  %1281 = vmatprep.subr.bf16.mxu0 %v4069_v34  ;;  %v4123_v60 = vcombine.high %v571_v51, %v575_v42  ;;  %v4141_v7 = vcombine.low %v571_v51, %v575_v42  ;;  %v4193_v51 = vcombine.low %v588_v21, %v592_v22  ;;  %v611_v22 = vld [vmem:[%s5986_s2 + $0x380] sm:$0xff] }
  0x48   :  { %1322 = vmatprep.subr.bf16.mxu1 %v4072_v35  ;;  %1299 = vmatprep.mubr.bf16.mxu0 %v5992_v3  ;;  %v4195_v42 = vcombine.high %v595_v31, %v599_v36  ;;  %v4222_v21 = vcombine.high %v604_v4, %v608_v5  ;;  %v615_v31 = vld [vmem:[%s5986_s2 + $0x3a0] sm:$0xff]  ;;  %v612_v36 = vld [vmem:[%s5986_s2 + $0x388] sm:$0xff] }
  0x49   :  { %1340 = vmatprep.mubr.bf16.mxu1 %v5992_v3  ;;  %6301 = vst [vmem:[#allocation39_spill] sm:$0xff] %v4123_v60  ;;  %6303 = vst [vmem:[#allocation41_spill] sm:$0xff] %v4141_v7  ;;  %v4241_v3 = vcombine.low %v604_v4, %v608_v5  ;;  %v624_v4 = vld [vmem:[%s5986_s2 + $0x3e8] sm:$0xff]  ;;  %v4261_v5 = vcombine.low %v611_v22, %v615_v31 }
  0x4a   :  { %1282 = vmatpush1.bf16.msra.mxu0 %v4089_v43  ;;  %6312 = vst [vmem:[#allocation50_spill] sm:$0xff] %v4193_v51  ;;  %6313 = vst [vmem:[#allocation51_spill] sm:$0xff] %v4195_v42 }
  0x4b   :  { %1323 = vmatpush1.bf16.msra.mxu1 %v4095_v44  ;;  %1283 = vmatprep.subr.bf16.mxu0 %v4097_v45  ;;  %6318 = vst [vmem:[#allocation56_spill] sm:$0xff] %v4222_v21  ;;  %6320 = vst [vmem:[#allocation58_spill] sm:$0xff] %v4241_v3 }
  0x4c   :  { %1324 = vmatprep.subr.bf16.mxu1 %v4100_v46  ;;  %6323 = vst [vmem:[#allocation61_spill] sm:$0xff] %v4261_v5 }
  0x4e   :  { %1284 = vmatpush1.bf16.msra.mxu0 %v4117_v54 }
  0x4f   :  { %1325 = vmatpush1.bf16.msra.mxu1 %v4121_v59  ;;  %1285 = vmatprep.subr.bf16.mxu0 %v4123_v60 }
  0x50   :  { %1326 = vmatprep.subr.bf16.mxu1 %v4126_v61 }
  0x52   :  { %1286 = vmatpush1.bf16.msra.mxu0 %v4141_v7 }
  0x53   :  { %1327 = vmatpush1.bf16.msra.mxu1 %v4145_v12  ;;  %1287 = vmatprep.subr.bf16.mxu0 %v4147_v13 }
  0x54   :  { %1328 = vmatprep.subr.bf16.mxu1 %v4150_v14 }
  0x56   :  { %1288 = vmatpush1.bf16.msra.mxu0 %v4165_v23 }
  0x57   :  { %1329 = vmatpush1.bf16.msra.mxu1 %v4169_v28  ;;  %1289 = vmatprep.subr.bf16.mxu0 %v4171_v29 }
  0x58   :  { %1330 = vmatprep.subr.bf16.mxu1 %v4174_v30 }
  0x5a   :  { %1290 = vmatpush1.bf16.msra.mxu0 %v4189_v41  ;;  %v525_v41 = vld [vmem:[%s5986_s2 + $0xd0] sm:$0xff] }
  0x5b   :  { %1331 = vmatpush1.bf16.msra.mxu1 %v4193_v51  ;;  %1291 = vmatprep.subr.bf16.mxu0 %v4195_v42  ;;  %v4246_v42 = vcombine.high %v612_v36, %v616_v38  ;;  %v619_v51 = vld [vmem:[%s5986_s2 + $0x3c0] sm:$0xff] }
  0x5c   :  { %1332 = vmatprep.subr.bf16.mxu1 %v4198_v52  ;;  %v4243_v52 = vcombine.high %v611_v22, %v615_v31  ;;  %v505_v22 = vld [vmem:[%s5986_s2 + $0x30] sm:$0xff]  ;;  %v502_v31 = vld [vmem:[%s5986_s2 + $0x18] sm:$0xff] }
  0x5d   :  { %6322 = vst [vmem:[#allocation60_spill] sm:$0xff] %v4246_v42 }
  0x5e   :  { %1292 = vmatpush1.bf16.msra.mxu0 %v4213_v6  ;;  %6321 = vst [vmem:[#allocation59_spill] sm:$0xff] %v4243_v52  ;;  %v501_v6 = vld [vmem:[%s5986_s2 + $0x10] sm:$0xff] }
  0x5f   :  { %1333 = vmatpush1.bf16.msra.mxu1 %v4217_v15  ;;  %1293 = vmatprep.subr.bf16.mxu0 %v4219_v20  ;;  %v4267_v20 = vcombine.high %v619_v51, %v623_v53  ;;  %v4270_v15 = vcombine.high %v620_v62, %v624_v4 }
  0x60   :  { %1334 = vmatprep.subr.bf16.mxu1 %v4222_v21  ;;  %v4265_v21 = vcombine.low %v612_v36, %v616_v38  ;;  %v506_v36 = vld [vmem:[%s5986_s2 + $0x38] sm:$0xff]  ;;  %v4285_v38 = vcombine.low %v619_v51, %v623_v53  ;;  %v513_v51 = vld [vmem:[%s5986_s2 + $0x70] sm:$0xff] }
  0x61   :  { %6325 = vst [vmem:[#allocation63_spill] sm:$0xff] %v4267_v20  ;;  %6326 = vst [vmem:[#allocation64_spill] sm:$0xff] %v4270_v15  ;;  %v510_v53 = vld [vmem:[%s5986_s2 + $0x58] sm:$0xff] }
  0x62   :  { %1294 = vmatpush1.bf16.msra.mxu0 %v4237_v39  ;;  %6324 = vst [vmem:[#allocation62_spill] sm:$0xff] %v4265_v21  ;;  %6327 = vst [vmem:[#allocation65_spill] sm:$0xff] %v4285_v38  ;;  %v509_v39 = vld [vmem:[%s5986_s2 + $0x50] sm:$0xff] }
  0x63   :  { %1335 = vmatpush1.bf16.msra.mxu1 %v4241_v3  ;;  %1295 = vmatprep.subr.bf16.mxu0 %v4243_v52  ;;  %v4291_v52 = vcombine.high %v501_v6, %v505_v22  ;;  %v4294_v3 = vcombine.high %v502_v31, %v506_v36 }
  0x64   :  { %1336 = vmatprep.subr.bf16.mxu1 %v4246_v42  ;;  %v4289_v42 = vcombine.low %v620_v62, %v624_v4  ;;  %v514_v62 = vld [vmem:[%s5986_s2 + $0x78] sm:$0xff]  ;;  %v4309_v4 = vcombine.low %v501_v6, %v505_v22  ;;  %v521_v6 = vld [vmem:[%s5986_s2 + $0xb0] sm:$0xff]  ;;  %v6335_v22 = vmov 0  }
  0x65   :  { %6329 = vst [vmem:[#allocation67_spill] sm:$0xff] %v4291_v52  ;;  %6330 = vst [vmem:[#allocation68_spill] sm:$0xff] %v4294_v3 }
  0x66   :  { %1296 = vmatpush1.bf16.msra.mxu0 %v4261_v5  ;;  %6328 = vst [vmem:[#allocation66_spill] sm:$0xff] %v4289_v42  ;;  %6331 = vst [vmem:[#allocation69_spill] sm:$0xff] %v4309_v4  ;;  %v517_v5 = vld [vmem:[%s5986_s2 + $0x90] sm:$0xff] }
  0x67   :  { %1337 = vmatpush1.bf16.msra.mxu1 %v4265_v21  ;;  %1297 = vmatprep.subr.bf16.mxu0 %v4267_v20  ;;  %v4315_v20 = vcombine.high %v509_v39, %v513_v51  ;;  %v4318_v21 = vcombine.high %v510_v53, %v514_v62 }
  0x68   :  { %1338 = vmatprep.subr.bf16.mxu1 %v4270_v15  ;;  %v4313_v15 = vcombine.low %v502_v31, %v506_v36  ;;  %v518_v31 = vld [vmem:[%s5986_s2 + $0x98] sm:$0xff] }
  0x69   :  { %6333 = vst [vmem:[#allocation71_spill] sm:$0xff] %v4315_v20  ;;  %6334 = vst [vmem:[#allocation72_spill] sm:$0xff] %v4318_v21  ;;  %v522_v36 = vld [vmem:[%s5986_s2 + $0xb8] sm:$0xff] }
  0x6a   :  { %1298 = vmatpush1.bf16.msra.mxu0 %v4285_v38  ;;  %6332 = vst [vmem:[#allocation70_spill] sm:$0xff] %v4313_v15  ;;  %v4344_v38 = vcombine.high %v518_v31, %v522_v36 }
  0x6b   :  { %1339 = vmatpush1.bf16.msra.mxu1 %v4289_v42  ;;  %1349 = vmatprep.subr.bf16.mxu0 %v4291_v52  ;;  %v4339_v52 = vcombine.low %v510_v53, %v514_v62  ;;  %v4341_v42 = vcombine.high %v517_v5, %v521_v6  ;;  %v530_v53 = vld [vmem:[%s5986_s2 + $0xf8] sm:$0xff]  ;;  %v4361_v62 = vcombine.low %v517_v5, %v521_v6  ;;  %v537_v5 = vld [vmem:[%s5986_s2 + $0x130] sm:$0xff] }
  0x6c   :  { %1390 = vmatprep.subr.bf16.mxu1 %v4294_v3  ;;  %v4335_v3 = vcombine.low %v509_v39, %v513_v51  ;;  %6339 = vst [vmem:[#allocation76_spill] sm:$0xff] %v4344_v38  ;;  %v529_v39 = vld [vmem:[%s5986_s2 + $0xf0] sm:$0xff]  ;;  %v526_v51 = vld [vmem:[%s5986_s2 + $0xd8] sm:$0xff] }
  0x6d   :  { %1300 = vmatmul.mubr.bf16.vlgmr.msra.gmra.mrb[32].mxu0 %v6335_v22  ;;  %6337 = vst [vmem:[#allocation74_spill] sm:$0xff] %v4339_v52  ;;  %6338 = vst [vmem:[#allocation75_spill] sm:$0xff] %v4341_v42  ;;  %v534_v6 = vld [vmem:[%s5986_s2 + $0x118] sm:$0xff] }
  0x6e   :  { %1341 = vmatmul.mubr.bf16.vlgmr.msra.gmra.mrb[32].mxu1 %v6335_v22  ;;  %1350 = vmatpush1.bf16.msra.mxu0 %v4309_v4  ;;  %6336 = vst [vmem:[#allocation73_spill] sm:$0xff] %v4335_v3  ;;  %6340 = vst [vmem:[#allocation77_spill] sm:$0xff] %v4361_v62  ;;  %v533_v4 = vld [vmem:[%s5986_s2 + $0x110] sm:$0xff] }
  0x6f   :  { %1391 = vmatpush1.bf16.msra.mxu1 %v4313_v15  ;;  %1351 = vmatprep.subr.bf16.mxu0 %v4315_v20  ;;  %v4367_v20 = vcombine.high %v525_v41, %v529_v39  ;;  %v4370_v15 = vcombine.high %v526_v51, %v530_v53 }
  0x70   :  { %1392 = vmatprep.subr.bf16.mxu1 %v4318_v21  ;;  %1381 = vmatprep.mubr.bf16.mxu0 %v6335_v22  ;;  %v4365_v21 = vcombine.low %v518_v31, %v522_v36  ;;  %v538_v31 = vld [vmem:[%s5986_s2 + $0x138] sm:$0xff]  ;;  %v4385_v36 = vcombine.low %v525_v41, %v529_v39  ;;  %v545_v41 = vld [vmem:[%s5986_s2 + $0x170] sm:$0xff] }
  0x71   :  { %1422 = vmatprep.mubr.bf16.mxu1 %v6335_v22  ;;  %6342 = vst [vmem:[#allocation79_spill] sm:$0xff] %v4367_v20  ;;  %6343 = vst [vmem:[#allocation80_spill] sm:$0xff] %v4370_v15  ;;  %v542_v39 = vld [vmem:[%s5986_s2 + $0x158] sm:$0xff] }
  0x72   :  { %1352 = vmatpush1.bf16.msra.mxu0 %v4335_v3  ;;  %6341 = vst [vmem:[#allocation78_spill] sm:$0xff] %v4365_v21  ;;  %6344 = vst [vmem:[#allocation81_spill] sm:$0xff] %v4385_v36  ;;  %v541_v3 = vld [vmem:[%s5986_s2 + $0x150] sm:$0xff] }
  0x73   :  { %1393 = vmatpush1.bf16.msra.mxu1 %v4339_v52  ;;  %1353 = vmatprep.subr.bf16.mxu0 %v4341_v42  ;;  %v4391_v42 = vcombine.high %v533_v4, %v537_v5  ;;  %v4394_v52 = vcombine.high %v534_v6, %v538_v31 }
  0x74   :  { %1394 = vmatprep.subr.bf16.mxu1 %v4344_v38  ;;  %v4389_v38 = vcombine.low %v526_v51, %v530_v53  ;;  %v546_v51 = vld [vmem:[%s5986_s2 + $0x178] sm:$0xff]  ;;  %v4409_v53 = vcombine.low %v533_v4, %v537_v5  ;;  %v553_v4 = vld [vmem:[%s5986_s2 + $0x1b0] sm:$0xff] }
  0x75   :  { %6346 = vst [vmem:[#allocation83_spill] sm:$0xff] %v4391_v42  ;;  %6347 = vst [vmem:[#allocation84_spill] sm:$0xff] %v4394_v52  ;;  %v550_v5 = vld [vmem:[%s5986_s2 + $0x198] sm:$0xff] }
  0x76   :  { %1354 = vmatpush1.bf16.msra.mxu0 %v4361_v62  ;;  %6345 = vst [vmem:[#allocation82_spill] sm:$0xff] %v4389_v38  ;;  %6348 = vst [vmem:[#allocation85_spill] sm:$0xff] %v4409_v53  ;;  %v549_v62 = vld [vmem:[%s5986_s2 + $0x190] sm:$0xff] }
  0x77   :  { %1395 = vmatpush1.bf16.msra.mxu1 %v4365_v21  ;;  %1355 = vmatprep.subr.bf16.mxu0 %v4367_v20  ;;  %v4415_v20 = vcombine.high %v541_v3, %v545_v41  ;;  %v4418_v21 = vcombine.high %v542_v39, %v546_v51 }
  0x78   :  { %1396 = vmatprep.subr.bf16.mxu1 %v4370_v15  ;;  %v4413_v15 = vcombine.low %v534_v6, %v538_v31  ;;  %v554_v6 = vld [vmem:[%s5986_s2 + $0x1b8] sm:$0xff]  ;;  %v4433_v31 = vcombine.low %v541_v3, %v545_v41  ;;  %v561_v3 = vld [vmem:[%s5986_s2 + $0x1f0] sm:$0xff] }
  0x79   :  { %6350 = vst [vmem:[#allocation87_spill] sm:$0xff] %v4415_v20  ;;  %6351 = vst [vmem:[#allocation88_spill] sm:$0xff] %v4418_v21  ;;  %v558_v41 = vld [vmem:[%s5986_s2 + $0x1d8] sm:$0xff] }
  0x7a   :  { %1356 = vmatpush1.bf16.msra.mxu0 %v4385_v36  ;;  %6349 = vst [vmem:[#allocation86_spill] sm:$0xff] %v4413_v15  ;;  %6352 = vst [vmem:[#allocation89_spill] sm:$0xff] %v4433_v31  ;;  %v557_v36 = vld [vmem:[%s5986_s2 + $0x1d0] sm:$0xff] }
  0x7b   :  { %1397 = vmatpush1.bf16.msra.mxu1 %v4389_v38  ;;  %1357 = vmatprep.subr.bf16.mxu0 %v4391_v42  ;;  %v4439_v42 = vcombine.high %v549_v62, %v553_v4  ;;  %v4442_v38 = vcombine.high %v550_v5, %v554_v6 }
  0x7c   :  { %1398 = vmatprep.subr.bf16.mxu1 %v4394_v52  ;;  %v4437_v52 = vcombine.low %v542_v39, %v546_v51  ;;  %v562_v39 = vld [vmem:[%s5986_s2 + $0x1f8] sm:$0xff]  ;;  %v4457_v51 = vcombine.low %v549_v62, %v553_v4  ;;  %v569_v62 = vld [vmem:[%s5986_s2 + $0x230] sm:$0xff] }
  0x7d   :  { %6354 = vst [vmem:[#allocation91_spill] sm:$0xff] %v4439_v42  ;;  %6355 = vst [vmem:[#allocation92_spill] sm:$0xff] %v4442_v38  ;;  %v566_v4 = vld [vmem:[%s5986_s2 + $0x218] sm:$0xff] }
  0x7e   :  { %1358 = vmatpush1.bf16.msra.mxu0 %v4409_v53  ;;  %6353 = vst [vmem:[#allocation90_spill] sm:$0xff] %v4437_v52  ;;  %6356 = vst [vmem:[#allocation93_spill] sm:$0xff] %v4457_v51  ;;  %v565_v53 = vld [vmem:[%s5986_s2 + $0x210] sm:$0xff] }
  0x7f   :  { %1399 = vmatpush1.bf16.msra.mxu1 %v4413_v15  ;;  %1359 = vmatprep.subr.bf16.mxu0 %v4415_v20  ;;  %v4463_v20 = vcombine.high %v557_v36, %v561_v3  ;;  %v4466_v15 = vcombine.high %v558_v41, %v562_v39 }
  0x80   :  { %1400 = vmatprep.subr.bf16.mxu1 %v4418_v21  ;;  %v4461_v21 = vcombine.low %v550_v5, %v554_v6  ;;  %v570_v5 = vld [vmem:[%s5986_s2 + $0x238] sm:$0xff]  ;;  %v4481_v6 = vcombine.low %v557_v36, %v561_v3  ;;  %v577_v36 = vld [vmem:[%s5986_s2 + $0x270] sm:$0xff] }
  0x81   :  { %6358 = vst [vmem:[#allocation95_spill] sm:$0xff] %v4463_v20  ;;  %6359 = vst [vmem:[#allocation96_spill] sm:$0xff] %v4466_v15  ;;  %v574_v3 = vld [vmem:[%s5986_s2 + $0x258] sm:$0xff] }
  0x82   :  { %1360 = vmatpush1.bf16.msra.mxu0 %v4433_v31  ;;  %6357 = vst [vmem:[#allocation94_spill] sm:$0xff] %v4461_v21  ;;  %6360 = vst [vmem:[#allocation97_spill] sm:$0xff] %v4481_v6  ;;  %v573_v31 = vld [vmem:[%s5986_s2 + $0x250] sm:$0xff] }
  0x83   :  { %1401 = vmatpush1.bf16.msra.mxu1 %v4437_v52  ;;  %1361 = vmatprep.subr.bf16.mxu0 %v4439_v42  ;;  %v4487_v42 = vcombine.high %v565_v53, %v569_v62  ;;  %v4490_v52 = vcombine.high %v566_v4, %v570_v5 }
  0x84   :  { %1402 = vmatprep.subr.bf16.mxu1 %v4442_v38  ;;  %v4485_v38 = vcombine.low %v558_v41, %v562_v39  ;;  %v578_v41 = vld [vmem:[%s5986_s2 + $0x278] sm:$0xff]  ;;  %v4505_v39 = vcombine.low %v565_v53, %v569_v62  ;;  %v585_v53 = vld [vmem:[%s5986_s2 + $0x2b0] sm:$0xff] }
  0x85   :  { %6362 = vst [vmem:[#allocation99_spill] sm:$0xff] %v4487_v42  ;;  %6363 = vst [vmem:[#allocation100_spill] sm:$0xff] %v4490_v52  ;;  %v582_v62 = vld [vmem:[%s5986_s2 + $0x298] sm:$0xff] }
  0x86   :  { %1362 = vmatpush1.bf16.msra.mxu0 %v4457_v51  ;;  %6361 = vst [vmem:[#allocation98_spill] sm:$0xff] %v4485_v38  ;;  %6364 = vst [vmem:[#allocation101_spill] sm:$0xff] %v4505_v39  ;;  %v581_v51 = vld [vmem:[%s5986_s2 + $0x290] sm:$0xff] }
  0x87   :  { %1403 = vmatpush1.bf16.msra.mxu1 %v4461_v21  ;;  %1363 = vmatprep.subr.bf16.mxu0 %v4463_v20  ;;  %v4511_v20 = vcombine.high %v573_v31, %v577_v36  ;;  %v4514_v21 = vcombine.high %v574_v3, %v578_v41 }
  0x88   :  { %1404 = vmatprep.subr.bf16.mxu1 %v4466_v15  ;;  %v4509_v15 = vcombine.low %v566_v4, %v570_v5  ;;  %v586_v4 = vld [vmem:[%s5986_s2 + $0x2b8] sm:$0xff]  ;;  %v4529_v5 = vcombine.low %v573_v31, %v577_v36  ;;  %v593_v31 = vld [vmem:[%s5986_s2 + $0x2f0] sm:$0xff] }
  0x89   :  { %6366 = vst [vmem:[#allocation103_spill] sm:$0xff] %v4511_v20  ;;  %6367 = vst [vmem:[#allocation104_spill] sm:$0xff] %v4514_v21  ;;  %v590_v36 = vld [vmem:[%s5986_s2 + $0x2d8] sm:$0xff] }
  0x8a   :  { %1364 = vmatpush1.bf16.msra.mxu0 %v4481_v6  ;;  %6365 = vst [vmem:[#allocation102_spill] sm:$0xff] %v4509_v15  ;;  %6368 = vst [vmem:[#allocation105_spill] sm:$0xff] %v4529_v5  ;;  %v589_v6 = vld [vmem:[%s5986_s2 + $0x2d0] sm:$0xff] }
  0x8b   :  { %1405 = vmatpush1.bf16.msra.mxu1 %v4485_v38  ;;  %1365 = vmatprep.subr.bf16.mxu0 %v4487_v42  ;;  %v4535_v42 = vcombine.high %v581_v51, %v585_v53  ;;  %v4538_v38 = vcombine.high %v582_v62, %v586_v4 }
  0x8c   :  { %1406 = vmatprep.subr.bf16.mxu1 %v4490_v52  ;;  %v4533_v52 = vcombine.low %v574_v3, %v578_v41  ;;  %v594_v3 = vld [vmem:[%s5986_s2 + $0x2f8] sm:$0xff]  ;;  %v4553_v41 = vcombine.low %v581_v51, %v585_v53  ;;  %v601_v51 = vld [vmem:[%s5986_s2 + $0x330] sm:$0xff] }
  0x8d   :  { %6370 = vst [vmem:[#allocation107_spill] sm:$0xff] %v4535_v42  ;;  %6371 = vst [vmem:[#allocation108_spill] sm:$0xff] %v4538_v38  ;;  %v598_v53 = vld [vmem:[%s5986_s2 + $0x318] sm:$0xff] }
  0x8e   :  { %1366 = vmatpush1.bf16.msra.mxu0 %v4505_v39  ;;  %6369 = vst [vmem:[#allocation106_spill] sm:$0xff] %v4533_v52  ;;  %6372 = vst [vmem:[#allocation109_spill] sm:$0xff] %v4553_v41  ;;  %v597_v39 = vld [vmem:[%s5986_s2 + $0x310] sm:$0xff] }
  0x8f   :  { %1407 = vmatpush1.bf16.msra.mxu1 %v4509_v15  ;;  %1367 = vmatprep.subr.bf16.mxu0 %v4511_v20  ;;  %v4559_v20 = vcombine.high %v589_v6, %v593_v31  ;;  %v4562_v15 = vcombine.high %v590_v36, %v594_v3 }
  0x90   :  { %1408 = vmatprep.subr.bf16.mxu1 %v4514_v21  ;;  %v4557_v21 = vcombine.low %v582_v62, %v586_v4  ;;  %v602_v62 = vld [vmem:[%s5986_s2 + $0x338] sm:$0xff]  ;;  %v4577_v4 = vcombine.low %v589_v6, %v593_v31  ;;  %v609_v6 = vld [vmem:[%s5986_s2 + $0x370] sm:$0xff] }
  0x91   :  { %6374 = vst [vmem:[#allocation111_spill] sm:$0xff] %v4559_v20  ;;  %6375 = vst [vmem:[#allocation112_spill] sm:$0xff] %v4562_v15  ;;  %v606_v31 = vld [vmem:[%s5986_s2 + $0x358] sm:$0xff] }
  0x92   :  { %1368 = vmatpush1.bf16.msra.mxu0 %v4529_v5  ;;  %6373 = vst [vmem:[#allocation110_spill] sm:$0xff] %v4557_v21  ;;  %6376 = vst [vmem:[#allocation113_spill] sm:$0xff] %v4577_v4  ;;  %v605_v5 = vld [vmem:[%s5986_s2 + $0x350] sm:$0xff] }
  0x93   :  { %1409 = vmatpush1.bf16.msra.mxu1 %v4533_v52  ;;  %1369 = vmatprep.subr.bf16.mxu0 %v4535_v42  ;;  %v4583_v42 = vcombine.high %v597_v39, %v601_v51  ;;  %v4586_v52 = vcombine.high %v598_v53, %v602_v62 }
  0x94   :  { %1410 = vmatprep.subr.bf16.mxu1 %v4538_v38  ;;  %v4581_v38 = vcombine.low %v590_v36, %v594_v3  ;;  %v610_v36 = vld [vmem:[%s5986_s2 + $0x378] sm:$0xff]  ;;  %v4601_v3 = vcombine.low %v597_v39, %v601_v51  ;;  %v617_v39 = vld [vmem:[%s5986_s2 + $0x3b0] sm:$0xff] }
  0x95   :  { %6378 = vst [vmem:[#allocation115_spill] sm:$0xff] %v4583_v42  ;;  %6379 = vst [vmem:[#allocation116_spill] sm:$0xff] %v4586_v52  ;;  %v614_v51 = vld [vmem:[%s5986_s2 + $0x398] sm:$0xff] }
  0x96   :  { %1370 = vmatpush1.bf16.msra.mxu0 %v4553_v41  ;;  %6377 = vst [vmem:[#allocation114_spill] sm:$0xff] %v4581_v38  ;;  %6380 = vst [vmem:[#allocation117_spill] sm:$0xff] %v4601_v3  ;;  %v613_v41 = vld [vmem:[%s5986_s2 + $0x390] sm:$0xff] }
  0x97   :  { %1411 = vmatpush1.bf16.msra.mxu1 %v4557_v21  ;;  %1371 = vmatprep.subr.bf16.mxu0 %v4559_v20  ;;  %v4607_v20 = vcombine.high %v605_v5, %v609_v6  ;;  %v4610_v21 = vcombine.high %v606_v31, %v610_v36 }
  0x98   :  { %1412 = vmatprep.subr.bf16.mxu1 %v4562_v15  ;;  %v4605_v15 = vcombine.low %v598_v53, %v602_v62  ;;  %v618_v53 = vld [vmem:[%s5986_s2 + $0x3b8] sm:$0xff]  ;;  %v4625_v62 = vcombine.low %v605_v5, %v609_v6  ;;  %v625_v5 = vld [vmem:[%s5986_s2 + $0x3f0] sm:$0xff] }
  0x99   :  { %6382 = vst [vmem:[#allocation119_spill] sm:$0xff] %v4607_v20  ;;  %6383 = vst [vmem:[#allocation120_spill] sm:$0xff] %v4610_v21  ;;  %v622_v6 = vld [vmem:[%s5986_s2 + $0x3d8] sm:$0xff] }
  0x9a   :  { %1372 = vmatpush1.bf16.msra.mxu0 %v4577_v4  ;;  %6381 = vst [vmem:[#allocation118_spill] sm:$0xff] %v4605_v15  ;;  %6384 = vst [vmem:[#allocation121_spill] sm:$0xff] %v4625_v62  ;;  %v621_v4 = vld [vmem:[%s5986_s2 + $0x3d0] sm:$0xff] }
  0x9b   :  { %1413 = vmatpush1.bf16.msra.mxu1 %v4581_v38  ;;  %1373 = vmatprep.subr.bf16.mxu0 %v4583_v42  ;;  %v4631_v42 = vcombine.high %v613_v41, %v617_v39  ;;  %v4634_v38 = vcombine.high %v614_v51, %v618_v53 }
  0x9c   :  { %1414 = vmatprep.subr.bf16.mxu1 %v4586_v52  ;;  %v4629_v52 = vcombine.low %v606_v31, %v610_v36  ;;  %v626_v31 = vld [vmem:[%s5986_s2 + $0x3f8] sm:$0xff]  ;;  %v4649_v36 = vcombine.low %v613_v41, %v617_v39 }
  0x9d   :  { %6386 = vst [vmem:[#allocation123_spill] sm:$0xff] %v4631_v42  ;;  %6387 = vst [vmem:[#allocation124_spill] sm:$0xff] %v4634_v38  ;;  %v4665_v41 = vcombine.low %v622_v6, %v626_v31  ;;  %v6395_v39 = vld [vmem:[#allocation49_spill] sm:$0xff] }
  0x9e   :  { %1374 = vmatpush1.bf16.msra.mxu0 %v4601_v3  ;;  %6385 = vst [vmem:[#allocation122_spill] sm:$0xff] %v4629_v52  ;;  %6388 = vst [vmem:[#allocation125_spill] sm:$0xff] %v4649_v36  ;;  %v4661_v3 = vcombine.low %v621_v4, %v625_v5 }
  0x9f   :  { %1415 = vmatpush1.bf16.msra.mxu1 %v4605_v15  ;;  %1375 = vmatprep.subr.bf16.mxu0 %v4607_v20  ;;  %v4655_v20 = vcombine.high %v621_v4, %v625_v5  ;;  %v4658_v15 = vcombine.high %v622_v6, %v626_v31  ;;  %6393 = vst [vmem:[#allocation130_spill] sm:$0xff] %v4665_v41  ;;  %v6398_v6 = vld [vmem:[#allocation52_spill] sm:$0xff] }
  0xa0   :  { %1416 = vmatprep.subr.bf16.mxu1 %v4610_v21  ;;  %v4653_v21 = vcombine.low %v614_v51, %v618_v53  ;;  %6392 = vst [vmem:[#allocation129_spill] sm:$0xff] %v4661_v3  ;;  %v6396_v51 = vld [vmem:[#allocation50_spill] sm:$0xff]  ;;  %v6397_v53 = vld [vmem:[#allocation51_spill] sm:$0xff]  ;;  %v6402_v31 = vld [vmem:[#allocation56_spill] sm:$0xff] }
  0xa1   :  { %6390 = vst [vmem:[#allocation127_spill] sm:$0xff] %v4655_v20  ;;  %6391 = vst [vmem:[#allocation128_spill] sm:$0xff] %v4658_v15 }
  0xa2   :  { %1376 = vmatpush1.bf16.msra.mxu0 %v4625_v62  ;;  %6389 = vst [vmem:[#allocation126_spill] sm:$0xff] %v4653_v21 }
  0xa3   :  { %1417 = vmatpush1.bf16.msra.mxu1 %v4629_v52  ;;  %1377 = vmatprep.subr.bf16.mxu0 %v4631_v42 }
  0xa4   :  { %1418 = vmatprep.subr.bf16.mxu1 %v4634_v38 }
  0xa6   :  { %1378 = vmatpush1.bf16.msra.mxu0 %v4649_v36 }
  0xa7   :  { %1419 = vmatpush1.bf16.msra.mxu1 %v4653_v21  ;;  %1379 = vmatprep.subr.bf16.mxu0 %v4655_v20 }
  0xa8   :  { %1420 = vmatprep.subr.bf16.mxu1 %v4658_v15 }
  0xaa   :  { %1380 = vmatpush1.bf16.msra.mxu0 %v4661_v3 }
  0xab   :  { %1421 = vmatpush1.bf16.msra.mxu1 %v4665_v41  ;;  %1503 = vmatprep.subr.bf16.mxu0 %v3853_v37 }
  0xac   :  { %1544 = vmatprep.subr.bf16.mxu1 %v3860_v40 }
  0xad   :  { %1382 = vmatmul.mubr.bf16.vlgmr.msra.gmra.mrb[36].mxu0 %v6335_v22 }
  0xae   :  { %1423 = vmatmul.mubr.bf16.vlgmr.msra.gmra.mrb[36].mxu1 %v6335_v22  ;;  %1504 = vmatpush1.bf16.msra.mxu0 %v3904_v47  ;;  %v54_v22 = vlaneseq }
  0xaf   :  { %1545 = vmatpush1.bf16.msra.mxu1 %v3906_v48  ;;  %1505 = vmatprep.subr.bf16.mxu0 %v3908_v49 }
  0xb0   :  { %1546 = vmatprep.subr.bf16.mxu1 %v3910_v50  ;;  %v4718_v4 = vshrl.u32 %v54_v22, 7 }
  0xb2   :  { %1506 = vmatpush1.bf16.msra.mxu0 %v3929_v55  ;;  %6394 = vst [vmem:[#allocation131_spill] sm:$0xff] %v4718_v4  ;;  %v64_v5 = vsub.s32 2, %v4718_v4 }
  0xb3   :  { %1547 = vmatpush1.bf16.msra.mxu1 %v3933_v56  ;;  %1507 = vmatprep.subr.bf16.mxu0 %v3935_v57 }
  0xb4   :  { %1548 = vmatprep.subr.bf16.mxu1 %v3938_v58 }
  0xb6   :  { %1508 = vmatpush1.bf16.msra.mxu0 %v3955_v63 }
  0xb7   :  { %1549 = vmatpush1.bf16.msra.mxu1 %v3959_v0  ;;  %1509 = vmatprep.subr.bf16.mxu0 %v3961_v1 }
  0xb8   :  { %1550 = vmatprep.subr.bf16.mxu1 %v3964_v2 }
  0xba   :  { %1510 = vmatpush1.bf16.msra.mxu0 %v3981_v8 }
  0xbb   :  { %1551 = vmatpush1.bf16.msra.mxu1 %v3987_v9  ;;  %1511 = vmatprep.subr.bf16.mxu0 %v3989_v10 }
  0xbc   :  { %1552 = vmatprep.subr.bf16.mxu1 %v3992_v11 }
  0xbe   :  { %1512 = vmatpush1.bf16.msra.mxu0 %v4009_v16 }
  0xbf   :  { %1553 = vmatpush1.bf16.msra.mxu1 %v4013_v17  ;;  %1513 = vmatprep.subr.bf16.mxu0 %v4015_v18 }
  0xc0   :  { %1554 = vmatprep.subr.bf16.mxu1 %v4018_v19 }
  0xc2   :  { %1514 = vmatpush1.bf16.msra.mxu0 %v4035_v24 }
  0xc3   :  { %1555 = vmatpush1.bf16.msra.mxu1 %v4041_v25  ;;  %1515 = vmatprep.subr.bf16.mxu0 %v4043_v26 }
  0xc4   :  { %1556 = vmatprep.subr.bf16.mxu1 %v4046_v27 }
  0xc6   :  { %1516 = vmatpush1.bf16.msra.mxu0 %v4063_v32 }
  0xc7   :  { %1557 = vmatpush1.bf16.msra.mxu1 %v4067_v33  ;;  %1517 = vmatprep.subr.bf16.mxu0 %v4069_v34 }
  0xc8   :  { %1558 = vmatprep.subr.bf16.mxu1 %v4072_v35 }
  0xca   :  { %1518 = vmatpush1.bf16.msra.mxu0 %v4089_v43 }
  0xcb   :  { %1559 = vmatpush1.bf16.msra.mxu1 %v4095_v44  ;;  %1519 = vmatprep.subr.bf16.mxu0 %v4097_v45  ;;  %v6415_v45 = vld [vmem:[#allocation63_spill] sm:$0xff] }
  0xcc   :  { %1560 = vmatprep.subr.bf16.mxu1 %v4100_v46  ;;  %v6411_v46 = vld [vmem:[#allocation60_spill] sm:$0xff]  ;;  %v6424_v44 = vld [vmem:[#allocation67_spill] sm:$0xff] }
  0xce   :  { %1520 = vmatpush1.bf16.msra.mxu0 %v4117_v54 }
  0xcf   :  { %1561 = vmatpush1.bf16.msra.mxu1 %v4121_v59  ;;  %1521 = vmatprep.subr.bf16.mxu0 %v4123_v60  ;;  %v6407_v60 = vld [vmem:[#allocation58_spill] sm:$0xff]  ;;  %v6408_v59 = vld [vmem:[#allocation59_spill] sm:$0xff] }
  0xd0   :  { %1562 = vmatprep.subr.bf16.mxu1 %v4126_v61 }
  0xd2   :  { %1522 = vmatpush1.bf16.msra.mxu0 %v4141_v7 }
  0xd3   :  { %1563 = vmatpush1.bf16.msra.mxu1 %v4145_v12  ;;  %1523 = vmatprep.subr.bf16.mxu0 %v4147_v13 }
  0xd4   :  { %1564 = vmatprep.subr.bf16.mxu1 %v4150_v14 }
  0xd6   :  { %1524 = vmatpush1.bf16.msra.mxu0 %v4165_v23  ;;  %v6403_v23 = vsub.s32 0, %v4718_v4 }
  0xd7   :  { %1565 = vmatpush1.bf16.msra.mxu1 %v4169_v28  ;;  %1525 = vmatprep.subr.bf16.mxu0 %v4171_v29  ;;  %v68_v28 = vsub.s32 3, %v4718_v4 }
  0xd8   :  { %1566 = vmatprep.subr.bf16.mxu1 %v4174_v30  ;;  %v4730_v30 = vld [vmem:[%s5987_s3] sm:$0xff] }
  0xd9   :  { %v4745_v14 = vrot.slane %v4730_v30, %v6403_v23 }
  0xda   :  { %1526 = vmatpush1.bf16.msra.mxu0 %v6395_v39  ;;  %v6399_v39 = vld [vmem:[#allocation53_spill] sm:$0xff] }
  0xdb   :  { %1567 = vmatpush1.bf16.msra.mxu1 %v6396_v51  ;;  %1527 = vmatprep.subr.bf16.mxu0 %v6397_v53  ;;  %v6400_v51 = vld [vmem:[#allocation54_spill] sm:$0xff]  ;;  %v6401_v53 = vld [vmem:[#allocation55_spill] sm:$0xff] }
  0xdc   :  { %1568 = vmatprep.subr.bf16.mxu1 %v6398_v6  ;;  %v4739_v6 = vrot.slane %v4730_v30, %v64_v5 }
  0xde   :  { %1528 = vmatpush1.bf16.msra.mxu0 %v6399_v39 }
  0xdf   :  { %1569 = vmatpush1.bf16.msra.mxu1 %v6400_v51  ;;  %1529 = vmatprep.subr.bf16.mxu0 %v6401_v53  ;;  %v4752_v51 = vrot.slane %v4730_v30, %v68_v28  ;;  %v6404_v53 = vsub.s32 1, %v4718_v4 }
  0xe0   :  { %v4736_v29 = vpop.f32.mrb[0].mxu0  ;;  %1570 = vmatprep.subr.bf16.mxu1 %v6402_v31  ;;  %v4749_v22 = vpop.f32.mrb[0].mxu1  ;;  %v6405_v31 = vld [vmem:[#allocation57_spill] sm:$0xff] }
  0xe1   :  { %v4747_v13 = vpop.f32.mrb[1].mxu0  ;;  %v4757_v39 = vrot.slane %v4730_v30, %v6404_v53  ;;  %v4759_v12 = vpop.f32.mrb[1].mxu1 }
  0xe2   :  { %v245_v5 = vpop.f32.mrb[2].mxu0  ;;  %1530 = vmatpush1.bf16.msra.mxu0 %v6405_v31  ;;  %v318_v61 = vpop.f32.mrb[2].mxu1 }
  0xe3   :  { %v4763_v23 = vadd.f32 %v245_v5, %v4745_v14  ;;  %v247_v7 = vpop.f32.mrb[3].mxu0  ;;  %1571 = vmatpush1.bf16.msra.mxu1 %v6407_v60  ;;  %1531 = vmatprep.subr.bf16.mxu0 %v6408_v59  ;;  %v4771_v53 = vadd.f32 %v318_v61, %v4739_v6  ;;  %v320_v54 = vpop.f32.mrb[3].mxu1  ;;  %v6413_v5 = vld [vmem:[#allocation61_spill] sm:$0xff]  ;;  %v6416_v59 = vld [vmem:[#allocation64_spill] sm:$0xff] }
  0xe4   :  { %v4768_v28 = vadd.f32 %v247_v7, %v4757_v39  ;;  %1572 = vmatprep.subr.bf16.mxu1 %v6411_v46  ;;  %v4775_v31 = vadd.f32 %v320_v54, %v4752_v51 }
  0xe5   :  { %6406 = vst [vmem:[#allocation132_spill] sm:$0xff] %v4763_v23  ;;  %6410 = vst [vmem:[#allocation134_spill] sm:$0xff] %v4771_v53  ;;  %v6414_v23 = vld [vmem:[#allocation62_spill] sm:$0xff] }
  0xe6   :  { %6409 = vst [vmem:[#allocation133_spill] sm:$0xff] %v4768_v28  ;;  %6412 = vst [vmem:[#allocation135_spill] sm:$0xff] %v4775_v31  ;;  %1532 = vmatpush1.bf16.msra.mxu0 %v6413_v5  ;;  %v6420_v5 = vld [vmem:[#allocation65_spill] sm:$0xff] }
  0xe7   :  { %1573 = vmatpush1.bf16.msra.mxu1 %v6414_v23  ;;  %1533 = vmatprep.subr.bf16.mxu0 %v6415_v45 }
  0xe8   :  { %v251_v60 = vpop.f32.mrb[4].mxu0  ;;  %1574 = vmatprep.subr.bf16.mxu1 %v6416_v59 }
  0xe9   :  { %v4782_v7 = vadd.f32 %v251_v60, %v4745_v14  ;;  %v253_v61 = vpop.f32.mrb[5].mxu0  ;;  %v324_v28 = vpop.f32.mrb[4].mxu1 }
  0xea   :  { %v4785_v53 = vadd.f32 %v253_v61, %v4757_v39  ;;  %v255_v46 = vpop.f32.mrb[6].mxu0  ;;  %v4788_v54 = vadd.f32 %v324_v28, %v4739_v6  ;;  %v326_v31 = vpop.f32.mrb[5].mxu1  ;;  %1534 = vmatpush1.bf16.msra.mxu0 %v6420_v5 }
  0xeb   :  { %6417 = vst [vmem:[#allocation136_spill] sm:$0xff] %v4782_v7  ;;  %v4792_v45 = vadd.f32 %v255_v46, %v4745_v14  ;;  %v257_v23 = vpop.f32.mrb[7].mxu0  ;;  %v4795_v59 = vadd.f32 %v326_v31, %v4752_v51  ;;  %v328_v60 = vpop.f32.mrb[6].mxu1  ;;  %v6423_v7 = vld [vmem:[#allocation66_spill] sm:$0xff]  ;;  %1585 = vmatprep.subr.bf16.mxu0 %v6424_v44 }
  0xec   :  { %6418 = vst [vmem:[#allocation137_spill] sm:$0xff] %v4785_v53  ;;  %6419 = vst [vmem:[#allocation138_spill] sm:$0xff] %v4788_v54  ;;  %1575 = vmatpush1.bf16.msra.mxu1 %v6423_v7  ;;  %v4800_v61 = vadd.f32 %v257_v23, %v4757_v39  ;;  %v4803_v28 = vadd.f32 %v328_v60, %v4739_v6  ;;  %v330_v53 = vpop.f32.mrb[7].mxu1  ;;  %v6427_v54 = vld [vmem:[#allocation68_spill] sm:$0xff] }
  0xed   :  { %6421 = vst [vmem:[#allocation139_spill] sm:$0xff] %v4792_v45  ;;  %6422 = vst [vmem:[#allocation140_spill] sm:$0xff] %v4795_v59  ;;  %1626 = vmatprep.subr.bf16.mxu1 %v6427_v54  ;;  %v4807_v46 = vadd.f32 %v330_v53, %v4752_v51 }
  0xee   :  { %6425 = vst [vmem:[#allocation141_spill] sm:$0xff] %v4800_v61  ;;  %6426 = vst [vmem:[#allocation142_spill] sm:$0xff] %v4803_v28 }
  0xef   :  { %6428 = vst [vmem:[#allocation143_spill] sm:$0xff] %v4807_v46 }
  0xf0   :  { %v261_v45 = vpop.f32.mrb[8].mxu0 }
  0xf1   :  { %v4810_v31 = vadd.f32 %v261_v45, %v4745_v14  ;;  %v263_v59 = vpop.f32.mrb[9].mxu0  ;;  %v334_v7 = vpop.f32.mrb[8].mxu1 }
  0xf2   :  { %v4813_v44 = vadd.f32 %v263_v59, %v4757_v39  ;;  %v265_v23 = vpop.f32.mrb[10].mxu0  ;;  %v4816_v61 = vadd.f32 %v334_v7, %v4739_v6  ;;  %v336_v60 = vpop.f32.mrb[9].mxu1 }
  0xf3   :  { %6429 = vst [vmem:[#allocation144_spill] sm:$0xff] %v4810_v31  ;;  %v4819_v28 = vadd.f32 %v265_v23, %v4745_v14  ;;  %v267_v54 = vpop.f32.mrb[11].mxu0  ;;  %v4822_v53 = vadd.f32 %v336_v60, %v4752_v51  ;;  %v338_v46 = vpop.f32.mrb[10].mxu1 }
  0xf4   :  { %6430 = vst [vmem:[#allocation145_spill] sm:$0xff] %v4813_v44  ;;  %6431 = vst [vmem:[#allocation146_spill] sm:$0xff] %v4816_v61  ;;  %v4825_v45 = vadd.f32 %v267_v54, %v4757_v39  ;;  %v4828_v31 = vadd.f32 %v338_v46, %v4739_v6  ;;  %v340_v59 = vpop.f32.mrb[11].mxu1 }
  0xf5   :  { %6432 = vst [vmem:[#allocation147_spill] sm:$0xff] %v4819_v28  ;;  %6433 = vst [vmem:[#allocation148_spill] sm:$0xff] %v4822_v53  ;;  %v4831_v44 = vadd.f32 %v340_v59, %v4752_v51 }
  0xf6   :  { %6434 = vst [vmem:[#allocation149_spill] sm:$0xff] %v4825_v45  ;;  %6435 = vst [vmem:[#allocation150_spill] sm:$0xff] %v4828_v31 }
  0xf7   :  { %6436 = vst [vmem:[#allocation151_spill] sm:$0xff] %v4831_v44 }
  0xf8   :  { %v271_v7 = vpop.f32.mrb[12].mxu0 }
  0xf9   :  { %v4834_v61 = vadd.f32 %v271_v7, %v4745_v14  ;;  %v273_v23 = vpop.f32.mrb[13].mxu0  ;;  %v344_v28 = vpop.f32.mrb[12].mxu1 }
  0xfa   :  { %v4837_v60 = vadd.f32 %v273_v23, %v4757_v39  ;;  %v275_v53 = vpop.f32.mrb[14].mxu0  ;;  %v4840_v54 = vadd.f32 %v344_v28, %v4739_v6  ;;  %v346_v45 = vpop.f32.mrb[13].mxu1  ;;  %v72_v28 = vsub.s32 4, %v4718_v4 }
  0xfb   :  { %6437 = vst [vmem:[#allocation152_spill] sm:$0xff] %v4834_v61  ;;  %v4843_v46 = vadd.f32 %v275_v53, %v4745_v14  ;;  %v277_v31 = vpop.f32.mrb[15].mxu0  ;;  %v4846_v59 = vadd.f32 %v346_v45, %v4752_v51  ;;  %v348_v44 = vpop.f32.mrb[14].mxu1  ;;  %v84_v53 = vsub.s32 7, %v4718_v4  ;;  %v76_v45 = vsub.s32 5, %v4718_v4 }
  0xfc   :  { %6438 = vst [vmem:[#allocation153_spill] sm:$0xff] %v4837_v60  ;;  %6439 = vst [vmem:[#allocation154_spill] sm:$0xff] %v4840_v54  ;;  %v4849_v7 = vadd.f32 %v277_v31, %v4757_v39  ;;  %v4852_v61 = vadd.f32 %v348_v44, %v4739_v6  ;;  %v350_v23 = vpop.f32.mrb[15].mxu1  ;;  %v80_v60 = vsub.s32 6, %v4718_v4  ;;  %v4867_v44 = vrot.slane %v4730_v30, %v72_v28 }
  0xfd   :  { %6440 = vst [vmem:[#allocation155_spill] sm:$0xff] %v4843_v46  ;;  %6441 = vst [vmem:[#allocation156_spill] sm:$0xff] %v4846_v59  ;;  %v4857_v54 = vadd.f32 %v350_v23, %v4752_v51  ;;  %v4874_v59 = vrot.slane %v4730_v30, %v84_v53  ;;  %v4877_v23 = vrot.slane %v4730_v30, %v76_v45 }
  0xfe   :  { %6442 = vst [vmem:[#allocation157_spill] sm:$0xff] %v4849_v7  ;;  %6443 = vst [vmem:[#allocation158_spill] sm:$0xff] %v4852_v61  ;;  %v4864_v31 = vrot.slane %v4730_v30, %v80_v60 }
  0xff   :  { %6444 = vst [vmem:[#allocation159_spill] sm:$0xff] %v4857_v54 }
 0x100   :  { %v4861_v46 = vpop.f32.mrb[16].mxu0 }
 0x101   :  { %v4869_v7 = vpop.f32.mrb[17].mxu0  ;;  %v4871_v61 = vpop.f32.mrb[16].mxu1 }
 0x102   :  { %v391_v54 = vpop.f32.mrb[18].mxu0  ;;  %v4879_v4 = vpop.f32.mrb[17].mxu1 }
 0x103   :  { %v4882_v5 = vadd.f32 %v391_v54, %v4867_v44  ;;  %v393_v60 = vpop.f32.mrb[19].mxu0  ;;  %v464_v43 = vpop.f32.mrb[18].mxu1 }
 0x104   :  { %v4885_v28 = vadd.f32 %v393_v60, %v4877_v23  ;;  %v4888_v35 = vadd.f32 %v464_v43, %v4864_v31  ;;  %v466_v34 = vpop.f32.mrb[19].mxu1 }
 0x105   :  { %6445 = vst [vmem:[#allocation160_spill] sm:$0xff] %v4882_v5  ;;  %v4891_v53 = vadd.f32 %v466_v34, %v4874_v59 }
 0x106   :  { %6446 = vst [vmem:[#allocation161_spill] sm:$0xff] %v4885_v28  ;;  %6447 = vst [vmem:[#allocation162_spill] sm:$0xff] %v4888_v35 }
 0x107   :  { %6448 = vst [vmem:[#allocation163_spill] sm:$0xff] %v4891_v53 }
 0x108   :  { %v397_v30 = vpop.f32.mrb[20].mxu0 }
 0x109   :  { %v4894_v45 = vadd.f32 %v397_v30, %v4867_v44  ;;  %v399_v33 = vpop.f32.mrb[21].mxu0  ;;  %v470_v32 = vpop.f32.mrb[20].mxu1 }
 0x10a   :  { %v4897_v54 = vadd.f32 %v399_v33, %v4877_v23  ;;  %v401_v5 = vpop.f32.mrb[22].mxu0  ;;  %v4900_v60 = vadd.f32 %v470_v32, %v4864_v31  ;;  %v472_v28 = vpop.f32.mrb[21].mxu1 }
 0x10b   :  { %6449 = vst [vmem:[#allocation164_spill] sm:$0xff] %v4894_v45  ;;  %v4903_v43 = vadd.f32 %v401_v5, %v4867_v44  ;;  %v403_v35 = vpop.f32.mrb[23].mxu0  ;;  %v4906_v34 = vadd.f32 %v472_v28, %v4874_v59  ;;  %v474_v53 = vpop.f32.mrb[22].mxu1 }
 0x10c   :  { %6450 = vst [vmem:[#allocation165_spill] sm:$0xff] %v4897_v54  ;;  %6451 = vst [vmem:[#allocation166_spill] sm:$0xff] %v4900_v60  ;;  %v4909_v30 = vadd.f32 %v403_v35, %v4877_v23  ;;  %v4912_v45 = vadd.f32 %v474_v53, %v4864_v31  ;;  %v476_v33 = vpop.f32.mrb[23].mxu1 }
 0x10d   :  { %6452 = vst [vmem:[#allocation167_spill] sm:$0xff] %v4903_v43  ;;  %6453 = vst [vmem:[#allocation168_spill] sm:$0xff] %v4906_v34  ;;  %v4915_v54 = vadd.f32 %v476_v33, %v4874_v59 }
 0x10e   :  { %6454 = vst [vmem:[#allocation169_spill] sm:$0xff] %v4909_v30  ;;  %6455 = vst [vmem:[#allocation170_spill] sm:$0xff] %v4912_v45 }
 0x10f   :  { %6456 = vst [vmem:[#allocation171_spill] sm:$0xff] %v4915_v54 }
 0x110   :  { %v407_v32 = vpop.f32.mrb[24].mxu0 }
 0x111   :  { %v4918_v60 = vadd.f32 %v407_v32, %v4867_v44  ;;  %v409_v5 = vpop.f32.mrb[25].mxu0  ;;  %v480_v43 = vpop.f32.mrb[24].mxu1 }
 0x112   :  { %v4921_v28 = vadd.f32 %v409_v5, %v4877_v23  ;;  %v411_v34 = vpop.f32.mrb[26].mxu0  ;;  %v4924_v35 = vadd.f32 %v480_v43, %v4864_v31  ;;  %v482_v30 = vpop.f32.mrb[25].mxu1 }
 0x113   :  { %6457 = vst [vmem:[#allocation172_spill] sm:$0xff] %v4918_v60  ;;  %v4927_v53 = vadd.f32 %v411_v34, %v4867_v44  ;;  %v413_v45 = vpop.f32.mrb[27].mxu0  ;;  %v4930_v33 = vadd.f32 %v482_v30, %v4874_v59  ;;  %v484_v54 = vpop.f32.mrb[26].mxu1 }
 0x114   :  { %6458 = vst [vmem:[#allocation173_spill] sm:$0xff] %v4921_v28  ;;  %6459 = vst [vmem:[#allocation174_spill] sm:$0xff] %v4924_v35  ;;  %v4933_v32 = vadd.f32 %v413_v45, %v4877_v23  ;;  %v4936_v60 = vadd.f32 %v484_v54, %v4864_v31  ;;  %v486_v5 = vpop.f32.mrb[27].mxu1 }
 0x115   :  { %6460 = vst [vmem:[#allocation175_spill] sm:$0xff] %v4927_v53  ;;  %6461 = vst [vmem:[#allocation176_spill] sm:$0xff] %v4930_v33  ;;  %v4939_v28 = vadd.f32 %v486_v5, %v4874_v59 }
 0x116   :  { %6462 = vst [vmem:[#allocation177_spill] sm:$0xff] %v4933_v32  ;;  %6463 = vst [vmem:[#allocation178_spill] sm:$0xff] %v4936_v60 }
 0x117   :  { %6464 = vst [vmem:[#allocation179_spill] sm:$0xff] %v4939_v28 }
 0x118   :  { %v417_v43 = vpop.f32.mrb[28].mxu0 }
 0x119   :  { %v4942_v35 = vadd.f32 %v417_v43, %v4867_v44  ;;  %v419_v34 = vpop.f32.mrb[29].mxu0  ;;  %v490_v53 = vpop.f32.mrb[28].mxu1 }
 0x11a   :  { %v4945_v30 = vadd.f32 %v419_v34, %v4877_v23  ;;  %v421_v33 = vpop.f32.mrb[30].mxu0  ;;  %v4948_v45 = vadd.f32 %v490_v53, %v4864_v31  ;;  %v492_v32 = vpop.f32.mrb[29].mxu1  ;;  %v242_v53 = vadd.f32 %v4736_v29, %v4745_v14 }
 0x11b   :  { %6465 = vst [vmem:[#allocation180_spill] sm:$0xff] %v4942_v35  ;;  %v4951_v54 = vadd.f32 %v421_v33, %v4867_v44  ;;  %v423_v60 = vpop.f32.mrb[31].mxu0  ;;  %v4954_v5 = vadd.f32 %v492_v32, %v4874_v59  ;;  %v494_v28 = vpop.f32.mrb[30].mxu1  ;;  %v244_v33 = vadd.f32 %v4747_v13, %v4757_v39  ;;  %v315_v32 = vadd.f32 %v4749_v22, %v4739_v6 }
 0x11c   :  { %6466 = vst [vmem:[#allocation181_spill] sm:$0xff] %v4945_v30  ;;  %6467 = vst [vmem:[#allocation182_spill] sm:$0xff] %v4948_v45  ;;  %v4957_v43 = vadd.f32 %v423_v60, %v4877_v23  ;;  %v4960_v35 = vadd.f32 %v494_v28, %v4864_v31  ;;  %v496_v34 = vpop.f32.mrb[31].mxu1  ;;  %v317_v60 = vadd.f32 %v4759_v12, %v4752_v51 }
 0x11d   :  { %6468 = vst [vmem:[#allocation183_spill] sm:$0xff] %v4951_v54  ;;  %6469 = vst [vmem:[#allocation184_spill] sm:$0xff] %v4954_v5  ;;  %v4963_v30 = vadd.f32 %v496_v34, %v4874_v59  ;;  %v388_v39 = vadd.f32 %v4861_v46, %v4867_v44  ;;  %v390_v12 = vadd.f32 %v4869_v7, %v4877_v23 }
 0x11e   :  { %6470 = vst [vmem:[#allocation185_spill] sm:$0xff] %v4957_v43  ;;  %6471 = vst [vmem:[#allocation186_spill] sm:$0xff] %v4960_v35  ;;  %v461_v51 = vadd.f32 %v4871_v61, %v4864_v31 }
 0x11f   :  { %6472 = vst [vmem:[#allocation187_spill] sm:$0xff] %v4963_v30 }
 0x140   :  { %v1301_v54 = vpop.f32.mrb[32].mxu0 }
 0x141   :  { %v1431_v43 = vadd.f32 %v1301_v54, %v242_v53  ;;  %v1342_v28 = vpop.f32.mrb[32].mxu1  ;;  %v1303_v35 = vpop.f32.mrb[33].mxu0 }
 0x142   :  { %v1433_v5 = vadd.f32 %v1342_v28, %v315_v32  ;;  %v1432_v45 = vadd.f32 %v1303_v35, %v244_v33  ;;  %v1344_v34 = vpop.f32.mrb[33].mxu1  ;;  %v1305_v30 = vpop.f32.mrb[34].mxu0 }
 0x143   :  { %v1434_v27 = vadd.f32 %v1344_v34, %v317_v60  ;;  %v1306_v26 = vpop.f32.mrb[35].mxu0  ;;  %v1346_v14 = vpop.f32.mrb[34].mxu1  ;;  %v3360_v25 = vmul.f32 -1.442695, %v1431_v43 }
 0x144   :  { %v1347_v29 = vpop.f32.mrb[35].mxu1  ;;  %v3362_v13 = vmul.f32 -1.442695, %v1433_v5  ;;  %v463_v26 = vadd.f32 %v4879_v4, %v4874_v59  ;;  %v3361_v5 = vmul.f32 -1.442695, %v1432_v45 }
 0x145   :  { %3447 = vpow2.f32 %v3360_v25  ;;  %v3363_v6 = vmul.f32 -1.442695, %v1434_v27 }
 0x146   :  { %3449 = vpow2.f32 %v3362_v13 }
 0x147   :  { %3451 = vpow2.f32 %v3363_v6 }
 0x14f   :  { %v3448_v27 = vpop.eup %3447 }
 0x150   :  { %v3450_v4 = vpop.eup %3449  ;;  %v1463_v59 = vadd.f32 1.0, %v3448_v27 }
 0x151   :  { %v1465_v32 = vadd.f32 1.0, %v3450_v4  ;;  %v3452_v60 = vpop.eup %3451 }
 0x180   :  { %v1383_v22 = vpop.f32.mrb[36].mxu0 }
 0x181   :  { %v1435_v35 = vadd.f32 %v1383_v22, %v388_v39  ;;  %v1424_v30 = vpop.f32.mrb[36].mxu1  ;;  %v1385_v54 = vpop.f32.mrb[37].mxu0  ;;  %v1466_v39 = vadd.f32 1.0, %v3452_v60 }
 0x182   :  { %v1437_v43 = vadd.f32 %v1424_v30, %v461_v51  ;;  %v1436_v53 = vadd.f32 %v1385_v54, %v390_v12  ;;  %v1426_v46 = vpop.f32.mrb[37].mxu1  ;;  %v1387_v25 = vpop.f32.mrb[38].mxu0 }
 0x183   :  { %v3364_v44 = vmul.f32 -1.442695, %v1435_v35  ;;  %v1438_v33 = vadd.f32 %v1426_v46, %v463_v26  ;;  %v1388_v7 = vpop.f32.mrb[39].mxu0  ;;  %v1428_v23 = vpop.f32.mrb[38].mxu1 }
 0x184   :  { %v3365_v61 = vmul.f32 -1.442695, %v1436_v53  ;;  %v1429_v31 = vpop.f32.mrb[39].mxu1  ;;  %v3366_v28 = vmul.f32 -1.442695, %v1437_v43 }
 0x185   :  { %3453 = vpow2.f32 %v3364_v44  ;;  %v3367_v13 = vmul.f32 -1.442695, %v1438_v33 }
 0x186   :  { %3455 = vpow2.f32 %v3361_v5 }
 0x187   :  { %3457 = vpow2.f32 %v3365_v61 }
 0x188   :  { %3459 = vrcp.f32 %v1463_v59 }
 0x189   :  { %3461 = vrcp.f32 %v1465_v32 }
 0x18f   :  { %v3454_v45 = vpop.eup %3453 }
 0x190   :  { %v3456_v34 = vpop.eup %3455  ;;  %v1467_v14 = vadd.f32 1.0, %v3454_v45 }
 0x191   :  { %v3458_v29 = vpop.eup %3457  ;;  %v1464_v51 = vadd.f32 1.0, %v3456_v34 }
 0x192   :  { %3463 = vrcp.f32 %v1467_v14  ;;  %v1468_v12 = vadd.f32 1.0, %v3458_v29  ;;  %v3460_v6 = vpop.eup %3459 }
 0x193   :  { %3465 = vpow2.f32 %v3366_v28  ;;  %v3462_v22 = vpop.eup %3461 }
 0x194   :  { %3467 = vrcp.f32 %v1468_v12  ;;  %v1491_v44 = vmul.f32 0.0, %v3462_v22  ;;  %v6474_v12 = vld [vmem:[#allocation70_spill] sm:$0xff]  ;;  %v6477_v22 = vld [vmem:[#allocation73_spill] sm:$0xff] }
 0x195   :  { %3469 = vpow2.f32 %v3367_v13 }
 0x196   :  { %3471 = vrcp.f32 %v1466_v39  ;;  %v6473_v39 = vld [vmem:[#allocation69_spill] sm:$0xff] }
 0x197   :  { %3473 = vrcp.f32 %v1464_v51  ;;  %v6475_v51 = vld [vmem:[#allocation71_spill] sm:$0xff] }
 0x19c   :  { %v3464_v26 = vpop.eup %3463 }
 0x19d   :  { %v3466_v35 = vpop.eup %3465  ;;  %v1487_v30 = vmul.f32 2.0, %v3464_v26  ;;  %v6478_v26 = vld [vmem:[#allocation74_spill] sm:$0xff] }
 0x19e   :  { %v3468_v54 = vpop.eup %3467  ;;  %v1469_v25 = vadd.f32 1.0, %v3466_v35  ;;  %v6479_v35 = vld [vmem:[#allocation75_spill] sm:$0xff] }
 0x19f   :  { %v3470_v5 = vpop.eup %3469  ;;  %v3368_v43 = vadd.f32 -1.0, %v1487_v30  ;;  %v1488_v53 = vmul.f32 2.0, %v3468_v54  ;;  %v6480_v30 = vld [vmem:[#allocation76_spill] sm:$0xff]  ;;  %v6481_v54 = vld [vmem:[#allocation77_spill] sm:$0xff] }
 0x1a0   :  { %v3472_v46 = vpop.eup %3471  ;;  %v1470_v61 = vadd.f32 1.0, %v3470_v5  ;;  %3475 = vrcp.f32 %v1469_v25  ;;  %v6482_v5 = vld [vmem:[#allocation78_spill] sm:$0xff] }
 0x1a1   :  { %v1493_v33 = vmul.f32 %v3460_v6, %v3368_v43  ;;  %v3369_v7 = vadd.f32 -1.0, %v1488_v53  ;;  %v3474_v23 = vpop.eup %3473  ;;  %v1492_v31 = vmul.f32 0.0, %v3472_v46  ;;  %v6476_v6 = vld [vmem:[#allocation72_spill] sm:$0xff]  ;;  %v6483_v43 = vld [vmem:[#allocation79_spill] sm:$0xff]  ;;  %v6485_v46 = vld [vmem:[#allocation81_spill] sm:$0xff] }
 0x1a2   :  { %v6484_v53 = vld [vmem:[#allocation80_spill] sm:$0xff]  ;;  %v6486_v25 = vld [vmem:[#allocation82_spill] sm:$0xff] }
 0x1a3   :  { %v4981_v27 = vadd.f32 %v1493_v33, %v1491_v44  ;;  %v1494_v4 = vmul.f32 %v3474_v23, %v3369_v7  ;;  %v6487_v44 = vld [vmem:[#allocation83_spill] sm:$0xff]  ;;  %v6488_v33 = vld [vmem:[#allocation84_spill] sm:$0xff]  ;;  %v6489_v7 = vld [vmem:[#allocation85_spill] sm:$0xff] }
 0x1a4   :  { %v6490_v23 = vld [vmem:[#allocation86_spill] sm:$0xff] }
 0x1a5   :  { %3477 = vtanh.f32 %v4981_v27  ;;  %v4984_v59 = vadd.f32 %v1494_v4, %v1492_v31  ;;  %v6492_v31 = vld [vmem:[#allocation88_spill] sm:$0xff]  ;;  %v6493_v4 = vld [vmem:[#allocation89_spill] sm:$0xff] }
 0x1a6   :  { %3479 = vrcp.f32 %v1470_v61  ;;  %v6491_v61 = vld [vmem:[#allocation87_spill] sm:$0xff] }
 0x1a7   :  { %3481 = vtanh.f32 %v4984_v59 }
 0x1aa   :  { %v3476_v32 = vpop.eup %3475 }
 0x1af   :  { %v3478_v60 = vpop.eup %3477 }
 0x1b0   :  { %v3480_v45 = vpop.eup %3479  ;;  %v1499_v34 = vmul.f32 %v3478_v60, %v3476_v32  ;;  %v6494_v32 = vld [vmem:[#allocation90_spill] sm:$0xff]  ;;  %v6495_v60 = vld [vmem:[#allocation91_spill] sm:$0xff] }
 0x1b1   :  { %v3482_v28 = vpop.eup %3481 }
 0x1b2   :  { %v1500_v14 = vmul.f32 %v3482_v28, %v3480_v45  ;;  %v4987_v13 = vpack.c.bf16 %v1499_v34, %v1499_v34  ;;  %v6496_v45 = vld [vmem:[#allocation92_spill] sm:$0xff]  ;;  %v6497_v28 = vld [vmem:[#allocation93_spill] sm:$0xff]  ;;  %v6498_v34 = vld [vmem:[#allocation94_spill] sm:$0xff] }
 0x1b4   :  { %v1502_v29 = vpack.c.bf16 %v1500_v14, %v1500_v14  ;;  %v6499_v14 = vld [vmem:[#allocation95_spill] sm:$0xff] }
 0x1b6   :  { %1535 = vmatprep.mubr.bf16.mxu0 %v1502_v29  ;;  %1576 = vmatprep.mubr.bf16.mxu1 %v1502_v29 }
 0x1b7   :  { %1536 = vmatmul.mubr.bf16.vlgmr.msra.gmra.mrb[40].mxu0 %v4987_v13  ;;  %1577 = vmatmul.mubr.bf16.vlgmr.msra.gmra.mrb[40].mxu1 %v4987_v13 }
 0x1b8   :  { %1586 = vmatpush1.bf16.msra.mxu0 %v6473_v39  ;;  %1627 = vmatpush1.bf16.msra.mxu1 %v6474_v12 }
 0x1b9   :  { %1617 = vmatprep.mubr.bf16.mxu0 %v1502_v29  ;;  %1658 = vmatprep.mubr.bf16.mxu1 %v1502_v29  ;;  %v6500_v29 = vld [vmem:[#allocation96_spill] sm:$0xff] }
 0x1ba   :  { %1587 = vmatprep.subr.bf16.mxu0 %v6475_v51  ;;  %1628 = vmatprep.subr.bf16.mxu1 %v6476_v6 }
 0x1bc   :  { %1588 = vmatpush1.bf16.msra.mxu0 %v6477_v22  ;;  %1629 = vmatpush1.bf16.msra.mxu1 %v6478_v26 }
 0x1bd   :  { %1589 = vmatprep.subr.bf16.mxu0 %v6479_v35  ;;  %1630 = vmatprep.subr.bf16.mxu1 %v6480_v30 }
 0x1c0   :  { %1590 = vmatpush1.bf16.msra.mxu0 %v6481_v54  ;;  %1631 = vmatpush1.bf16.msra.mxu1 %v6482_v5 }
 0x1c1   :  { %1591 = vmatprep.subr.bf16.mxu0 %v6483_v43  ;;  %1632 = vmatprep.subr.bf16.mxu1 %v6484_v53 }
 0x1c4   :  { %1592 = vmatpush1.bf16.msra.mxu0 %v6485_v46  ;;  %1633 = vmatpush1.bf16.msra.mxu1 %v6486_v25 }
 0x1c5   :  { %1593 = vmatprep.subr.bf16.mxu0 %v6487_v44  ;;  %1634 = vmatprep.subr.bf16.mxu1 %v6488_v33 }
 0x1c8   :  { %1594 = vmatpush1.bf16.msra.mxu0 %v6489_v7  ;;  %1635 = vmatpush1.bf16.msra.mxu1 %v6490_v23  ;;  %v6501_v23 = vld [vmem:[#allocation97_spill] sm:$0xff] }
 0x1c9   :  { %1595 = vmatprep.subr.bf16.mxu0 %v6491_v61  ;;  %1636 = vmatprep.subr.bf16.mxu1 %v6492_v31  ;;  %v6502_v61 = vld [vmem:[#allocation98_spill] sm:$0xff]  ;;  %v6503_v31 = vld [vmem:[#allocation99_spill] sm:$0xff] }
 0x1cc   :  { %1596 = vmatpush1.bf16.msra.mxu0 %v6493_v4  ;;  %1637 = vmatpush1.bf16.msra.mxu1 %v6494_v32  ;;  %v6504_v4 = vld [vmem:[#allocation100_spill] sm:$0xff]  ;;  %v6505_v32 = vld [vmem:[#allocation101_spill] sm:$0xff] }
 0x1cd   :  { %1597 = vmatprep.subr.bf16.mxu0 %v6495_v60  ;;  %1638 = vmatprep.subr.bf16.mxu1 %v6496_v45  ;;  %v6506_v60 = vld [vmem:[#allocation102_spill] sm:$0xff]  ;;  %v6507_v45 = vld [vmem:[#allocation103_spill] sm:$0xff] }
 0x1d0   :  { %1598 = vmatpush1.bf16.msra.mxu0 %v6497_v28  ;;  %1639 = vmatpush1.bf16.msra.mxu1 %v6498_v34  ;;  %v6508_v28 = vld [vmem:[#allocation104_spill] sm:$0xff]  ;;  %v6509_v34 = vld [vmem:[#allocation105_spill] sm:$0xff] }
 0x1d1   :  { %1599 = vmatprep.subr.bf16.mxu0 %v6499_v14  ;;  %1640 = vmatprep.subr.bf16.mxu1 %v6500_v29  ;;  %v6510_v14 = vld [vmem:[#allocation106_spill] sm:$0xff]  ;;  %v6511_v29 = vld [vmem:[#allocation107_spill] sm:$0xff] }
 0x1d4   :  { %1600 = vmatpush1.bf16.msra.mxu0 %v6501_v23  ;;  %1641 = vmatpush1.bf16.msra.mxu1 %v6502_v61  ;;  %v6512_v23 = vld [vmem:[#allocation108_spill] sm:$0xff]  ;;  %v6513_v61 = vld [vmem:[#allocation109_spill] sm:$0xff] }
 0x1d5   :  { %1601 = vmatprep.subr.bf16.mxu0 %v6503_v31  ;;  %1642 = vmatprep.subr.bf16.mxu1 %v6504_v4  ;;  %v6514_v31 = vld [vmem:[#allocation110_spill] sm:$0xff]  ;;  %v6515_v4 = vld [vmem:[#allocation111_spill] sm:$0xff] }
 0x1d8   :  { %1602 = vmatpush1.bf16.msra.mxu0 %v6505_v32  ;;  %1643 = vmatpush1.bf16.msra.mxu1 %v6506_v60  ;;  %v6516_v32 = vld [vmem:[#allocation112_spill] sm:$0xff]  ;;  %v6517_v60 = vld [vmem:[#allocation113_spill] sm:$0xff] }
 0x1d9   :  { %1603 = vmatprep.subr.bf16.mxu0 %v6507_v45  ;;  %1644 = vmatprep.subr.bf16.mxu1 %v6508_v28  ;;  %v6518_v45 = vld [vmem:[#allocation114_spill] sm:$0xff]  ;;  %v6519_v28 = vld [vmem:[#allocation115_spill] sm:$0xff] }
 0x1dc   :  { %1604 = vmatpush1.bf16.msra.mxu0 %v6509_v34  ;;  %1645 = vmatpush1.bf16.msra.mxu1 %v6510_v14  ;;  %v6520_v34 = vld [vmem:[#allocation116_spill] sm:$0xff]  ;;  %v6521_v14 = vld [vmem:[#allocation117_spill] sm:$0xff] }
 0x1dd   :  { %1605 = vmatprep.subr.bf16.mxu0 %v6511_v29  ;;  %1646 = vmatprep.subr.bf16.mxu1 %v6512_v23  ;;  %v6522_v29 = vld [vmem:[#allocation118_spill] sm:$0xff]  ;;  %v6523_v23 = vld [vmem:[#allocation119_spill] sm:$0xff] }
 0x1e0   :  { %1606 = vmatpush1.bf16.msra.mxu0 %v6513_v61  ;;  %1647 = vmatpush1.bf16.msra.mxu1 %v6514_v31  ;;  %v6524_v61 = vld [vmem:[#allocation120_spill] sm:$0xff] }
 0x1e1   :  { %1607 = vmatprep.subr.bf16.mxu0 %v6515_v4  ;;  %1648 = vmatprep.subr.bf16.mxu1 %v6516_v32 }
 0x1e4   :  { %1608 = vmatpush1.bf16.msra.mxu0 %v6517_v60  ;;  %1649 = vmatpush1.bf16.msra.mxu1 %v6518_v45 }
 0x1e5   :  { %1609 = vmatprep.subr.bf16.mxu0 %v6519_v28  ;;  %1650 = vmatprep.subr.bf16.mxu1 %v6520_v34 }
 0x1e8   :  { %1610 = vmatpush1.bf16.msra.mxu0 %v6521_v14  ;;  %1651 = vmatpush1.bf16.msra.mxu1 %v6522_v29 }
 0x1e9   :  { %1611 = vmatprep.subr.bf16.mxu0 %v6523_v23  ;;  %1652 = vmatprep.subr.bf16.mxu1 %v6524_v61 }
 0x1ec   :  { %1612 = vmatpush1.bf16.msra.mxu0 %v4625_v62  ;;  %1653 = vmatpush1.bf16.msra.mxu1 %v4629_v52 }
 0x1ed   :  { %1613 = vmatprep.subr.bf16.mxu0 %v4631_v42  ;;  %1654 = vmatprep.subr.bf16.mxu1 %v4634_v38 }
 0x1f0   :  { %1614 = vmatpush1.bf16.msra.mxu0 %v4649_v36  ;;  %1655 = vmatpush1.bf16.msra.mxu1 %v4653_v21 }
 0x1f1   :  { %1615 = vmatprep.subr.bf16.mxu0 %v4655_v20  ;;  %1656 = vmatprep.subr.bf16.mxu1 %v4658_v15 }
 0x1f4   :  { %1616 = vmatpush1.bf16.msra.mxu0 %v4661_v3  ;;  %1657 = vmatpush1.bf16.msra.mxu1 %v4665_v41 }
 0x1f5   :  { %1739 = vmatprep.subr.bf16.mxu0 %v3853_v37  ;;  %1780 = vmatprep.subr.bf16.mxu1 %v3860_v40 }
 0x1f7   :  { %1618 = vmatmul.mubr.bf16.vlgmr.msra.gmra.mrb[44].mxu0 %v4987_v13  ;;  %1659 = vmatmul.mubr.bf16.vlgmr.msra.gmra.mrb[44].mxu1 %v4987_v13  ;;  %v6525_v13 = vld [vmem:[#allocation26_spill] sm:$0xff] }
 0x1f8   :  { %1740 = vmatpush1.bf16.msra.mxu0 %v3904_v47  ;;  %1781 = vmatpush1.bf16.msra.mxu1 %v3906_v48 }
 0x1f9   :  { %1741 = vmatprep.subr.bf16.mxu0 %v3908_v49  ;;  %1782 = vmatprep.subr.bf16.mxu1 %v3910_v50 }
 0x1fc   :  { %1742 = vmatpush1.bf16.msra.mxu0 %v3929_v55  ;;  %1783 = vmatpush1.bf16.msra.mxu1 %v3933_v56 }
 0x1fd   :  { %1743 = vmatprep.subr.bf16.mxu0 %v3935_v57  ;;  %1784 = vmatprep.subr.bf16.mxu1 %v3938_v58  ;;  %v6570_v58 = vld [vmem:[#allocation133_spill] sm:$0xff]  ;;  %v6571_v57 = vld [vmem:[#allocation135_spill] sm:$0xff] }
 0x200   :  { %1744 = vmatpush1.bf16.msra.mxu0 %v3955_v63  ;;  %1785 = vmatpush1.bf16.msra.mxu1 %v3959_v0  ;;  %v6569_v0 = vld [vmem:[#allocation134_spill] sm:$0xff] }
 0x201   :  { %1745 = vmatprep.subr.bf16.mxu0 %v3961_v1  ;;  %1786 = vmatprep.subr.bf16.mxu1 %v3964_v2  ;;  %v6526_v2 = vld [vmem:[#allocation27_spill] sm:$0xff]  ;;  %v6568_v1 = vld [vmem:[#allocation132_spill] sm:$0xff] }
 0x204   :  { %1746 = vmatpush1.bf16.msra.mxu0 %v3981_v8  ;;  %1787 = vmatpush1.bf16.msra.mxu1 %v3987_v9  ;;  %v6527_v8 = vld [vmem:[#allocation28_spill] sm:$0xff]  ;;  %v6528_v9 = vld [vmem:[#allocation29_spill] sm:$0xff] }
 0x205   :  { %1747 = vmatprep.subr.bf16.mxu0 %v3989_v10  ;;  %1788 = vmatprep.subr.bf16.mxu1 %v3992_v11  ;;  %v6529_v10 = vld [vmem:[#allocation30_spill] sm:$0xff]  ;;  %v6530_v11 = vld [vmem:[#allocation31_spill] sm:$0xff] }
 0x208   :  { %1748 = vmatpush1.bf16.msra.mxu0 %v4009_v16  ;;  %1789 = vmatpush1.bf16.msra.mxu1 %v4013_v17  ;;  %v6531_v16 = vld [vmem:[#allocation32_spill] sm:$0xff]  ;;  %v6532_v17 = vld [vmem:[#allocation33_spill] sm:$0xff] }
 0x209   :  { %1749 = vmatprep.subr.bf16.mxu0 %v4015_v18  ;;  %1790 = vmatprep.subr.bf16.mxu1 %v4018_v19  ;;  %v6533_v18 = vld [vmem:[#allocation34_spill] sm:$0xff]  ;;  %v6534_v19 = vld [vmem:[#allocation35_spill] sm:$0xff] }
 0x20c   :  { %1750 = vmatpush1.bf16.msra.mxu0 %v4035_v24  ;;  %1791 = vmatpush1.bf16.msra.mxu1 %v6525_v13  ;;  %v6535_v24 = vld [vmem:[#allocation36_spill] sm:$0xff]  ;;  %v6536_v13 = vld [vmem:[#allocation37_spill] sm:$0xff] }
 0x20d   :  { %1751 = vmatprep.subr.bf16.mxu0 %v6526_v2  ;;  %1792 = vmatprep.subr.bf16.mxu1 %v6527_v8  ;;  %v6537_v2 = vld [vmem:[#allocation38_spill] sm:$0xff]  ;;  %v6538_v8 = vld [vmem:[#allocation39_spill] sm:$0xff] }
 0x210   :  { %1752 = vmatpush1.bf16.msra.mxu0 %v6528_v9  ;;  %1793 = vmatpush1.bf16.msra.mxu1 %v6529_v10  ;;  %v6539_v9 = vld [vmem:[#allocation40_spill] sm:$0xff]  ;;  %v6540_v10 = vld [vmem:[#allocation41_spill] sm:$0xff] }
 0x211   :  { %1753 = vmatprep.subr.bf16.mxu0 %v6530_v11  ;;  %1794 = vmatprep.subr.bf16.mxu1 %v6531_v16  ;;  %v6541_v11 = vld [vmem:[#allocation42_spill] sm:$0xff]  ;;  %v6542_v16 = vld [vmem:[#allocation43_spill] sm:$0xff] }
 0x214   :  { %1754 = vmatpush1.bf16.msra.mxu0 %v6532_v17  ;;  %1795 = vmatpush1.bf16.msra.mxu1 %v6533_v18  ;;  %v6543_v17 = vld [vmem:[#allocation44_spill] sm:$0xff]  ;;  %v6544_v18 = vld [vmem:[#allocation45_spill] sm:$0xff] }
 0x215   :  { %1755 = vmatprep.subr.bf16.mxu0 %v6534_v19  ;;  %1796 = vmatprep.subr.bf16.mxu1 %v6535_v24  ;;  %v6545_v19 = vld [vmem:[#allocation46_spill] sm:$0xff]  ;;  %v6546_v24 = vld [vmem:[#allocation47_spill] sm:$0xff] }
 0x218   :  { %1756 = vmatpush1.bf16.msra.mxu0 %v6536_v13  ;;  %1797 = vmatpush1.bf16.msra.mxu1 %v6537_v2  ;;  %v6547_v13 = vld [vmem:[#allocation48_spill] sm:$0xff]  ;;  %v6548_v2 = vld [vmem:[#allocation49_spill] sm:$0xff] }
 0x219   :  { %1757 = vmatprep.subr.bf16.mxu0 %v6538_v8  ;;  %1798 = vmatprep.subr.bf16.mxu1 %v6539_v9  ;;  %v6549_v8 = vld [vmem:[#allocation50_spill] sm:$0xff]  ;;  %v6550_v9 = vld [vmem:[#allocation51_spill] sm:$0xff] }
 0x21c   :  { %1758 = vmatpush1.bf16.msra.mxu0 %v6540_v10  ;;  %1799 = vmatpush1.bf16.msra.mxu1 %v6541_v11  ;;  %v6551_v10 = vld [vmem:[#allocation52_spill] sm:$0xff]  ;;  %v6552_v11 = vld [vmem:[#allocation53_spill] sm:$0xff] }
 0x21d   :  { %1759 = vmatprep.subr.bf16.mxu0 %v6542_v16  ;;  %1800 = vmatprep.subr.bf16.mxu1 %v6543_v17  ;;  %v6553_v16 = vld [vmem:[#allocation54_spill] sm:$0xff]  ;;  %v6554_v17 = vld [vmem:[#allocation55_spill] sm:$0xff] }
 0x220   :  { %1760 = vmatpush1.bf16.msra.mxu0 %v6544_v18  ;;  %1801 = vmatpush1.bf16.msra.mxu1 %v6545_v19  ;;  %v6555_v18 = vld [vmem:[#allocation56_spill] sm:$0xff]  ;;  %v6556_v19 = vld [vmem:[#allocation57_spill] sm:$0xff] }
 0x221   :  { %1761 = vmatprep.subr.bf16.mxu0 %v6546_v24  ;;  %1802 = vmatprep.subr.bf16.mxu1 %v6547_v13  ;;  %v6557_v24 = vld [vmem:[#allocation58_spill] sm:$0xff]  ;;  %v6558_v13 = vld [vmem:[#allocation59_spill] sm:$0xff] }
 0x224   :  { %1762 = vmatpush1.bf16.msra.mxu0 %v6548_v2  ;;  %1803 = vmatpush1.bf16.msra.mxu1 %v6549_v8  ;;  %v6559_v2 = vld [vmem:[#allocation60_spill] sm:$0xff]  ;;  %v6560_v8 = vld [vmem:[#allocation61_spill] sm:$0xff] }
 0x225   :  { %1763 = vmatprep.subr.bf16.mxu0 %v6550_v9  ;;  %1804 = vmatprep.subr.bf16.mxu1 %v6551_v10  ;;  %v6561_v9 = vld [vmem:[#allocation62_spill] sm:$0xff]  ;;  %v6562_v10 = vld [vmem:[#allocation63_spill] sm:$0xff] }
 0x228   :  { %1764 = vmatpush1.bf16.msra.mxu0 %v6552_v11  ;;  %1805 = vmatpush1.bf16.msra.mxu1 %v6553_v16  ;;  %v6563_v11 = vld [vmem:[#allocation64_spill] sm:$0xff]  ;;  %v6564_v16 = vld [vmem:[#allocation65_spill] sm:$0xff] }
 0x229   :  { %1765 = vmatprep.subr.bf16.mxu0 %v6554_v17  ;;  %1806 = vmatprep.subr.bf16.mxu1 %v6555_v18  ;;  %v6565_v17 = vld [vmem:[#allocation66_spill] sm:$0xff]  ;;  %v6566_v18 = vld [vmem:[#allocation67_spill] sm:$0xff] }
 0x22c   :  { %1766 = vmatpush1.bf16.msra.mxu0 %v6556_v19  ;;  %1807 = vmatpush1.bf16.msra.mxu1 %v6557_v24  ;;  %v6567_v19 = vld [vmem:[#allocation68_spill] sm:$0xff] }
 0x22d   :  { %1767 = vmatprep.subr.bf16.mxu0 %v6558_v13  ;;  %1808 = vmatprep.subr.bf16.mxu1 %v6559_v2 }
 0x230   :  { %1768 = vmatpush1.bf16.msra.mxu0 %v6560_v8  ;;  %1809 = vmatpush1.bf16.msra.mxu1 %v6561_v9 }
 0x231   :  { %1769 = vmatprep.subr.bf16.mxu0 %v6562_v10  ;;  %1810 = vmatprep.subr.bf16.mxu1 %v6563_v11 }
 0x234   :  { %1770 = vmatpush1.bf16.msra.mxu0 %v6564_v16  ;;  %1811 = vmatpush1.bf16.msra.mxu1 %v6565_v17 }
 0x235   :  { %1821 = vmatprep.subr.bf16.mxu0 %v6566_v18  ;;  %1862 = vmatprep.subr.bf16.mxu1 %v6567_v19 }
 0x28a   :  { %v1537_v24 = vpop.f32.mrb[40].mxu0  ;;  %v1578_v13 = vpop.f32.mrb[40].mxu1 }
 0x28b   :  { %v1667_v2 = vadd.f32 %v1537_v24, %v6568_v1  ;;  %v1669_v8 = vadd.f32 %v1578_v13, %v6569_v0  ;;  %v1539_v63 = vpop.f32.mrb[41].mxu0  ;;  %v1580_v9 = vpop.f32.mrb[41].mxu1  ;;  %v6572_v1 = vld [vmem:[#allocation160_spill] sm:$0xff]  ;;  %v6573_v0 = vld [vmem:[#allocation162_spill] sm:$0xff] }
 0x28c   :  { %v1668_v10 = vadd.f32 %v1539_v63, %v6570_v58  ;;  %v1670_v11 = vadd.f32 %v1580_v9, %v6571_v57  ;;  %v1541_v56 = vpop.f32.mrb[42].mxu0  ;;  %v1582_v16 = vpop.f32.mrb[42].mxu1  ;;  %v6574_v63 = vld [vmem:[#allocation161_spill] sm:$0xff] }
 0x28d   :  { %v1542_v55 = vpop.f32.mrb[43].mxu0  ;;  %v1583_v17 = vpop.f32.mrb[43].mxu1  ;;  %v3370_v50 = vmul.f32 -1.442695, %v1667_v2  ;;  %v3372_v18 = vmul.f32 -1.442695, %v1669_v8 }
 0x28e   :  { %v3373_v19 = vmul.f32 -1.442695, %v1670_v11  ;;  %v3371_v58 = vmul.f32 -1.442695, %v1668_v10  ;;  %v6575_v56 = vld [vmem:[#allocation163_spill] sm:$0xff] }
 0x28f   :  { %3483 = vpow2.f32 %v3370_v50 }
 0x290   :  { %3485 = vpow2.f32 %v3372_v18 }
 0x291   :  { %3487 = vpow2.f32 %v3373_v19 }
 0x2ca   :  { %v1619_v49 = vpop.f32.mrb[44].mxu0  ;;  %v1660_v48 = vpop.f32.mrb[44].mxu1 }
 0x2cb   :  { %v1671_v24 = vadd.f32 %v1619_v49, %v6572_v1  ;;  %v1673_v13 = vadd.f32 %v1660_v48, %v6573_v0  ;;  %v1621_v47 = vpop.f32.mrb[45].mxu0  ;;  %v1662_v40 = vpop.f32.mrb[45].mxu1 }
 0x2cc   :  { %v1672_v57 = vadd.f32 %v1621_v47, %v6574_v63  ;;  %v1674_v9 = vadd.f32 %v1662_v40, %v6575_v56  ;;  %v1623_v55 = vpop.f32.mrb[46].mxu0  ;;  %v1664_v16 = vpop.f32.mrb[46].mxu1 }
 0x2cd   :  { %v3374_v2 = vmul.f32 -1.442695, %v1671_v24  ;;  %v1624_v8 = vpop.f32.mrb[47].mxu0  ;;  %v1665_v50 = vpop.f32.mrb[47].mxu1  ;;  %v3376_v0 = vmul.f32 -1.442695, %v1673_v13 }
 0x2ce   :  { %v3375_v11 = vmul.f32 -1.442695, %v1672_v57  ;;  %v3484_v49 = vpop.eup %3483  ;;  %v3377_v24 = vmul.f32 -1.442695, %v1674_v9 }
 0x2cf   :  { %3489 = vpow2.f32 %v3374_v2  ;;  %v3486_v17 = vpop.eup %3485  ;;  %v1699_v48 = vadd.f32 1.0, %v3484_v49 }
 0x2d0   :  { %3491 = vpow2.f32 %v3371_v58  ;;  %v1701_v18 = vadd.f32 1.0, %v3486_v17  ;;  %v3488_v1 = vpop.eup %3487 }
 0x2d1   :  { %3493 = vpow2.f32 %v3375_v11  ;;  %v1702_v56 = vadd.f32 1.0, %v3488_v1 }
 0x2d2   :  { %3495 = vrcp.f32 %v1699_v48 }
 0x2d3   :  { %3497 = vrcp.f32 %v1701_v18 }
 0x2d9   :  { %v3490_v10 = vpop.eup %3489 }
 0x2da   :  { %v3492_v47 = vpop.eup %3491  ;;  %v1703_v40 = vadd.f32 1.0, %v3490_v10 }
 0x2db   :  { %v3494_v63 = vpop.eup %3493  ;;  %v1700_v57 = vadd.f32 1.0, %v3492_v47 }
 0x2dc   :  { %3499 = vrcp.f32 %v1703_v40  ;;  %v1704_v19 = vadd.f32 1.0, %v3494_v63  ;;  %v3496_v58 = vpop.eup %3495 }
 0x2dd   :  { %3501 = vpow2.f32 %v3376_v0  ;;  %v3498_v55 = vpop.eup %3497 }
 0x2de   :  { %3503 = vrcp.f32 %v1704_v19  ;;  %v1727_v48 = vmul.f32 %v3498_v55, %v4981_v27 }
 0x2df   :  { %3505 = vpow2.f32 %v3377_v24 }
 0x2e0   :  { %3507 = vrcp.f32 %v1702_v56 }
 0x2e1   :  { %3509 = vrcp.f32 %v1700_v57 }
 0x2e6   :  { %v3500_v16 = vpop.eup %3499 }
 0x2e7   :  { %v3502_v2 = vpop.eup %3501  ;;  %v1723_v13 = vmul.f32 2.0, %v3500_v16 }
 0x2e8   :  { %v3504_v8 = vpop.eup %3503  ;;  %v1705_v9 = vadd.f32 1.0, %v3502_v2 }
 0x2e9   :  { %v3506_v50 = vpop.eup %3505  ;;  %v3378_v11 = vadd.f32 -1.0, %v1723_v13  ;;  %v1724_v49 = vmul.f32 2.0, %v3504_v8  ;;  %v6577_v13 = vld [vmem:[#allocation87_spill] sm:$0xff]  ;;  %v6578_v8 = vld [vmem:[#allocation88_spill] sm:$0xff] }
 0x2ea   :  { %v3508_v17 = vpop.eup %3507  ;;  %v1706_v0 = vadd.f32 1.0, %v3506_v50  ;;  %3511 = vrcp.f32 %v1705_v9  ;;  %v6579_v50 = vld [vmem:[#allocation89_spill] sm:$0xff] }
 0x2eb   :  { %v1729_v18 = vmul.f32 %v3496_v58, %v3378_v11  ;;  %v3379_v1 = vadd.f32 -1.0, %v1724_v49  ;;  %v3510_v10 = vpop.eup %3509  ;;  %v1728_v40 = vmul.f32 %v3508_v17, %v4984_v59  ;;  %v6576_v59 = vld [vmem:[#allocation86_spill] sm:$0xff]  ;;  %v6581_v49 = vld [vmem:[#allocation91_spill] sm:$0xff]  ;;  %v6582_v17 = vld [vmem:[#allocation92_spill] sm:$0xff] }
 0x2ec   :  { %v6580_v11 = vld [vmem:[#allocation90_spill] sm:$0xff]  ;;  %v6583_v9 = vld [vmem:[#allocation93_spill] sm:$0xff] }
 0x2ed   :  { %v5130_v47 = vadd.f32 %v1729_v18, %v1727_v48  ;;  %v1730_v63 = vmul.f32 %v3510_v10, %v3379_v1  ;;  %v6584_v48 = vld [vmem:[#allocation94_spill] sm:$0xff]  ;;  %v6585_v18 = vld [vmem:[#allocation95_spill] sm:$0xff]  ;;  %v6586_v1 = vld [vmem:[#allocation96_spill] sm:$0xff] }
 0x2ee   :  { %v6587_v10 = vld [vmem:[#allocation97_spill] sm:$0xff] }
 0x2ef   :  { %3513 = vtanh.f32 %v5130_v47  ;;  %v5134_v24 = vadd.f32 %v1730_v63, %v1728_v40  ;;  %v6589_v40 = vld [vmem:[#allocation99_spill] sm:$0xff]  ;;  %v6590_v63 = vld [vmem:[#allocation100_spill] sm:$0xff] }
 0x2f0   :  { %3515 = vrcp.f32 %v1706_v0  ;;  %v6588_v0 = vld [vmem:[#allocation98_spill] sm:$0xff] }
 0x2f1   :  { %3517 = vtanh.f32 %v5134_v24 }
 0x2f4   :  { %v3512_v56 = vpop.eup %3511 }
 0x2f9   :  { %v3514_v19 = vpop.eup %3513 }
 0x2fa   :  { %v3516_v27 = vpop.eup %3515  ;;  %v1735_v58 = vmul.f32 %v3514_v19, %v3512_v56  ;;  %v6591_v56 = vld [vmem:[#allocation101_spill] sm:$0xff]  ;;  %v6592_v19 = vld [vmem:[#allocation102_spill] sm:$0xff] }
 0x2fb   :  { %v3518_v57 = vpop.eup %3517 }
 0x2fc   :  { %v1736_v55 = vmul.f32 %v3518_v57, %v3516_v27  ;;  %v5137_v2 = vpack.c.bf16 %v1735_v58, %v1735_v58  ;;  %v6593_v27 = vld [vmem:[#allocation103_spill] sm:$0xff]  ;;  %v6594_v57 = vld [vmem:[#allocation104_spill] sm:$0xff]  ;;  %v6595_v58 = vld [vmem:[#allocation105_spill] sm:$0xff] }
 0x2fe   :  { %v1738_v16 = vpack.c.bf16 %v1736_v55, %v1736_v55  ;;  %v6596_v55 = vld [vmem:[#allocation106_spill] sm:$0xff] }
 0x300   :  { %1771 = vmatprep.mubr.bf16.mxu0 %v1738_v16  ;;  %1812 = vmatprep.mubr.bf16.mxu1 %v1738_v16 }
 0x301   :  { %1772 = vmatmul.mubr.bf16.vlgmr.msra.gmra.mrb[48].mxu0 %v5137_v2  ;;  %1813 = vmatmul.mubr.bf16.vlgmr.msra.gmra.mrb[48].mxu1 %v5137_v2 }
 0x302   :  { %1822 = vmatpush1.bf16.msra.mxu0 %v6473_v39  ;;  %1863 = vmatpush1.bf16.msra.mxu1 %v6474_v12 }
 0x303   :  { %1853 = vmatprep.mubr.bf16.mxu0 %v1738_v16  ;;  %1894 = vmatprep.mubr.bf16.mxu1 %v1738_v16  ;;  %v6597_v16 = vld [vmem:[#allocation107_spill] sm:$0xff] }
 0x304   :  { %1823 = vmatprep.subr.bf16.mxu0 %v6475_v51  ;;  %1864 = vmatprep.subr.bf16.mxu1 %v6476_v6 }
 0x306   :  { %1824 = vmatpush1.bf16.msra.mxu0 %v6477_v22  ;;  %1865 = vmatpush1.bf16.msra.mxu1 %v6478_v26 }
 0x307   :  { %1825 = vmatprep.subr.bf16.mxu0 %v6479_v35  ;;  %1866 = vmatprep.subr.bf16.mxu1 %v6480_v30 }
 0x30a   :  { %1826 = vmatpush1.bf16.msra.mxu0 %v6481_v54  ;;  %1867 = vmatpush1.bf16.msra.mxu1 %v6482_v5 }
 0x30b   :  { %1827 = vmatprep.subr.bf16.mxu0 %v6483_v43  ;;  %1868 = vmatprep.subr.bf16.mxu1 %v6484_v53 }
 0x30e   :  { %1828 = vmatpush1.bf16.msra.mxu0 %v6485_v46  ;;  %1869 = vmatpush1.bf16.msra.mxu1 %v6486_v25 }
 0x30f   :  { %1829 = vmatprep.subr.bf16.mxu0 %v6487_v44  ;;  %1870 = vmatprep.subr.bf16.mxu1 %v6488_v33 }
 0x312   :  { %1830 = vmatpush1.bf16.msra.mxu0 %v6489_v7  ;;  %1871 = vmatpush1.bf16.msra.mxu1 %v6576_v59 }
 0x313   :  { %1831 = vmatprep.subr.bf16.mxu0 %v6577_v13  ;;  %1872 = vmatprep.subr.bf16.mxu1 %v6578_v8 }
 0x316   :  { %1832 = vmatpush1.bf16.msra.mxu0 %v6579_v50  ;;  %1873 = vmatpush1.bf16.msra.mxu1 %v6580_v11 }
 0x317   :  { %1833 = vmatprep.subr.bf16.mxu0 %v6581_v49  ;;  %1874 = vmatprep.subr.bf16.mxu1 %v6582_v17 }
 0x31a   :  { %1834 = vmatpush1.bf16.msra.mxu0 %v6583_v9  ;;  %1875 = vmatpush1.bf16.msra.mxu1 %v6584_v48 }
 0x31b   :  { %1835 = vmatprep.subr.bf16.mxu0 %v6585_v18  ;;  %1876 = vmatprep.subr.bf16.mxu1 %v6586_v1 }
 0x31e   :  { %1836 = vmatpush1.bf16.msra.mxu0 %v6587_v10  ;;  %1877 = vmatpush1.bf16.msra.mxu1 %v6588_v0  ;;  %v6598_v10 = vld [vmem:[#allocation108_spill] sm:$0xff]  ;;  %v6599_v0 = vld [vmem:[#allocation109_spill] sm:$0xff] }
 0x31f   :  { %1837 = vmatprep.subr.bf16.mxu0 %v6589_v40  ;;  %1878 = vmatprep.subr.bf16.mxu1 %v6590_v63 }
 0x322   :  { %1838 = vmatpush1.bf16.msra.mxu0 %v6591_v56  ;;  %1879 = vmatpush1.bf16.msra.mxu1 %v6592_v19 }
 0x323   :  { %1839 = vmatprep.subr.bf16.mxu0 %v6593_v27  ;;  %1880 = vmatprep.subr.bf16.mxu1 %v6594_v57 }
 0x326   :  { %1840 = vmatpush1.bf16.msra.mxu0 %v6595_v58  ;;  %1881 = vmatpush1.bf16.msra.mxu1 %v6596_v55 }
 0x327   :  { %1841 = vmatprep.subr.bf16.mxu0 %v6597_v16  ;;  %1882 = vmatprep.subr.bf16.mxu1 %v6598_v10 }
 0x32a   :  { %1842 = vmatpush1.bf16.msra.mxu0 %v6599_v0  ;;  %1883 = vmatpush1.bf16.msra.mxu1 %v6514_v31 }
 0x32b   :  { %1843 = vmatprep.subr.bf16.mxu0 %v6515_v4  ;;  %1884 = vmatprep.subr.bf16.mxu1 %v6516_v32 }
 0x32e   :  { %1844 = vmatpush1.bf16.msra.mxu0 %v6517_v60  ;;  %1885 = vmatpush1.bf16.msra.mxu1 %v6518_v45 }
 0x32f   :  { %1845 = vmatprep.subr.bf16.mxu0 %v6519_v28  ;;  %1886 = vmatprep.subr.bf16.mxu1 %v6520_v34 }
 0x332   :  { %1846 = vmatpush1.bf16.msra.mxu0 %v6521_v14  ;;  %1887 = vmatpush1.bf16.msra.mxu1 %v6522_v29  ;;  %v6667_v29 = vld [vmem:[#allocation137_spill] sm:$0xff]  ;;  %v6668_v14 = vld [vmem:[#allocation140_spill] sm:$0xff] }
 0x333   :  { %1847 = vmatprep.subr.bf16.mxu0 %v6523_v23  ;;  %1888 = vmatprep.subr.bf16.mxu1 %v6524_v61  ;;  %v6666_v61 = vld [vmem:[#allocation138_spill] sm:$0xff] }
 0x336   :  { %1848 = vmatpush1.bf16.msra.mxu0 %v4625_v62  ;;  %1889 = vmatpush1.bf16.msra.mxu1 %v4629_v52  ;;  %v6600_v62 = vld [vmem:[#allocation4_spill] sm:$0xff] }
 0x337   :  { %1849 = vmatprep.subr.bf16.mxu0 %v4631_v42  ;;  %1890 = vmatprep.subr.bf16.mxu1 %v4634_v38  ;;  %v6601_v38 = vld [vmem:[#allocation5_spill] sm:$0xff]  ;;  %v6610_v42 = vld [vmem:[#allocation14_spill] sm:$0xff]  ;;  %v6665_v52 = vld [vmem:[#allocation136_spill] sm:$0xff] }
 0x33a   :  { %1850 = vmatpush1.bf16.msra.mxu0 %v4649_v36  ;;  %1891 = vmatpush1.bf16.msra.mxu1 %v4653_v21  ;;  %v6602_v36 = vld [vmem:[#allocation6_spill] sm:$0xff]  ;;  %v6603_v21 = vld [vmem:[#allocation7_spill] sm:$0xff] }
 0x33b   :  { %1851 = vmatprep.subr.bf16.mxu0 %v4655_v20  ;;  %1892 = vmatprep.subr.bf16.mxu1 %v4658_v15  ;;  %v6604_v20 = vld [vmem:[#allocation8_spill] sm:$0xff]  ;;  %v6605_v15 = vld [vmem:[#allocation9_spill] sm:$0xff] }
 0x33e   :  { %1852 = vmatpush1.bf16.msra.mxu0 %v4661_v3  ;;  %1893 = vmatpush1.bf16.msra.mxu1 %v4665_v41  ;;  %v6606_v3 = vld [vmem:[#allocation10_spill] sm:$0xff]  ;;  %v6607_v41 = vld [vmem:[#allocation11_spill] sm:$0xff] }
 0x33f   :  { %1975 = vmatprep.subr.bf16.mxu0 %v3853_v37  ;;  %2016 = vmatprep.subr.bf16.mxu1 %v6600_v62  ;;  %v6608_v37 = vld [vmem:[#allocation12_spill] sm:$0xff]  ;;  %v6609_v62 = vld [vmem:[#allocation13_spill] sm:$0xff] }
 0x341   :  { %1854 = vmatmul.mubr.bf16.vlgmr.msra.gmra.mrb[52].mxu0 %v5137_v2  ;;  %1895 = vmatmul.mubr.bf16.vlgmr.msra.gmra.mrb[52].mxu1 %v5137_v2  ;;  %v6611_v2 = vld [vmem:[#allocation15_spill] sm:$0xff] }
 0x342   :  { %1976 = vmatpush1.bf16.msra.mxu0 %v6601_v38  ;;  %2017 = vmatpush1.bf16.msra.mxu1 %v6602_v36  ;;  %v6612_v38 = vld [vmem:[#allocation16_spill] sm:$0xff]  ;;  %v6613_v36 = vld [vmem:[#allocation17_spill] sm:$0xff] }
 0x343   :  { %1977 = vmatprep.subr.bf16.mxu0 %v6603_v21  ;;  %2018 = vmatprep.subr.bf16.mxu1 %v6604_v20  ;;  %v6614_v21 = vld [vmem:[#allocation18_spill] sm:$0xff]  ;;  %v6615_v20 = vld [vmem:[#allocation19_spill] sm:$0xff] }
 0x346   :  { %1978 = vmatpush1.bf16.msra.mxu0 %v6605_v15  ;;  %2019 = vmatpush1.bf16.msra.mxu1 %v6606_v3  ;;  %v6616_v15 = vld [vmem:[#allocation20_spill] sm:$0xff]  ;;  %v6617_v3 = vld [vmem:[#allocation21_spill] sm:$0xff] }
 0x347   :  { %1979 = vmatprep.subr.bf16.mxu0 %v6607_v41  ;;  %2020 = vmatprep.subr.bf16.mxu1 %v6608_v37  ;;  %v6618_v41 = vld [vmem:[#allocation22_spill] sm:$0xff]  ;;  %v6619_v37 = vld [vmem:[#allocation23_spill] sm:$0xff] }
 0x34a   :  { %1980 = vmatpush1.bf16.msra.mxu0 %v6609_v62  ;;  %2021 = vmatpush1.bf16.msra.mxu1 %v6610_v42  ;;  %v6620_v62 = vld [vmem:[#allocation24_spill] sm:$0xff]  ;;  %v6621_v42 = vld [vmem:[#allocation25_spill] sm:$0xff] }
 0x34b   :  { %1981 = vmatprep.subr.bf16.mxu0 %v6611_v2  ;;  %2022 = vmatprep.subr.bf16.mxu1 %v6612_v38  ;;  %v6622_v2 = vld [vmem:[#allocation26_spill] sm:$0xff]  ;;  %v6623_v38 = vld [vmem:[#allocation27_spill] sm:$0xff] }
 0x34e   :  { %1982 = vmatpush1.bf16.msra.mxu0 %v6613_v36  ;;  %2023 = vmatpush1.bf16.msra.mxu1 %v6614_v21  ;;  %v6624_v36 = vld [vmem:[#allocation28_spill] sm:$0xff]  ;;  %v6625_v21 = vld [vmem:[#allocation29_spill] sm:$0xff] }
 0x34f   :  { %1983 = vmatprep.subr.bf16.mxu0 %v6615_v20  ;;  %2024 = vmatprep.subr.bf16.mxu1 %v6616_v15  ;;  %v6626_v20 = vld [vmem:[#allocation30_spill] sm:$0xff]  ;;  %v6627_v15 = vld [vmem:[#allocation31_spill] sm:$0xff] }
 0x352   :  { %1984 = vmatpush1.bf16.msra.mxu0 %v6617_v3  ;;  %2025 = vmatpush1.bf16.msra.mxu1 %v6618_v41  ;;  %v6628_v3 = vld [vmem:[#allocation32_spill] sm:$0xff]  ;;  %v6629_v41 = vld [vmem:[#allocation33_spill] sm:$0xff] }
 0x353   :  { %1985 = vmatprep.subr.bf16.mxu0 %v6619_v37  ;;  %2026 = vmatprep.subr.bf16.mxu1 %v6620_v62  ;;  %v6630_v37 = vld [vmem:[#allocation34_spill] sm:$0xff]  ;;  %v6631_v62 = vld [vmem:[#allocation35_spill] sm:$0xff] }
 0x356   :  { %1986 = vmatpush1.bf16.msra.mxu0 %v6621_v42  ;;  %2027 = vmatpush1.bf16.msra.mxu1 %v6622_v2  ;;  %v6632_v42 = vld [vmem:[#allocation36_spill] sm:$0xff]  ;;  %v6633_v2 = vld [vmem:[#allocation37_spill] sm:$0xff] }
 0x357   :  { %1987 = vmatprep.subr.bf16.mxu0 %v6623_v38  ;;  %2028 = vmatprep.subr.bf16.mxu1 %v6624_v36  ;;  %v6634_v38 = vld [vmem:[#allocation38_spill] sm:$0xff]  ;;  %v6635_v36 = vld [vmem:[#allocation39_spill] sm:$0xff] }
 0x35a   :  { %1988 = vmatpush1.bf16.msra.mxu0 %v6625_v21  ;;  %2029 = vmatpush1.bf16.msra.mxu1 %v6626_v20  ;;  %v6636_v21 = vld [vmem:[#allocation40_spill] sm:$0xff]  ;;  %v6637_v20 = vld [vmem:[#allocation41_spill] sm:$0xff] }
 0x35b   :  { %1989 = vmatprep.subr.bf16.mxu0 %v6627_v15  ;;  %2030 = vmatprep.subr.bf16.mxu1 %v6628_v3  ;;  %v6638_v15 = vld [vmem:[#allocation42_spill] sm:$0xff]  ;;  %v6639_v3 = vld [vmem:[#allocation43_spill] sm:$0xff] }
 0x35e   :  { %1990 = vmatpush1.bf16.msra.mxu0 %v6629_v41  ;;  %2031 = vmatpush1.bf16.msra.mxu1 %v6630_v37  ;;  %v6640_v41 = vld [vmem:[#allocation44_spill] sm:$0xff]  ;;  %v6641_v37 = vld [vmem:[#allocation45_spill] sm:$0xff] }
 0x35f   :  { %1991 = vmatprep.subr.bf16.mxu0 %v6631_v62  ;;  %2032 = vmatprep.subr.bf16.mxu1 %v6632_v42  ;;  %v6642_v62 = vld [vmem:[#allocation46_spill] sm:$0xff]  ;;  %v6643_v42 = vld [vmem:[#allocation47_spill] sm:$0xff] }
 0x362   :  { %1992 = vmatpush1.bf16.msra.mxu0 %v6633_v2  ;;  %2033 = vmatpush1.bf16.msra.mxu1 %v6634_v38  ;;  %v6644_v2 = vld [vmem:[#allocation48_spill] sm:$0xff]  ;;  %v6645_v38 = vld [vmem:[#allocation49_spill] sm:$0xff] }
 0x363   :  { %1993 = vmatprep.subr.bf16.mxu0 %v6635_v36  ;;  %2034 = vmatprep.subr.bf16.mxu1 %v6636_v21  ;;  %v6646_v36 = vld [vmem:[#allocation50_spill] sm:$0xff]  ;;  %v6647_v21 = vld [vmem:[#allocation51_spill] sm:$0xff] }
 0x366   :  { %1994 = vmatpush1.bf16.msra.mxu0 %v6637_v20  ;;  %2035 = vmatpush1.bf16.msra.mxu1 %v6638_v15  ;;  %v6648_v20 = vld [vmem:[#allocation52_spill] sm:$0xff]  ;;  %v6649_v15 = vld [vmem:[#allocation53_spill] sm:$0xff] }
 0x367   :  { %1995 = vmatprep.subr.bf16.mxu0 %v6639_v3  ;;  %2036 = vmatprep.subr.bf16.mxu1 %v6640_v41  ;;  %v6650_v3 = vld [vmem:[#allocation54_spill] sm:$0xff]  ;;  %v6651_v41 = vld [vmem:[#allocation55_spill] sm:$0xff] }
 0x36a   :  { %1996 = vmatpush1.bf16.msra.mxu0 %v6641_v37  ;;  %2037 = vmatpush1.bf16.msra.mxu1 %v6642_v62  ;;  %v6652_v37 = vld [vmem:[#allocation56_spill] sm:$0xff]  ;;  %v6653_v62 = vld [vmem:[#allocation57_spill] sm:$0xff] }
 0x36b   :  { %1997 = vmatprep.subr.bf16.mxu0 %v6643_v42  ;;  %2038 = vmatprep.subr.bf16.mxu1 %v6644_v2  ;;  %v6654_v42 = vld [vmem:[#allocation58_spill] sm:$0xff]  ;;  %v6655_v2 = vld [vmem:[#allocation59_spill] sm:$0xff] }
 0x36e   :  { %1998 = vmatpush1.bf16.msra.mxu0 %v6645_v38  ;;  %2039 = vmatpush1.bf16.msra.mxu1 %v6646_v36  ;;  %v6656_v38 = vld [vmem:[#allocation60_spill] sm:$0xff]  ;;  %v6657_v36 = vld [vmem:[#allocation61_spill] sm:$0xff] }
 0x36f   :  { %1999 = vmatprep.subr.bf16.mxu0 %v6647_v21  ;;  %2040 = vmatprep.subr.bf16.mxu1 %v6648_v20  ;;  %v6658_v21 = vld [vmem:[#allocation62_spill] sm:$0xff]  ;;  %v6659_v20 = vld [vmem:[#allocation63_spill] sm:$0xff] }
 0x372   :  { %2000 = vmatpush1.bf16.msra.mxu0 %v6649_v15  ;;  %2041 = vmatpush1.bf16.msra.mxu1 %v6650_v3  ;;  %v6660_v15 = vld [vmem:[#allocation64_spill] sm:$0xff]  ;;  %v6661_v3 = vld [vmem:[#allocation65_spill] sm:$0xff] }
 0x373   :  { %2001 = vmatprep.subr.bf16.mxu0 %v6651_v41  ;;  %2042 = vmatprep.subr.bf16.mxu1 %v6652_v37  ;;  %v6662_v41 = vld [vmem:[#allocation66_spill] sm:$0xff]  ;;  %v6663_v37 = vld [vmem:[#allocation67_spill] sm:$0xff] }
 0x376   :  { %2002 = vmatpush1.bf16.msra.mxu0 %v6653_v62  ;;  %2043 = vmatpush1.bf16.msra.mxu1 %v6654_v42  ;;  %v6664_v62 = vld [vmem:[#allocation68_spill] sm:$0xff] }
 0x377   :  { %2003 = vmatprep.subr.bf16.mxu0 %v6655_v2  ;;  %2044 = vmatprep.subr.bf16.mxu1 %v6656_v38 }
 0x37a   :  { %2004 = vmatpush1.bf16.msra.mxu0 %v6657_v36  ;;  %2045 = vmatpush1.bf16.msra.mxu1 %v6658_v21 }
 0x37b   :  { %2005 = vmatprep.subr.bf16.mxu0 %v6659_v20  ;;  %2046 = vmatprep.subr.bf16.mxu1 %v6660_v15 }
 0x37e   :  { %2006 = vmatpush1.bf16.msra.mxu0 %v6661_v3  ;;  %2047 = vmatpush1.bf16.msra.mxu1 %v6662_v41 }
 0x37f   :  { %2057 = vmatprep.subr.bf16.mxu0 %v6663_v37  ;;  %2098 = vmatprep.subr.bf16.mxu1 %v6664_v62 }
 0x3d4   :  { %v1773_v42 = vpop.f32.mrb[48].mxu0  ;;  %v1814_v2 = vpop.f32.mrb[48].mxu1 }
 0x3d5   :  { %v1903_v38 = vadd.f32 %v1773_v42, %v6665_v52  ;;  %v1905_v36 = vadd.f32 %v1814_v2, %v6666_v61  ;;  %v1775_v23 = vpop.f32.mrb[49].mxu0  ;;  %v1816_v21 = vpop.f32.mrb[49].mxu1  ;;  %v6669_v42 = vld [vmem:[#allocation164_spill] sm:$0xff]  ;;  %v6670_v61 = vld [vmem:[#allocation166_spill] sm:$0xff] }
 0x3d6   :  { %v1904_v20 = vadd.f32 %v1775_v23, %v6667_v29  ;;  %v1906_v15 = vadd.f32 %v1816_v21, %v6668_v14  ;;  %v1777_v34 = vpop.f32.mrb[50].mxu0  ;;  %v1818_v3 = vpop.f32.mrb[50].mxu1  ;;  %v6671_v29 = vld [vmem:[#allocation165_spill] sm:$0xff] }
 0x3d7   :  { %v1778_v28 = vpop.f32.mrb[51].mxu0  ;;  %v1819_v41 = vpop.f32.mrb[51].mxu1  ;;  %v3380_v45 = vmul.f32 -1.442695, %v1903_v38  ;;  %v3382_v37 = vmul.f32 -1.442695, %v1905_v36 }
 0x3d8   :  { %v3383_v62 = vmul.f32 -1.442695, %v1906_v15  ;;  %v3381_v23 = vmul.f32 -1.442695, %v1904_v20  ;;  %v6672_v34 = vld [vmem:[#allocation168_spill] sm:$0xff] }
 0x3d9   :  { %3519 = vpow2.f32 %v3380_v45 }
 0x3da   :  { %3521 = vpow2.f32 %v3382_v37 }
 0x3db   :  { %3523 = vpow2.f32 %v3383_v62 }
 0x3e3   :  { %v3520_v15 = vpop.eup %3519 }
 0x414   :  { %v1855_v60 = vpop.f32.mrb[52].mxu0  ;;  %v1896_v32 = vpop.f32.mrb[52].mxu1 }
 0x415   :  { %v1907_v52 = vadd.f32 %v1855_v60, %v6669_v42  ;;  %v1909_v2 = vadd.f32 %v1896_v32, %v6670_v61  ;;  %v1857_v4 = vpop.f32.mrb[53].mxu0  ;;  %v1898_v31 = vpop.f32.mrb[53].mxu1  ;;  %v1935_v32 = vadd.f32 1.0, %v3520_v15 }
 0x416   :  { %v1908_v21 = vadd.f32 %v1857_v4, %v6671_v29  ;;  %v1910_v3 = vadd.f32 %v1898_v31, %v6672_v34  ;;  %v1859_v28 = vpop.f32.mrb[54].mxu0  ;;  %v1900_v41 = vpop.f32.mrb[54].mxu1 }
 0x417   :  { %v3384_v38 = vmul.f32 -1.442695, %v1907_v52  ;;  %v1860_v36 = vpop.f32.mrb[55].mxu0  ;;  %v1901_v45 = vpop.f32.mrb[55].mxu1  ;;  %v3386_v61 = vmul.f32 -1.442695, %v1909_v2 }
 0x418   :  { %v3385_v37 = vmul.f32 -1.442695, %v1908_v21  ;;  %v3522_v60 = vpop.eup %3521  ;;  %v3387_v52 = vmul.f32 -1.442695, %v1910_v3 }
 0x419   :  { %3525 = vpow2.f32 %v3384_v38  ;;  %v1937_v14 = vadd.f32 1.0, %v3522_v60  ;;  %v3524_v42 = vpop.eup %3523 }
 0x41a   :  { %3527 = vpow2.f32 %v3381_v23  ;;  %v1938_v34 = vadd.f32 1.0, %v3524_v42 }
 0x41b   :  { %3529 = vpow2.f32 %v3385_v37 }
 0x41c   :  { %3531 = vrcp.f32 %v1935_v32 }
 0x41d   :  { %3533 = vrcp.f32 %v1937_v14 }
 0x423   :  { %v3526_v20 = vpop.eup %3525 }
 0x424   :  { %v3528_v4 = vpop.eup %3527  ;;  %v1939_v31 = vadd.f32 1.0, %v3526_v20 }
 0x425   :  { %v3530_v29 = vpop.eup %3529  ;;  %v1936_v21 = vadd.f32 1.0, %v3528_v4 }
 0x426   :  { %3535 = vrcp.f32 %v1939_v31  ;;  %v1940_v62 = vadd.f32 1.0, %v3530_v29  ;;  %v3532_v23 = vpop.eup %3531 }
 0x427   :  { %3537 = vpow2.f32 %v3386_v61  ;;  %v3534_v28 = vpop.eup %3533 }
 0x428   :  { %3539 = vrcp.f32 %v1940_v62  ;;  %v1963_v32 = vmul.f32 %v3534_v28, %v5130_v47 }
 0x429   :  { %3541 = vpow2.f32 %v3387_v52 }
 0x42a   :  { %3543 = vrcp.f32 %v1938_v34 }
 0x42b   :  { %3545 = vrcp.f32 %v1936_v21 }
 0x430   :  { %v3536_v41 = vpop.eup %3535 }
 0x431   :  { %v3538_v38 = vpop.eup %3537  ;;  %v1959_v2 = vmul.f32 2.0, %v3536_v41 }
 0x432   :  { %v3540_v36 = vpop.eup %3539  ;;  %v1941_v3 = vadd.f32 1.0, %v3538_v38 }
 0x433   :  { %v3542_v45 = vpop.eup %3541  ;;  %v3388_v37 = vadd.f32 -1.0, %v1959_v2  ;;  %v1960_v15 = vmul.f32 2.0, %v3540_v36  ;;  %v6674_v2 = vld [vmem:[#allocation98_spill] sm:$0xff] }
 0x434   :  { %v3544_v60 = vpop.eup %3543  ;;  %v1942_v61 = vadd.f32 1.0, %v3542_v45  ;;  %3547 = vrcp.f32 %v1941_v3  ;;  %v6675_v36 = vld [vmem:[#allocation110_spill] sm:$0xff]  ;;  %v6676_v45 = vld [vmem:[#allocation111_spill] sm:$0xff] }
 0x435   :  { %v1965_v14 = vmul.f32 %v3532_v23, %v3388_v37  ;;  %v3389_v42 = vadd.f32 -1.0, %v1960_v15  ;;  %v3546_v20 = vpop.eup %3545  ;;  %v1964_v31 = vmul.f32 %v3544_v60, %v5134_v24  ;;  %v6673_v24 = vld [vmem:[#allocation97_spill] sm:$0xff]  ;;  %v6677_v37 = vld [vmem:[#allocation112_spill] sm:$0xff]  ;;  %v6679_v60 = vld [vmem:[#allocation114_spill] sm:$0xff] }
 0x436   :  { %v6678_v15 = vld [vmem:[#allocation113_spill] sm:$0xff]  ;;  %v6680_v3 = vld [vmem:[#allocation115_spill] sm:$0xff] }
 0x437   :  { %v5280_v4 = vadd.f32 %v1965_v14, %v1963_v32  ;;  %v1966_v29 = vmul.f32 %v3546_v20, %v3389_v42  ;;  %v6681_v32 = vld [vmem:[#allocation116_spill] sm:$0xff]  ;;  %v6682_v14 = vld [vmem:[#allocation117_spill] sm:$0xff]  ;;  %v6683_v42 = vld [vmem:[#allocation118_spill] sm:$0xff] }
 0x438   :  { %v6684_v20 = vld [vmem:[#allocation119_spill] sm:$0xff] }
 0x439   :  { %3549 = vtanh.f32 %v5280_v4  ;;  %v5284_v52 = vadd.f32 %v1966_v29, %v1964_v31  ;;  %v6686_v31 = vld [vmem:[#allocation121_spill] sm:$0xff]  ;;  %v6687_v29 = vld [vmem:[#allocation122_spill] sm:$0xff] }
 0x43a   :  { %3551 = vrcp.f32 %v1942_v61  ;;  %v6685_v61 = vld [vmem:[#allocation120_spill] sm:$0xff] }
 0x43b   :  { %3553 = vtanh.f32 %v5284_v52 }
 0x43e   :  { %v3548_v34 = vpop.eup %3547 }
 0x443   :  { %v3550_v62 = vpop.eup %3549 }
 0x444   :  { %v3552_v47 = vpop.eup %3551  ;;  %v1971_v23 = vmul.f32 %v3550_v62, %v3548_v34  ;;  %v6688_v34 = vld [vmem:[#allocation123_spill] sm:$0xff]  ;;  %v6689_v62 = vld [vmem:[#allocation124_spill] sm:$0xff] }
 0x445   :  { %v3554_v21 = vpop.eup %3553 }
 0x446   :  { %v1972_v28 = vmul.f32 %v3554_v21, %v3552_v47  ;;  %v5287_v38 = vpack.c.bf16 %v1971_v23, %v1971_v23  ;;  %v6690_v47 = vld [vmem:[#allocation125_spill] sm:$0xff]  ;;  %v6691_v21 = vld [vmem:[#allocation126_spill] sm:$0xff]  ;;  %v6692_v23 = vld [vmem:[#allocation127_spill] sm:$0xff] }
 0x448   :  { %v1974_v41 = vpack.c.bf16 %v1972_v28, %v1972_v28  ;;  %v6693_v28 = vld [vmem:[#allocation128_spill] sm:$0xff] }
 0x44a   :  { %2007 = vmatprep.mubr.bf16.mxu0 %v1974_v41  ;;  %2048 = vmatprep.mubr.bf16.mxu1 %v1974_v41 }
 0x44b   :  { %2008 = vmatmul.mubr.bf16.vlgmr.msra.gmra.mrb[56].mxu0 %v5287_v38  ;;  %2049 = vmatmul.mubr.bf16.vlgmr.msra.gmra.mrb[56].mxu1 %v5287_v38 }
 0x44c   :  { %2058 = vmatpush1.bf16.msra.mxu0 %v6473_v39  ;;  %2099 = vmatpush1.bf16.msra.mxu1 %v6474_v12 }
 0x44d   :  { %2089 = vmatprep.mubr.bf16.mxu0 %v1974_v41  ;;  %2130 = vmatprep.mubr.bf16.mxu1 %v1974_v41  ;;  %v6694_v41 = vld [vmem:[#allocation129_spill] sm:$0xff] }
 0x44e   :  { %2059 = vmatprep.subr.bf16.mxu0 %v6475_v51  ;;  %2100 = vmatprep.subr.bf16.mxu1 %v6476_v6 }
 0x450   :  { %2060 = vmatpush1.bf16.msra.mxu0 %v6477_v22  ;;  %2101 = vmatpush1.bf16.msra.mxu1 %v6478_v26 }
 0x451   :  { %2061 = vmatprep.subr.bf16.mxu0 %v6479_v35  ;;  %2102 = vmatprep.subr.bf16.mxu1 %v6480_v30 }
 0x454   :  { %2062 = vmatpush1.bf16.msra.mxu0 %v6481_v54  ;;  %2103 = vmatpush1.bf16.msra.mxu1 %v6482_v5 }
 0x455   :  { %2063 = vmatprep.subr.bf16.mxu0 %v6483_v43  ;;  %2104 = vmatprep.subr.bf16.mxu1 %v6484_v53 }
 0x458   :  { %2064 = vmatpush1.bf16.msra.mxu0 %v6485_v46  ;;  %2105 = vmatpush1.bf16.msra.mxu1 %v6486_v25 }
 0x459   :  { %2065 = vmatprep.subr.bf16.mxu0 %v6487_v44  ;;  %2106 = vmatprep.subr.bf16.mxu1 %v6488_v33 }
 0x45c   :  { %2066 = vmatpush1.bf16.msra.mxu0 %v6489_v7  ;;  %2107 = vmatpush1.bf16.msra.mxu1 %v6576_v59 }
 0x45d   :  { %2067 = vmatprep.subr.bf16.mxu0 %v6577_v13  ;;  %2108 = vmatprep.subr.bf16.mxu1 %v6578_v8 }
 0x460   :  { %2068 = vmatpush1.bf16.msra.mxu0 %v6579_v50  ;;  %2109 = vmatpush1.bf16.msra.mxu1 %v6580_v11 }
 0x461   :  { %2069 = vmatprep.subr.bf16.mxu0 %v6581_v49  ;;  %2110 = vmatprep.subr.bf16.mxu1 %v6582_v17 }
 0x464   :  { %2070 = vmatpush1.bf16.msra.mxu0 %v6583_v9  ;;  %2111 = vmatpush1.bf16.msra.mxu1 %v6584_v48 }
 0x465   :  { %2071 = vmatprep.subr.bf16.mxu0 %v6585_v18  ;;  %2112 = vmatprep.subr.bf16.mxu1 %v6586_v1 }
 0x468   :  { %2072 = vmatpush1.bf16.msra.mxu0 %v6673_v24  ;;  %2113 = vmatpush1.bf16.msra.mxu1 %v6674_v2 }
 0x469   :  { %2073 = vmatprep.subr.bf16.mxu0 %v6589_v40  ;;  %2114 = vmatprep.subr.bf16.mxu1 %v6590_v63 }
 0x46c   :  { %2074 = vmatpush1.bf16.msra.mxu0 %v6591_v56  ;;  %2115 = vmatpush1.bf16.msra.mxu1 %v6592_v19 }
 0x46d   :  { %2075 = vmatprep.subr.bf16.mxu0 %v6593_v27  ;;  %2116 = vmatprep.subr.bf16.mxu1 %v6594_v57 }
 0x470   :  { %2076 = vmatpush1.bf16.msra.mxu0 %v6595_v58  ;;  %2117 = vmatpush1.bf16.msra.mxu1 %v6596_v55 }
 0x471   :  { %2077 = vmatprep.subr.bf16.mxu0 %v6597_v16  ;;  %2118 = vmatprep.subr.bf16.mxu1 %v6598_v10 }
 0x474   :  { %2078 = vmatpush1.bf16.msra.mxu0 %v6599_v0  ;;  %2119 = vmatpush1.bf16.msra.mxu1 %v6675_v36 }
 0x475   :  { %2079 = vmatprep.subr.bf16.mxu0 %v6676_v45  ;;  %2120 = vmatprep.subr.bf16.mxu1 %v6677_v37 }
 0x478   :  { %2080 = vmatpush1.bf16.msra.mxu0 %v6678_v15  ;;  %2121 = vmatpush1.bf16.msra.mxu1 %v6679_v60 }
 0x479   :  { %2081 = vmatprep.subr.bf16.mxu0 %v6680_v3  ;;  %2122 = vmatprep.subr.bf16.mxu1 %v6681_v32  ;;  %v6764_v32 = vld [vmem:[#allocation141_spill] sm:$0xff]  ;;  %v6765_v3 = vld [vmem:[#allocation143_spill] sm:$0xff] }
 0x47c   :  { %2082 = vmatpush1.bf16.msra.mxu0 %v6682_v14  ;;  %2123 = vmatpush1.bf16.msra.mxu1 %v6683_v42  ;;  %v6763_v42 = vld [vmem:[#allocation142_spill] sm:$0xff] }
 0x47d   :  { %2083 = vmatprep.subr.bf16.mxu0 %v6684_v20  ;;  %2124 = vmatprep.subr.bf16.mxu1 %v6685_v61  ;;  %v6695_v20 = vld [vmem:[#allocation130_spill] sm:$0xff]  ;;  %v6696_v61 = vld [vmem:[#allocation3_spill] sm:$0xff] }
 0x480   :  { %2084 = vmatpush1.bf16.msra.mxu0 %v6686_v31  ;;  %2125 = vmatpush1.bf16.msra.mxu1 %v6687_v29  ;;  %v6697_v31 = vld [vmem:[#allocation4_spill] sm:$0xff]  ;;  %v6762_v29 = vld [vmem:[#allocation139_spill] sm:$0xff] }
 0x481   :  { %2085 = vmatprep.subr.bf16.mxu0 %v6688_v34  ;;  %2126 = vmatprep.subr.bf16.mxu1 %v6689_v62  ;;  %v6698_v62 = vld [vmem:[#allocation5_spill] sm:$0xff]  ;;  %v6707_v34 = vld [vmem:[#allocation14_spill] sm:$0xff] }
 0x484   :  { %2086 = vmatpush1.bf16.msra.mxu0 %v6690_v47  ;;  %2127 = vmatpush1.bf16.msra.mxu1 %v6691_v21  ;;  %v6699_v47 = vld [vmem:[#allocation6_spill] sm:$0xff]  ;;  %v6700_v21 = vld [vmem:[#allocation7_spill] sm:$0xff] }
 0x485   :  { %2087 = vmatprep.subr.bf16.mxu0 %v6692_v23  ;;  %2128 = vmatprep.subr.bf16.mxu1 %v6693_v28  ;;  %v6701_v23 = vld [vmem:[#allocation8_spill] sm:$0xff]  ;;  %v6702_v28 = vld [vmem:[#allocation9_spill] sm:$0xff] }
 0x488   :  { %2088 = vmatpush1.bf16.msra.mxu0 %v6694_v41  ;;  %2129 = vmatpush1.bf16.msra.mxu1 %v6695_v20  ;;  %v6703_v41 = vld [vmem:[#allocation10_spill] sm:$0xff]  ;;  %v6704_v20 = vld [vmem:[#allocation11_spill] sm:$0xff] }
 0x489   :  { %2211 = vmatprep.subr.bf16.mxu0 %v6696_v61  ;;  %2252 = vmatprep.subr.bf16.mxu1 %v6697_v31  ;;  %v6705_v61 = vld [vmem:[#allocation12_spill] sm:$0xff]  ;;  %v6706_v31 = vld [vmem:[#allocation13_spill] sm:$0xff] }
 0x48b   :  { %2090 = vmatmul.mubr.bf16.vlgmr.msra.gmra.mrb[60].mxu0 %v5287_v38  ;;  %2131 = vmatmul.mubr.bf16.vlgmr.msra.gmra.mrb[60].mxu1 %v5287_v38  ;;  %v6708_v38 = vld [vmem:[#allocation15_spill] sm:$0xff] }
 0x48c   :  { %2212 = vmatpush1.bf16.msra.mxu0 %v6698_v62  ;;  %2253 = vmatpush1.bf16.msra.mxu1 %v6699_v47  ;;  %v6709_v62 = vld [vmem:[#allocation16_spill] sm:$0xff]  ;;  %v6710_v47 = vld [vmem:[#allocation17_spill] sm:$0xff] }
 0x48d   :  { %2213 = vmatprep.subr.bf16.mxu0 %v6700_v21  ;;  %2254 = vmatprep.subr.bf16.mxu1 %v6701_v23  ;;  %v6711_v21 = vld [vmem:[#allocation18_spill] sm:$0xff]  ;;  %v6712_v23 = vld [vmem:[#allocation19_spill] sm:$0xff] }
 0x490   :  { %2214 = vmatpush1.bf16.msra.mxu0 %v6702_v28  ;;  %2255 = vmatpush1.bf16.msra.mxu1 %v6703_v41  ;;  %v6713_v28 = vld [vmem:[#allocation20_spill] sm:$0xff]  ;;  %v6714_v41 = vld [vmem:[#allocation21_spill] sm:$0xff] }
 0x491   :  { %2215 = vmatprep.subr.bf16.mxu0 %v6704_v20  ;;  %2256 = vmatprep.subr.bf16.mxu1 %v6705_v61  ;;  %v6715_v20 = vld [vmem:[#allocation22_spill] sm:$0xff]  ;;  %v6716_v61 = vld [vmem:[#allocation23_spill] sm:$0xff] }
 0x494   :  { %2216 = vmatpush1.bf16.msra.mxu0 %v6706_v31  ;;  %2257 = vmatpush1.bf16.msra.mxu1 %v6707_v34  ;;  %v6717_v31 = vld [vmem:[#allocation24_spill] sm:$0xff]  ;;  %v6718_v34 = vld [vmem:[#allocation25_spill] sm:$0xff] }
 0x495   :  { %2217 = vmatprep.subr.bf16.mxu0 %v6708_v38  ;;  %2258 = vmatprep.subr.bf16.mxu1 %v6709_v62  ;;  %v6719_v38 = vld [vmem:[#allocation26_spill] sm:$0xff]  ;;  %v6720_v62 = vld [vmem:[#allocation27_spill] sm:$0xff] }
 0x498   :  { %2218 = vmatpush1.bf16.msra.mxu0 %v6710_v47  ;;  %2259 = vmatpush1.bf16.msra.mxu1 %v6711_v21  ;;  %v6721_v47 = vld [vmem:[#allocation28_spill] sm:$0xff]  ;;  %v6722_v21 = vld [vmem:[#allocation29_spill] sm:$0xff] }
 0x499   :  { %2219 = vmatprep.subr.bf16.mxu0 %v6712_v23  ;;  %2260 = vmatprep.subr.bf16.mxu1 %v6713_v28  ;;  %v6723_v23 = vld [vmem:[#allocation30_spill] sm:$0xff]  ;;  %v6724_v28 = vld [vmem:[#allocation31_spill] sm:$0xff] }
 0x49c   :  { %2220 = vmatpush1.bf16.msra.mxu0 %v6714_v41  ;;  %2261 = vmatpush1.bf16.msra.mxu1 %v6715_v20  ;;  %v6725_v41 = vld [vmem:[#allocation32_spill] sm:$0xff]  ;;  %v6726_v20 = vld [vmem:[#allocation33_spill] sm:$0xff] }
 0x49d   :  { %2221 = vmatprep.subr.bf16.mxu0 %v6716_v61  ;;  %2262 = vmatprep.subr.bf16.mxu1 %v6717_v31  ;;  %v6727_v61 = vld [vmem:[#allocation34_spill] sm:$0xff]  ;;  %v6728_v31 = vld [vmem:[#allocation35_spill] sm:$0xff] }
 0x4a0   :  { %2222 = vmatpush1.bf16.msra.mxu0 %v6718_v34  ;;  %2263 = vmatpush1.bf16.msra.mxu1 %v6719_v38  ;;  %v6729_v34 = vld [vmem:[#allocation36_spill] sm:$0xff]  ;;  %v6730_v38 = vld [vmem:[#allocation37_spill] sm:$0xff] }
 0x4a1   :  { %2223 = vmatprep.subr.bf16.mxu0 %v6720_v62  ;;  %2264 = vmatprep.subr.bf16.mxu1 %v6721_v47  ;;  %v6731_v62 = vld [vmem:[#allocation38_spill] sm:$0xff]  ;;  %v6732_v47 = vld [vmem:[#allocation39_spill] sm:$0xff] }
 0x4a4   :  { %2224 = vmatpush1.bf16.msra.mxu0 %v6722_v21  ;;  %2265 = vmatpush1.bf16.msra.mxu1 %v6723_v23  ;;  %v6733_v21 = vld [vmem:[#allocation40_spill] sm:$0xff]  ;;  %v6734_v23 = vld [vmem:[#allocation41_spill] sm:$0xff] }
 0x4a5   :  { %2225 = vmatprep.subr.bf16.mxu0 %v6724_v28  ;;  %2266 = vmatprep.subr.bf16.mxu1 %v6725_v41  ;;  %v6735_v28 = vld [vmem:[#allocation42_spill] sm:$0xff]  ;;  %v6736_v41 = vld [vmem:[#allocation43_spill] sm:$0xff] }
 0x4a8   :  { %2226 = vmatpush1.bf16.msra.mxu0 %v6726_v20  ;;  %2267 = vmatpush1.bf16.msra.mxu1 %v6727_v61  ;;  %v6737_v20 = vld [vmem:[#allocation44_spill] sm:$0xff]  ;;  %v6738_v61 = vld [vmem:[#allocation45_spill] sm:$0xff] }
 0x4a9   :  { %2227 = vmatprep.subr.bf16.mxu0 %v6728_v31  ;;  %2268 = vmatprep.subr.bf16.mxu1 %v6729_v34  ;;  %v6739_v31 = vld [vmem:[#allocation46_spill] sm:$0xff]  ;;  %v6740_v34 = vld [vmem:[#allocation47_spill] sm:$0xff] }
 0x4ac   :  { %2228 = vmatpush1.bf16.msra.mxu0 %v6730_v38  ;;  %2269 = vmatpush1.bf16.msra.mxu1 %v6731_v62  ;;  %v6741_v38 = vld [vmem:[#allocation48_spill] sm:$0xff]  ;;  %v6742_v62 = vld [vmem:[#allocation49_spill] sm:$0xff] }
 0x4ad   :  { %2229 = vmatprep.subr.bf16.mxu0 %v6732_v47  ;;  %2270 = vmatprep.subr.bf16.mxu1 %v6733_v21  ;;  %v6743_v47 = vld [vmem:[#allocation50_spill] sm:$0xff]  ;;  %v6744_v21 = vld [vmem:[#allocation51_spill] sm:$0xff] }
 0x4b0   :  { %2230 = vmatpush1.bf16.msra.mxu0 %v6734_v23  ;;  %2271 = vmatpush1.bf16.msra.mxu1 %v6735_v28  ;;  %v6745_v23 = vld [vmem:[#allocation52_spill] sm:$0xff]  ;;  %v6746_v28 = vld [vmem:[#allocation53_spill] sm:$0xff] }
 0x4b1   :  { %2231 = vmatprep.subr.bf16.mxu0 %v6736_v41  ;;  %2272 = vmatprep.subr.bf16.mxu1 %v6737_v20  ;;  %v6747_v41 = vld [vmem:[#allocation54_spill] sm:$0xff]  ;;  %v6748_v20 = vld [vmem:[#allocation55_spill] sm:$0xff] }
 0x4b4   :  { %2232 = vmatpush1.bf16.msra.mxu0 %v6738_v61  ;;  %2273 = vmatpush1.bf16.msra.mxu1 %v6739_v31  ;;  %v6749_v61 = vld [vmem:[#allocation56_spill] sm:$0xff]  ;;  %v6750_v31 = vld [vmem:[#allocation57_spill] sm:$0xff] }
 0x4b5   :  { %2233 = vmatprep.subr.bf16.mxu0 %v6740_v34  ;;  %2274 = vmatprep.subr.bf16.mxu1 %v6741_v38  ;;  %v6751_v34 = vld [vmem:[#allocation58_spill] sm:$0xff]  ;;  %v6752_v38 = vld [vmem:[#allocation59_spill] sm:$0xff] }
 0x4b8   :  { %2234 = vmatpush1.bf16.msra.mxu0 %v6742_v62  ;;  %2275 = vmatpush1.bf16.msra.mxu1 %v6743_v47  ;;  %v6753_v62 = vld [vmem:[#allocation60_spill] sm:$0xff]  ;;  %v6754_v47 = vld [vmem:[#allocation61_spill] sm:$0xff] }
 0x4b9   :  { %2235 = vmatprep.subr.bf16.mxu0 %v6744_v21  ;;  %2276 = vmatprep.subr.bf16.mxu1 %v6745_v23  ;;  %v6755_v21 = vld [vmem:[#allocation62_spill] sm:$0xff]  ;;  %v6756_v23 = vld [vmem:[#allocation63_spill] sm:$0xff] }
 0x4bc   :  { %2236 = vmatpush1.bf16.msra.mxu0 %v6746_v28  ;;  %2277 = vmatpush1.bf16.msra.mxu1 %v6747_v41  ;;  %v6757_v28 = vld [vmem:[#allocation64_spill] sm:$0xff]  ;;  %v6758_v41 = vld [vmem:[#allocation65_spill] sm:$0xff] }
 0x4bd   :  { %2237 = vmatprep.subr.bf16.mxu0 %v6748_v20  ;;  %2278 = vmatprep.subr.bf16.mxu1 %v6749_v61  ;;  %v6759_v20 = vld [vmem:[#allocation66_spill] sm:$0xff]  ;;  %v6760_v61 = vld [vmem:[#allocation67_spill] sm:$0xff] }
 0x4c0   :  { %2238 = vmatpush1.bf16.msra.mxu0 %v6750_v31  ;;  %2279 = vmatpush1.bf16.msra.mxu1 %v6751_v34  ;;  %v6761_v31 = vld [vmem:[#allocation68_spill] sm:$0xff] }
 0x4c1   :  { %2239 = vmatprep.subr.bf16.mxu0 %v6752_v38  ;;  %2280 = vmatprep.subr.bf16.mxu1 %v6753_v62 }
 0x4c4   :  { %2240 = vmatpush1.bf16.msra.mxu0 %v6754_v47  ;;  %2281 = vmatpush1.bf16.msra.mxu1 %v6755_v21 }
 0x4c5   :  { %2241 = vmatprep.subr.bf16.mxu0 %v6756_v23  ;;  %2282 = vmatprep.subr.bf16.mxu1 %v6757_v28 }
 0x4c8   :  { %2242 = vmatpush1.bf16.msra.mxu0 %v6758_v41  ;;  %2283 = vmatpush1.bf16.msra.mxu1 %v6759_v20 }
 0x4c9   :  { %2293 = vmatprep.subr.bf16.mxu0 %v6760_v61  ;;  %2334 = vmatprep.subr.bf16.mxu1 %v6761_v31 }
 0x51e   :  { %v2009_v34 = vpop.f32.mrb[56].mxu0  ;;  %v2050_v38 = vpop.f32.mrb[56].mxu1 }
 0x51f   :  { %v2139_v62 = vadd.f32 %v2009_v34, %v6762_v29  ;;  %v2141_v47 = vadd.f32 %v2050_v38, %v6763_v42  ;;  %v2011_v14 = vpop.f32.mrb[57].mxu0  ;;  %v2052_v21 = vpop.f32.mrb[57].mxu1  ;;  %v6766_v29 = vld [vmem:[#allocation167_spill] sm:$0xff]  ;;  %v6767_v42 = vld [vmem:[#allocation170_spill] sm:$0xff] }
 0x520   :  { %v2140_v23 = vadd.f32 %v2011_v14, %v6764_v32  ;;  %v2142_v28 = vadd.f32 %v2052_v21, %v6765_v3  ;;  %v2013_v60 = vpop.f32.mrb[58].mxu0  ;;  %v2054_v41 = vpop.f32.mrb[58].mxu1  ;;  %v6768_v14 = vld [vmem:[#allocation169_spill] sm:$0xff] }
 0x521   :  { %v2014_v15 = vpop.f32.mrb[59].mxu0  ;;  %v2055_v20 = vpop.f32.mrb[59].mxu1  ;;  %v3390_v37 = vmul.f32 -1.442695, %v2139_v62  ;;  %v3392_v61 = vmul.f32 -1.442695, %v2141_v47 }
 0x522   :  { %v3393_v31 = vmul.f32 -1.442695, %v2142_v28  ;;  %v3391_v32 = vmul.f32 -1.442695, %v2140_v23  ;;  %v6769_v60 = vld [vmem:[#allocation171_spill] sm:$0xff] }
 0x523   :  { %3555 = vpow2.f32 %v3390_v37 }
 0x524   :  { %3557 = vpow2.f32 %v3392_v61 }
 0x525   :  { %3559 = vpow2.f32 %v3393_v31 }
 0x55e   :  { %v2091_v45 = vpop.f32.mrb[60].mxu0  ;;  %v2132_v36 = vpop.f32.mrb[60].mxu1 }
 0x55f   :  { %v2143_v34 = vadd.f32 %v2091_v45, %v6766_v29  ;;  %v2145_v38 = vadd.f32 %v2132_v36, %v6767_v42  ;;  %v2093_v0 = vpop.f32.mrb[61].mxu0  ;;  %v2134_v10 = vpop.f32.mrb[61].mxu1 }
 0x560   :  { %v2144_v3 = vadd.f32 %v2093_v0, %v6768_v14  ;;  %v2146_v21 = vadd.f32 %v2134_v10, %v6769_v60  ;;  %v2095_v15 = vpop.f32.mrb[62].mxu0  ;;  %v2136_v20 = vpop.f32.mrb[62].mxu1 }
 0x561   :  { %v3394_v62 = vmul.f32 -1.442695, %v2143_v34  ;;  %v2096_v47 = vpop.f32.mrb[63].mxu0  ;;  %v2137_v37 = vpop.f32.mrb[63].mxu1  ;;  %v3396_v42 = vmul.f32 -1.442695, %v2145_v38 }
 0x562   :  { %v3395_v61 = vmul.f32 -1.442695, %v2144_v3  ;;  %v3556_v45 = vpop.eup %3555  ;;  %v3397_v34 = vmul.f32 -1.442695, %v2146_v21 }
 0x563   :  { %3561 = vpow2.f32 %v3394_v62  ;;  %v3558_v28 = vpop.eup %3557  ;;  %v2171_v36 = vadd.f32 1.0, %v3556_v45 }
 0x564   :  { %3563 = vpow2.f32 %v3391_v32  ;;  %v2173_v41 = vadd.f32 1.0, %v3558_v28  ;;  %v3560_v29 = vpop.eup %3559 }
 0x565   :  { %3565 = vpow2.f32 %v3395_v61  ;;  %v2174_v60 = vadd.f32 1.0, %v3560_v29 }
 0x566   :  { %3567 = vrcp.f32 %v2171_v36 }
 0x567   :  { %3569 = vrcp.f32 %v2173_v41 }
 0x56d   :  { %v3562_v23 = vpop.eup %3561 }
 0x56e   :  { %v3564_v0 = vpop.eup %3563  ;;  %v2175_v10 = vadd.f32 1.0, %v3562_v23 }
 0x56f   :  { %v3566_v14 = vpop.eup %3565  ;;  %v2172_v3 = vadd.f32 1.0, %v3564_v0 }
 0x570   :  { %3571 = vrcp.f32 %v2175_v10  ;;  %v2176_v31 = vadd.f32 1.0, %v3566_v14  ;;  %v3568_v32 = vpop.eup %3567 }
 0x571   :  { %3573 = vpow2.f32 %v3396_v42  ;;  %v3570_v15 = vpop.eup %3569 }
 0x572   :  { %3575 = vrcp.f32 %v2176_v31  ;;  %v2199_v36 = vmul.f32 %v3570_v15, %v5280_v4 }
 0x573   :  { %3577 = vpow2.f32 %v3397_v34 }
 0x574   :  { %3579 = vrcp.f32 %v2174_v60 }
 0x575   :  { %3581 = vrcp.f32 %v2172_v3 }
 0x57a   :  { %v3572_v20 = vpop.eup %3571 }
 0x57b   :  { %v3574_v62 = vpop.eup %3573  ;;  %v2195_v38 = vmul.f32 2.0, %v3572_v20 }
 0x57c   :  { %v3576_v47 = vpop.eup %3575  ;;  %v2177_v21 = vadd.f32 1.0, %v3574_v62 }
 0x57d   :  { %v3578_v37 = vpop.eup %3577  ;;  %v3398_v61 = vadd.f32 -1.0, %v2195_v38  ;;  %v2196_v45 = vmul.f32 2.0, %v3576_v47  ;;  %v6771_v38 = vld [vmem:[#allocation109_spill] sm:$0xff]  ;;  %v6772_v47 = vld [vmem:[#allocation110_spill] sm:$0xff] }
 0x57e   :  { %v3580_v28 = vpop.eup %3579  ;;  %v2178_v42 = vadd.f32 1.0, %v3578_v37  ;;  %3583 = vrcp.f32 %v2177_v21  ;;  %v6773_v37 = vld [vmem:[#allocation111_spill] sm:$0xff] }
 0x57f   :  { %v2201_v41 = vmul.f32 %v3568_v32, %v3398_v61  ;;  %v3399_v29 = vadd.f32 -1.0, %v2196_v45  ;;  %v3582_v23 = vpop.eup %3581  ;;  %v2200_v10 = vmul.f32 %v3580_v28, %v5284_v52  ;;  %v6770_v52 = vld [vmem:[#allocation108_spill] sm:$0xff]  ;;  %v6775_v45 = vld [vmem:[#allocation113_spill] sm:$0xff]  ;;  %v6776_v28 = vld [vmem:[#allocation114_spill] sm:$0xff] }
 0x580   :  { %v6774_v61 = vld [vmem:[#allocation112_spill] sm:$0xff]  ;;  %v6777_v21 = vld [vmem:[#allocation115_spill] sm:$0xff] }
 0x581   :  { %v5430_v0 = vadd.f32 %v2201_v41, %v2199_v36  ;;  %v2202_v14 = vmul.f32 %v3582_v23, %v3399_v29  ;;  %v6778_v36 = vld [vmem:[#allocation116_spill] sm:$0xff]  ;;  %v6779_v41 = vld [vmem:[#allocation117_spill] sm:$0xff]  ;;  %v6780_v29 = vld [vmem:[#allocation118_spill] sm:$0xff] }
 0x582   :  { %v6781_v23 = vld [vmem:[#allocation119_spill] sm:$0xff] }
 0x583   :  { %3585 = vtanh.f32 %v5430_v0  ;;  %v5434_v34 = vadd.f32 %v2202_v14, %v2200_v10  ;;  %v6783_v10 = vld [vmem:[#allocation121_spill] sm:$0xff]  ;;  %v6784_v14 = vld [vmem:[#allocation122_spill] sm:$0xff] }
 0x584   :  { %3587 = vrcp.f32 %v2178_v42  ;;  %v6782_v42 = vld [vmem:[#allocation120_spill] sm:$0xff] }
 0x585   :  { %3589 = vtanh.f32 %v5434_v34 }
 0x588   :  { %v3584_v60 = vpop.eup %3583 }
 0x58d   :  { %v3586_v31 = vpop.eup %3585 }
 0x58e   :  { %v3588_v4 = vpop.eup %3587  ;;  %v2207_v32 = vmul.f32 %v3586_v31, %v3584_v60  ;;  %v6785_v60 = vld [vmem:[#allocation123_spill] sm:$0xff]  ;;  %v6786_v31 = vld [vmem:[#allocation124_spill] sm:$0xff] }
 0x58f   :  { %v3590_v3 = vpop.eup %3589 }
 0x590   :  { %v2208_v15 = vmul.f32 %v3590_v3, %v3588_v4  ;;  %v5437_v62 = vpack.c.bf16 %v2207_v32, %v2207_v32  ;;  %v6787_v4 = vld [vmem:[#allocation125_spill] sm:$0xff]  ;;  %v6788_v3 = vld [vmem:[#allocation126_spill] sm:$0xff]  ;;  %v6789_v32 = vld [vmem:[#allocation127_spill] sm:$0xff] }
 0x592   :  { %v2210_v20 = vpack.c.bf16 %v2208_v15, %v2208_v15  ;;  %v6790_v15 = vld [vmem:[#allocation128_spill] sm:$0xff] }
 0x594   :  { %2243 = vmatprep.mubr.bf16.mxu0 %v2210_v20  ;;  %2284 = vmatprep.mubr.bf16.mxu1 %v2210_v20 }
 0x595   :  { %2244 = vmatmul.mubr.bf16.vlgmr.msra.gmra.mrb[64].mxu0 %v5437_v62  ;;  %2285 = vmatmul.mubr.bf16.vlgmr.msra.gmra.mrb[64].mxu1 %v5437_v62 }
 0x596   :  { %2294 = vmatpush1.bf16.msra.mxu0 %v6473_v39  ;;  %2335 = vmatpush1.bf16.msra.mxu1 %v6474_v12 }
 0x597   :  { %2325 = vmatprep.mubr.bf16.mxu0 %v2210_v20  ;;  %2366 = vmatprep.mubr.bf16.mxu1 %v2210_v20  ;;  %v6791_v20 = vld [vmem:[#allocation129_spill] sm:$0xff] }
 0x598   :  { %2295 = vmatprep.subr.bf16.mxu0 %v6475_v51  ;;  %2336 = vmatprep.subr.bf16.mxu1 %v6476_v6 }
 0x59a   :  { %2296 = vmatpush1.bf16.msra.mxu0 %v6477_v22  ;;  %2337 = vmatpush1.bf16.msra.mxu1 %v6478_v26 }
 0x59b   :  { %2297 = vmatprep.subr.bf16.mxu0 %v6479_v35  ;;  %2338 = vmatprep.subr.bf16.mxu1 %v6480_v30 }
 0x59e   :  { %2298 = vmatpush1.bf16.msra.mxu0 %v6481_v54  ;;  %2339 = vmatpush1.bf16.msra.mxu1 %v6482_v5 }
 0x59f   :  { %2299 = vmatprep.subr.bf16.mxu0 %v6483_v43  ;;  %2340 = vmatprep.subr.bf16.mxu1 %v6484_v53 }
 0x5a2   :  { %2300 = vmatpush1.bf16.msra.mxu0 %v6485_v46  ;;  %2341 = vmatpush1.bf16.msra.mxu1 %v6486_v25 }
 0x5a3   :  { %2301 = vmatprep.subr.bf16.mxu0 %v6487_v44  ;;  %2342 = vmatprep.subr.bf16.mxu1 %v6488_v33 }
 0x5a6   :  { %2302 = vmatpush1.bf16.msra.mxu0 %v6489_v7  ;;  %2343 = vmatpush1.bf16.msra.mxu1 %v6576_v59 }
 0x5a7   :  { %2303 = vmatprep.subr.bf16.mxu0 %v6577_v13  ;;  %2344 = vmatprep.subr.bf16.mxu1 %v6578_v8 }
 0x5aa   :  { %2304 = vmatpush1.bf16.msra.mxu0 %v6579_v50  ;;  %2345 = vmatpush1.bf16.msra.mxu1 %v6580_v11 }
 0x5ab   :  { %2305 = vmatprep.subr.bf16.mxu0 %v6581_v49  ;;  %2346 = vmatprep.subr.bf16.mxu1 %v6582_v17 }
 0x5ae   :  { %2306 = vmatpush1.bf16.msra.mxu0 %v6583_v9  ;;  %2347 = vmatpush1.bf16.msra.mxu1 %v6584_v48 }
 0x5af   :  { %2307 = vmatprep.subr.bf16.mxu0 %v6585_v18  ;;  %2348 = vmatprep.subr.bf16.mxu1 %v6586_v1 }
 0x5b2   :  { %2308 = vmatpush1.bf16.msra.mxu0 %v6673_v24  ;;  %2349 = vmatpush1.bf16.msra.mxu1 %v6674_v2 }
 0x5b3   :  { %2309 = vmatprep.subr.bf16.mxu0 %v6589_v40  ;;  %2350 = vmatprep.subr.bf16.mxu1 %v6590_v63 }
 0x5b6   :  { %2310 = vmatpush1.bf16.msra.mxu0 %v6591_v56  ;;  %2351 = vmatpush1.bf16.msra.mxu1 %v6592_v19 }
 0x5b7   :  { %2311 = vmatprep.subr.bf16.mxu0 %v6593_v27  ;;  %2352 = vmatprep.subr.bf16.mxu1 %v6594_v57 }
 0x5ba   :  { %2312 = vmatpush1.bf16.msra.mxu0 %v6595_v58  ;;  %2353 = vmatpush1.bf16.msra.mxu1 %v6596_v55 }
 0x5bb   :  { %2313 = vmatprep.subr.bf16.mxu0 %v6597_v16  ;;  %2354 = vmatprep.subr.bf16.mxu1 %v6770_v52 }
 0x5be   :  { %2314 = vmatpush1.bf16.msra.mxu0 %v6771_v38  ;;  %2355 = vmatpush1.bf16.msra.mxu1 %v6772_v47 }
 0x5bf   :  { %2315 = vmatprep.subr.bf16.mxu0 %v6773_v37  ;;  %2356 = vmatprep.subr.bf16.mxu1 %v6774_v61 }
 0x5c2   :  { %2316 = vmatpush1.bf16.msra.mxu0 %v6775_v45  ;;  %2357 = vmatpush1.bf16.msra.mxu1 %v6776_v28 }
 0x5c3   :  { %2317 = vmatprep.subr.bf16.mxu0 %v6777_v21  ;;  %2358 = vmatprep.subr.bf16.mxu1 %v6778_v36  ;;  %v6861_v36 = vld [vmem:[#allocation145_spill] sm:$0xff]  ;;  %v6862_v21 = vld [vmem:[#allocation148_spill] sm:$0xff] }
 0x5c6   :  { %2318 = vmatpush1.bf16.msra.mxu0 %v6779_v41  ;;  %2359 = vmatpush1.bf16.msra.mxu1 %v6780_v29  ;;  %v6860_v29 = vld [vmem:[#allocation146_spill] sm:$0xff] }
 0x5c7   :  { %2319 = vmatprep.subr.bf16.mxu0 %v6781_v23  ;;  %2360 = vmatprep.subr.bf16.mxu1 %v6782_v42  ;;  %v6792_v23 = vld [vmem:[#allocation130_spill] sm:$0xff]  ;;  %v6793_v42 = vld [vmem:[#allocation3_spill] sm:$0xff] }
 0x5ca   :  { %2320 = vmatpush1.bf16.msra.mxu0 %v6783_v10  ;;  %2361 = vmatpush1.bf16.msra.mxu1 %v6784_v14  ;;  %v6794_v10 = vld [vmem:[#allocation4_spill] sm:$0xff] }
 0x5cb   :  { %2321 = vmatprep.subr.bf16.mxu0 %v6785_v60  ;;  %2362 = vmatprep.subr.bf16.mxu1 %v6786_v31  ;;  %v6795_v31 = vld [vmem:[#allocation5_spill] sm:$0xff]  ;;  %v6804_v60 = vld [vmem:[#allocation14_spill] sm:$0xff]  ;;  %v6859_v14 = vld [vmem:[#allocation144_spill] sm:$0xff] }
 0x5ce   :  { %2322 = vmatpush1.bf16.msra.mxu0 %v6787_v4  ;;  %2363 = vmatpush1.bf16.msra.mxu1 %v6788_v3  ;;  %v6796_v4 = vld [vmem:[#allocation6_spill] sm:$0xff]  ;;  %v6797_v3 = vld [vmem:[#allocation7_spill] sm:$0xff] }
 0x5cf   :  { %2323 = vmatprep.subr.bf16.mxu0 %v6789_v32  ;;  %2364 = vmatprep.subr.bf16.mxu1 %v6790_v15  ;;  %v6798_v32 = vld [vmem:[#allocation8_spill] sm:$0xff]  ;;  %v6799_v15 = vld [vmem:[#allocation9_spill] sm:$0xff] }
 0x5d2   :  { %2324 = vmatpush1.bf16.msra.mxu0 %v6791_v20  ;;  %2365 = vmatpush1.bf16.msra.mxu1 %v6792_v23  ;;  %v6800_v20 = vld [vmem:[#allocation10_spill] sm:$0xff]  ;;  %v6801_v23 = vld [vmem:[#allocation11_spill] sm:$0xff] }
 0x5d3   :  { %2447 = vmatprep.subr.bf16.mxu0 %v6793_v42  ;;  %2488 = vmatprep.subr.bf16.mxu1 %v6794_v10  ;;  %v6802_v42 = vld [vmem:[#allocation12_spill] sm:$0xff]  ;;  %v6803_v10 = vld [vmem:[#allocation13_spill] sm:$0xff] }
 0x5d5   :  { %2326 = vmatmul.mubr.bf16.vlgmr.msra.gmra.mrb[68].mxu0 %v5437_v62  ;;  %2367 = vmatmul.mubr.bf16.vlgmr.msra.gmra.mrb[68].mxu1 %v5437_v62  ;;  %v6805_v62 = vld [vmem:[#allocation15_spill] sm:$0xff] }
 0x5d6   :  { %2448 = vmatpush1.bf16.msra.mxu0 %v6795_v31  ;;  %2489 = vmatpush1.bf16.msra.mxu1 %v6796_v4  ;;  %v6806_v31 = vld [vmem:[#allocation16_spill] sm:$0xff]  ;;  %v6807_v4 = vld [vmem:[#allocation17_spill] sm:$0xff] }
 0x5d7   :  { %2449 = vmatprep.subr.bf16.mxu0 %v6797_v3  ;;  %2490 = vmatprep.subr.bf16.mxu1 %v6798_v32  ;;  %v6808_v3 = vld [vmem:[#allocation18_spill] sm:$0xff]  ;;  %v6809_v32 = vld [vmem:[#allocation19_spill] sm:$0xff] }
 0x5da   :  { %2450 = vmatpush1.bf16.msra.mxu0 %v6799_v15  ;;  %2491 = vmatpush1.bf16.msra.mxu1 %v6800_v20  ;;  %v6810_v15 = vld [vmem:[#allocation20_spill] sm:$0xff]  ;;  %v6811_v20 = vld [vmem:[#allocation21_spill] sm:$0xff] }
 0x5db   :  { %2451 = vmatprep.subr.bf16.mxu0 %v6801_v23  ;;  %2492 = vmatprep.subr.bf16.mxu1 %v6802_v42  ;;  %v6812_v23 = vld [vmem:[#allocation22_spill] sm:$0xff]  ;;  %v6813_v42 = vld [vmem:[#allocation23_spill] sm:$0xff] }
 0x5de   :  { %2452 = vmatpush1.bf16.msra.mxu0 %v6803_v10  ;;  %2493 = vmatpush1.bf16.msra.mxu1 %v6804_v60  ;;  %v6814_v10 = vld [vmem:[#allocation24_spill] sm:$0xff]  ;;  %v6815_v60 = vld [vmem:[#allocation25_spill] sm:$0xff] }
 0x5df   :  { %2453 = vmatprep.subr.bf16.mxu0 %v6805_v62  ;;  %2494 = vmatprep.subr.bf16.mxu1 %v6806_v31  ;;  %v6816_v62 = vld [vmem:[#allocation26_spill] sm:$0xff]  ;;  %v6817_v31 = vld [vmem:[#allocation27_spill] sm:$0xff] }
 0x5e2   :  { %2454 = vmatpush1.bf16.msra.mxu0 %v6807_v4  ;;  %2495 = vmatpush1.bf16.msra.mxu1 %v6808_v3  ;;  %v6818_v4 = vld [vmem:[#allocation28_spill] sm:$0xff]  ;;  %v6819_v3 = vld [vmem:[#allocation29_spill] sm:$0xff] }
 0x5e3   :  { %2455 = vmatprep.subr.bf16.mxu0 %v6809_v32  ;;  %2496 = vmatprep.subr.bf16.mxu1 %v6810_v15  ;;  %v6820_v32 = vld [vmem:[#allocation30_spill] sm:$0xff]  ;;  %v6821_v15 = vld [vmem:[#allocation31_spill] sm:$0xff] }
 0x5e6   :  { %2456 = vmatpush1.bf16.msra.mxu0 %v6811_v20  ;;  %2497 = vmatpush1.bf16.msra.mxu1 %v6812_v23  ;;  %v6822_v20 = vld [vmem:[#allocation32_spill] sm:$0xff]  ;;  %v6823_v23 = vld [vmem:[#allocation33_spill] sm:$0xff] }
 0x5e7   :  { %2457 = vmatprep.subr.bf16.mxu0 %v6813_v42  ;;  %2498 = vmatprep.subr.bf16.mxu1 %v6814_v10  ;;  %v6824_v42 = vld [vmem:[#allocation34_spill] sm:$0xff]  ;;  %v6825_v10 = vld [vmem:[#allocation35_spill] sm:$0xff] }
 0x5ea   :  { %2458 = vmatpush1.bf16.msra.mxu0 %v6815_v60  ;;  %2499 = vmatpush1.bf16.msra.mxu1 %v6816_v62  ;;  %v6826_v60 = vld [vmem:[#allocation36_spill] sm:$0xff]  ;;  %v6827_v62 = vld [vmem:[#allocation37_spill] sm:$0xff] }
 0x5eb   :  { %2459 = vmatprep.subr.bf16.mxu0 %v6817_v31  ;;  %2500 = vmatprep.subr.bf16.mxu1 %v6818_v4  ;;  %v6828_v31 = vld [vmem:[#allocation38_spill] sm:$0xff]  ;;  %v6829_v4 = vld [vmem:[#allocation39_spill] sm:$0xff] }
 0x5ee   :  { %2460 = vmatpush1.bf16.msra.mxu0 %v6819_v3  ;;  %2501 = vmatpush1.bf16.msra.mxu1 %v6820_v32  ;;  %v6830_v3 = vld [vmem:[#allocation40_spill] sm:$0xff]  ;;  %v6831_v32 = vld [vmem:[#allocation41_spill] sm:$0xff] }
 0x5ef   :  { %2461 = vmatprep.subr.bf16.mxu0 %v6821_v15  ;;  %2502 = vmatprep.subr.bf16.mxu1 %v6822_v20  ;;  %v6832_v15 = vld [vmem:[#allocation42_spill] sm:$0xff]  ;;  %v6833_v20 = vld [vmem:[#allocation43_spill] sm:$0xff] }
 0x5f2   :  { %2462 = vmatpush1.bf16.msra.mxu0 %v6823_v23  ;;  %2503 = vmatpush1.bf16.msra.mxu1 %v6824_v42  ;;  %v6834_v23 = vld [vmem:[#allocation44_spill] sm:$0xff]  ;;  %v6835_v42 = vld [vmem:[#allocation45_spill] sm:$0xff] }
 0x5f3   :  { %2463 = vmatprep.subr.bf16.mxu0 %v6825_v10  ;;  %2504 = vmatprep.subr.bf16.mxu1 %v6826_v60  ;;  %v6836_v10 = vld [vmem:[#allocation46_spill] sm:$0xff]  ;;  %v6837_v60 = vld [vmem:[#allocation47_spill] sm:$0xff] }
 0x5f6   :  { %2464 = vmatpush1.bf16.msra.mxu0 %v6827_v62  ;;  %2505 = vmatpush1.bf16.msra.mxu1 %v6828_v31  ;;  %v6838_v62 = vld [vmem:[#allocation48_spill] sm:$0xff]  ;;  %v6839_v31 = vld [vmem:[#allocation49_spill] sm:$0xff] }
 0x5f7   :  { %2465 = vmatprep.subr.bf16.mxu0 %v6829_v4  ;;  %2506 = vmatprep.subr.bf16.mxu1 %v6830_v3  ;;  %v6840_v4 = vld [vmem:[#allocation50_spill] sm:$0xff]  ;;  %v6841_v3 = vld [vmem:[#allocation51_spill] sm:$0xff] }
 0x5fa   :  { %2466 = vmatpush1.bf16.msra.mxu0 %v6831_v32  ;;  %2507 = vmatpush1.bf16.msra.mxu1 %v6832_v15  ;;  %v6842_v32 = vld [vmem:[#allocation52_spill] sm:$0xff]  ;;  %v6843_v15 = vld [vmem:[#allocation53_spill] sm:$0xff] }
 0x5fb   :  { %2467 = vmatprep.subr.bf16.mxu0 %v6833_v20  ;;  %2508 = vmatprep.subr.bf16.mxu1 %v6834_v23  ;;  %v6844_v20 = vld [vmem:[#allocation54_spill] sm:$0xff]  ;;  %v6845_v23 = vld [vmem:[#allocation55_spill] sm:$0xff] }
 0x5fe   :  { %2468 = vmatpush1.bf16.msra.mxu0 %v6835_v42  ;;  %2509 = vmatpush1.bf16.msra.mxu1 %v6836_v10  ;;  %v6846_v42 = vld [vmem:[#allocation56_spill] sm:$0xff]  ;;  %v6847_v10 = vld [vmem:[#allocation57_spill] sm:$0xff] }
 0x5ff   :  { %2469 = vmatprep.subr.bf16.mxu0 %v6837_v60  ;;  %2510 = vmatprep.subr.bf16.mxu1 %v6838_v62  ;;  %v6848_v60 = vld [vmem:[#allocation58_spill] sm:$0xff]  ;;  %v6849_v62 = vld [vmem:[#allocation59_spill] sm:$0xff] }
 0x602   :  { %2470 = vmatpush1.bf16.msra.mxu0 %v6839_v31  ;;  %2511 = vmatpush1.bf16.msra.mxu1 %v6840_v4  ;;  %v6850_v31 = vld [vmem:[#allocation60_spill] sm:$0xff]  ;;  %v6851_v4 = vld [vmem:[#allocation61_spill] sm:$0xff] }
 0x603   :  { %2471 = vmatprep.subr.bf16.mxu0 %v6841_v3  ;;  %2512 = vmatprep.subr.bf16.mxu1 %v6842_v32  ;;  %v6852_v3 = vld [vmem:[#allocation62_spill] sm:$0xff]  ;;  %v6853_v32 = vld [vmem:[#allocation63_spill] sm:$0xff] }
 0x606   :  { %2472 = vmatpush1.bf16.msra.mxu0 %v6843_v15  ;;  %2513 = vmatpush1.bf16.msra.mxu1 %v6844_v20  ;;  %v6854_v15 = vld [vmem:[#allocation64_spill] sm:$0xff]  ;;  %v6855_v20 = vld [vmem:[#allocation65_spill] sm:$0xff] }
 0x607   :  { %2473 = vmatprep.subr.bf16.mxu0 %v6845_v23  ;;  %2514 = vmatprep.subr.bf16.mxu1 %v6846_v42  ;;  %v6856_v23 = vld [vmem:[#allocation66_spill] sm:$0xff]  ;;  %v6857_v42 = vld [vmem:[#allocation67_spill] sm:$0xff] }
 0x60a   :  { %2474 = vmatpush1.bf16.msra.mxu0 %v6847_v10  ;;  %2515 = vmatpush1.bf16.msra.mxu1 %v6848_v60  ;;  %v6858_v10 = vld [vmem:[#allocation68_spill] sm:$0xff] }
 0x60b   :  { %2475 = vmatprep.subr.bf16.mxu0 %v6849_v62  ;;  %2516 = vmatprep.subr.bf16.mxu1 %v6850_v31 }
 0x60e   :  { %2476 = vmatpush1.bf16.msra.mxu0 %v6851_v4  ;;  %2517 = vmatpush1.bf16.msra.mxu1 %v6852_v3 }
 0x60f   :  { %2477 = vmatprep.subr.bf16.mxu0 %v6853_v32  ;;  %2518 = vmatprep.subr.bf16.mxu1 %v6854_v15 }
 0x612   :  { %2478 = vmatpush1.bf16.msra.mxu0 %v6855_v20  ;;  %2519 = vmatpush1.bf16.msra.mxu1 %v6856_v23 }
 0x613   :  { %2529 = vmatprep.subr.bf16.mxu0 %v6857_v42  ;;  %2570 = vmatprep.subr.bf16.mxu1 %v6858_v10 }
 0x668   :  { %v2245_v60 = vpop.f32.mrb[64].mxu0  ;;  %v2286_v62 = vpop.f32.mrb[64].mxu1 }
 0x669   :  { %v2375_v31 = vadd.f32 %v2245_v60, %v6859_v14  ;;  %v2377_v4 = vadd.f32 %v2286_v62, %v6860_v29  ;;  %v2247_v41 = vpop.f32.mrb[65].mxu0  ;;  %v2288_v3 = vpop.f32.mrb[65].mxu1  ;;  %v6863_v14 = vld [vmem:[#allocation172_spill] sm:$0xff]  ;;  %v6864_v29 = vld [vmem:[#allocation174_spill] sm:$0xff] }
 0x66a   :  { %v2376_v32 = vadd.f32 %v2247_v41, %v6861_v36  ;;  %v2378_v15 = vadd.f32 %v2288_v3, %v6862_v21  ;;  %v2249_v28 = vpop.f32.mrb[66].mxu0  ;;  %v2290_v20 = vpop.f32.mrb[66].mxu1  ;;  %v6865_v41 = vld [vmem:[#allocation173_spill] sm:$0xff] }
 0x66b   :  { %v2250_v45 = vpop.f32.mrb[67].mxu0  ;;  %v2291_v23 = vpop.f32.mrb[67].mxu1  ;;  %v3400_v61 = vmul.f32 -1.442695, %v2375_v31  ;;  %v3402_v42 = vmul.f32 -1.442695, %v2377_v4 }
 0x66c   :  { %v3403_v10 = vmul.f32 -1.442695, %v2378_v15  ;;  %v3401_v36 = vmul.f32 -1.442695, %v2376_v32  ;;  %v6866_v28 = vld [vmem:[#allocation176_spill] sm:$0xff] }
 0x66d   :  { %3591 = vpow2.f32 %v3400_v61 }
 0x66e   :  { %3593 = vpow2.f32 %v3402_v42 }
 0x66f   :  { %3595 = vpow2.f32 %v3403_v10 }
 0x6a8   :  { %v2327_v37 = vpop.f32.mrb[68].mxu0  ;;  %v2368_v47 = vpop.f32.mrb[68].mxu1 }
 0x6a9   :  { %v2379_v60 = vadd.f32 %v2327_v37, %v6863_v14  ;;  %v2381_v62 = vadd.f32 %v2368_v47, %v6864_v29  ;;  %v2329_v38 = vpop.f32.mrb[69].mxu0  ;;  %v2370_v52 = vpop.f32.mrb[69].mxu1 }
 0x6aa   :  { %v2380_v21 = vadd.f32 %v2329_v38, %v6865_v41  ;;  %v2382_v3 = vadd.f32 %v2370_v52, %v6866_v28  ;;  %v2331_v45 = vpop.f32.mrb[70].mxu0  ;;  %v2372_v23 = vpop.f32.mrb[70].mxu1 }
 0x6ab   :  { %v3404_v31 = vmul.f32 -1.442695, %v2379_v60  ;;  %v2332_v4 = vpop.f32.mrb[71].mxu0  ;;  %v2373_v61 = vpop.f32.mrb[71].mxu1  ;;  %v3406_v29 = vmul.f32 -1.442695, %v2381_v62 }
 0x6ac   :  { %v3405_v42 = vmul.f32 -1.442695, %v2380_v21  ;;  %v3592_v37 = vpop.eup %3591  ;;  %v3407_v60 = vmul.f32 -1.442695, %v2382_v3 }
 0x6ad   :  { %3597 = vpow2.f32 %v3404_v31  ;;  %v3594_v15 = vpop.eup %3593  ;;  %v2407_v47 = vadd.f32 1.0, %v3592_v37 }
 0x6ae   :  { %3599 = vpow2.f32 %v3401_v36  ;;  %v2409_v20 = vadd.f32 1.0, %v3594_v15  ;;  %v3596_v14 = vpop.eup %3595 }
 0x6af   :  { %3601 = vpow2.f32 %v3405_v42  ;;  %v2410_v28 = vadd.f32 1.0, %v3596_v14 }
 0x6b0   :  { %3603 = vrcp.f32 %v2407_v47 }
 0x6b1   :  { %3605 = vrcp.f32 %v2409_v20 }
 0x6b7   :  { %v3598_v32 = vpop.eup %3597 }
 0x6b8   :  { %v3600_v38 = vpop.eup %3599  ;;  %v2411_v52 = vadd.f32 1.0, %v3598_v32 }
 0x6b9   :  { %v3602_v41 = vpop.eup %3601  ;;  %v2408_v21 = vadd.f32 1.0, %v3600_v38 }
 0x6ba   :  { %3607 = vrcp.f32 %v2411_v52  ;;  %v2412_v10 = vadd.f32 1.0, %v3602_v41  ;;  %v3604_v36 = vpop.eup %3603 }
 0x6bb   :  { %3609 = vpow2.f32 %v3406_v29  ;;  %v3606_v45 = vpop.eup %3605 }
 0x6bc   :  { %3611 = vrcp.f32 %v2412_v10  ;;  %v2435_v47 = vmul.f32 %v3606_v45, %v5430_v0 }
 0x6bd   :  { %3613 = vpow2.f32 %v3407_v60 }
 0x6be   :  { %3615 = vrcp.f32 %v2410_v28 }
 0x6bf   :  { %3617 = vrcp.f32 %v2408_v21 }
 0x6c4   :  { %v3608_v23 = vpop.eup %3607 }
 0x6c5   :  { %v3610_v31 = vpop.eup %3609  ;;  %v2431_v62 = vmul.f32 2.0, %v3608_v23 }
 0x6c6   :  { %v3612_v4 = vpop.eup %3611  ;;  %v2413_v3 = vadd.f32 1.0, %v3610_v31 }
 0x6c7   :  { %v3614_v61 = vpop.eup %3613  ;;  %v3408_v42 = vadd.f32 -1.0, %v2431_v62  ;;  %v2432_v37 = vmul.f32 2.0, %v3612_v4  ;;  %v6868_v62 = vld [vmem:[#allocation109_spill] sm:$0xff]  ;;  %v6869_v4 = vld [vmem:[#allocation110_spill] sm:$0xff] }
 0x6c8   :  { %v3616_v15 = vpop.eup %3615  ;;  %v2414_v29 = vadd.f32 1.0, %v3614_v61  ;;  %3619 = vrcp.f32 %v2413_v3  ;;  %v6870_v61 = vld [vmem:[#allocation111_spill] sm:$0xff] }
 0x6c9   :  { %v2437_v20 = vmul.f32 %v3604_v36, %v3408_v42  ;;  %v3409_v14 = vadd.f32 -1.0, %v2432_v37  ;;  %v3618_v32 = vpop.eup %3617  ;;  %v2436_v52 = vmul.f32 %v3616_v15, %v5434_v34  ;;  %v6867_v34 = vld [vmem:[#allocation108_spill] sm:$0xff]  ;;  %v6872_v37 = vld [vmem:[#allocation113_spill] sm:$0xff]  ;;  %v6873_v15 = vld [vmem:[#allocation114_spill] sm:$0xff] }
 0x6ca   :  { %v6871_v42 = vld [vmem:[#allocation112_spill] sm:$0xff]  ;;  %v6874_v3 = vld [vmem:[#allocation115_spill] sm:$0xff] }
 0x6cb   :  { %v5580_v38 = vadd.f32 %v2437_v20, %v2435_v47  ;;  %v2438_v41 = vmul.f32 %v3618_v32, %v3409_v14  ;;  %v6875_v47 = vld [vmem:[#allocation116_spill] sm:$0xff]  ;;  %v6876_v20 = vld [vmem:[#allocation117_spill] sm:$0xff]  ;;  %v6877_v14 = vld [vmem:[#allocation118_spill] sm:$0xff] }
 0x6cc   :  { %v6878_v32 = vld [vmem:[#allocation119_spill] sm:$0xff] }
 0x6cd   :  { %3621 = vtanh.f32 %v5580_v38  ;;  %v5584_v60 = vadd.f32 %v2438_v41, %v2436_v52  ;;  %v6880_v52 = vld [vmem:[#allocation121_spill] sm:$0xff]  ;;  %v6881_v41 = vld [vmem:[#allocation122_spill] sm:$0xff] }
 0x6ce   :  { %3623 = vrcp.f32 %v2414_v29  ;;  %v6879_v29 = vld [vmem:[#allocation120_spill] sm:$0xff] }
 0x6cf   :  { %3625 = vtanh.f32 %v5584_v60 }
 0x6d2   :  { %v3620_v28 = vpop.eup %3619 }
 0x6d7   :  { %v3622_v10 = vpop.eup %3621 }
 0x6d8   :  { %v3624_v0 = vpop.eup %3623  ;;  %v2443_v36 = vmul.f32 %v3622_v10, %v3620_v28  ;;  %v6882_v28 = vld [vmem:[#allocation123_spill] sm:$0xff]  ;;  %v6883_v10 = vld [vmem:[#allocation124_spill] sm:$0xff] }
 0x6d9   :  { %v3626_v21 = vpop.eup %3625 }
 0x6da   :  { %v2444_v45 = vmul.f32 %v3626_v21, %v3624_v0  ;;  %v5587_v31 = vpack.c.bf16 %v2443_v36, %v2443_v36  ;;  %v6884_v0 = vld [vmem:[#allocation125_spill] sm:$0xff]  ;;  %v6885_v21 = vld [vmem:[#allocation126_spill] sm:$0xff]  ;;  %v6886_v36 = vld [vmem:[#allocation127_spill] sm:$0xff] }
 0x6dc   :  { %v2446_v23 = vpack.c.bf16 %v2444_v45, %v2444_v45  ;;  %v6887_v45 = vld [vmem:[#allocation128_spill] sm:$0xff] }
 0x6de   :  { %2479 = vmatprep.mubr.bf16.mxu0 %v2446_v23  ;;  %2520 = vmatprep.mubr.bf16.mxu1 %v2446_v23 }
 0x6df   :  { %2480 = vmatmul.mubr.bf16.vlgmr.msra.gmra.mrb[72].mxu0 %v5587_v31  ;;  %2521 = vmatmul.mubr.bf16.vlgmr.msra.gmra.mrb[72].mxu1 %v5587_v31 }
 0x6e0   :  { %2530 = vmatpush1.bf16.msra.mxu0 %v6473_v39  ;;  %2571 = vmatpush1.bf16.msra.mxu1 %v6474_v12 }
 0x6e1   :  { %2561 = vmatprep.mubr.bf16.mxu0 %v2446_v23  ;;  %2602 = vmatprep.mubr.bf16.mxu1 %v2446_v23  ;;  %v6888_v23 = vld [vmem:[#allocation129_spill] sm:$0xff] }
 0x6e2   :  { %2531 = vmatprep.subr.bf16.mxu0 %v6475_v51  ;;  %2572 = vmatprep.subr.bf16.mxu1 %v6476_v6 }
 0x6e4   :  { %2532 = vmatpush1.bf16.msra.mxu0 %v6477_v22  ;;  %2573 = vmatpush1.bf16.msra.mxu1 %v6478_v26 }
 0x6e5   :  { %2533 = vmatprep.subr.bf16.mxu0 %v6479_v35  ;;  %2574 = vmatprep.subr.bf16.mxu1 %v6480_v30 }
 0x6e8   :  { %2534 = vmatpush1.bf16.msra.mxu0 %v6481_v54  ;;  %2575 = vmatpush1.bf16.msra.mxu1 %v6482_v5 }
 0x6e9   :  { %2535 = vmatprep.subr.bf16.mxu0 %v6483_v43  ;;  %2576 = vmatprep.subr.bf16.mxu1 %v6484_v53 }
 0x6ec   :  { %2536 = vmatpush1.bf16.msra.mxu0 %v6485_v46  ;;  %2577 = vmatpush1.bf16.msra.mxu1 %v6486_v25 }
 0x6ed   :  { %2537 = vmatprep.subr.bf16.mxu0 %v6487_v44  ;;  %2578 = vmatprep.subr.bf16.mxu1 %v6488_v33 }
 0x6f0   :  { %2538 = vmatpush1.bf16.msra.mxu0 %v6489_v7  ;;  %2579 = vmatpush1.bf16.msra.mxu1 %v6576_v59 }
 0x6f1   :  { %2539 = vmatprep.subr.bf16.mxu0 %v6577_v13  ;;  %2580 = vmatprep.subr.bf16.mxu1 %v6578_v8 }
 0x6f4   :  { %2540 = vmatpush1.bf16.msra.mxu0 %v6579_v50  ;;  %2581 = vmatpush1.bf16.msra.mxu1 %v6580_v11 }
 0x6f5   :  { %2541 = vmatprep.subr.bf16.mxu0 %v6581_v49  ;;  %2582 = vmatprep.subr.bf16.mxu1 %v6582_v17 }
 0x6f8   :  { %2542 = vmatpush1.bf16.msra.mxu0 %v6583_v9  ;;  %2583 = vmatpush1.bf16.msra.mxu1 %v6584_v48 }
 0x6f9   :  { %2543 = vmatprep.subr.bf16.mxu0 %v6585_v18  ;;  %2584 = vmatprep.subr.bf16.mxu1 %v6586_v1 }
 0x6fc   :  { %2544 = vmatpush1.bf16.msra.mxu0 %v6673_v24  ;;  %2585 = vmatpush1.bf16.msra.mxu1 %v6674_v2 }
 0x6fd   :  { %2545 = vmatprep.subr.bf16.mxu0 %v6589_v40  ;;  %2586 = vmatprep.subr.bf16.mxu1 %v6590_v63 }
 0x700   :  { %2546 = vmatpush1.bf16.msra.mxu0 %v6591_v56  ;;  %2587 = vmatpush1.bf16.msra.mxu1 %v6592_v19 }
 0x701   :  { %2547 = vmatprep.subr.bf16.mxu0 %v6593_v27  ;;  %2588 = vmatprep.subr.bf16.mxu1 %v6594_v57 }
 0x704   :  { %2548 = vmatpush1.bf16.msra.mxu0 %v6595_v58  ;;  %2589 = vmatpush1.bf16.msra.mxu1 %v6596_v55 }
 0x705   :  { %2549 = vmatprep.subr.bf16.mxu0 %v6597_v16  ;;  %2590 = vmatprep.subr.bf16.mxu1 %v6867_v34 }
 0x708   :  { %2550 = vmatpush1.bf16.msra.mxu0 %v6868_v62  ;;  %2591 = vmatpush1.bf16.msra.mxu1 %v6869_v4 }
 0x709   :  { %2551 = vmatprep.subr.bf16.mxu0 %v6870_v61  ;;  %2592 = vmatprep.subr.bf16.mxu1 %v6871_v42 }
 0x70c   :  { %2552 = vmatpush1.bf16.msra.mxu0 %v6872_v37  ;;  %2593 = vmatpush1.bf16.msra.mxu1 %v6873_v15 }
 0x70d   :  { %2553 = vmatprep.subr.bf16.mxu0 %v6874_v3  ;;  %2594 = vmatprep.subr.bf16.mxu1 %v6875_v47  ;;  %v6958_v47 = vld [vmem:[#allocation149_spill] sm:$0xff]  ;;  %v6959_v3 = vld [vmem:[#allocation151_spill] sm:$0xff] }
 0x710   :  { %2554 = vmatpush1.bf16.msra.mxu0 %v6876_v20  ;;  %2595 = vmatpush1.bf16.msra.mxu1 %v6877_v14  ;;  %v6957_v14 = vld [vmem:[#allocation150_spill] sm:$0xff] }
 0x711   :  { %2555 = vmatprep.subr.bf16.mxu0 %v6878_v32  ;;  %2596 = vmatprep.subr.bf16.mxu1 %v6879_v29  ;;  %v6889_v32 = vld [vmem:[#allocation130_spill] sm:$0xff]  ;;  %v6890_v29 = vld [vmem:[#allocation3_spill] sm:$0xff] }
 0x714   :  { %2556 = vmatpush1.bf16.msra.mxu0 %v6880_v52  ;;  %2597 = vmatpush1.bf16.msra.mxu1 %v6881_v41  ;;  %v6891_v52 = vld [vmem:[#allocation4_spill] sm:$0xff]  ;;  %v6956_v41 = vld [vmem:[#allocation147_spill] sm:$0xff] }
 0x715   :  { %2557 = vmatprep.subr.bf16.mxu0 %v6882_v28  ;;  %2598 = vmatprep.subr.bf16.mxu1 %v6883_v10  ;;  %v6892_v10 = vld [vmem:[#allocation5_spill] sm:$0xff]  ;;  %v6901_v28 = vld [vmem:[#allocation14_spill] sm:$0xff] }
 0x718   :  { %2558 = vmatpush1.bf16.msra.mxu0 %v6884_v0  ;;  %2599 = vmatpush1.bf16.msra.mxu1 %v6885_v21  ;;  %v6893_v0 = vld [vmem:[#allocation6_spill] sm:$0xff]  ;;  %v6894_v21 = vld [vmem:[#allocation7_spill] sm:$0xff] }
 0x719   :  { %2559 = vmatprep.subr.bf16.mxu0 %v6886_v36  ;;  %2600 = vmatprep.subr.bf16.mxu1 %v6887_v45  ;;  %v6895_v36 = vld [vmem:[#allocation8_spill] sm:$0xff]  ;;  %v6896_v45 = vld [vmem:[#allocation9_spill] sm:$0xff] }
 0x71c   :  { %2560 = vmatpush1.bf16.msra.mxu0 %v6888_v23  ;;  %2601 = vmatpush1.bf16.msra.mxu1 %v6889_v32  ;;  %v6897_v23 = vld [vmem:[#allocation10_spill] sm:$0xff]  ;;  %v6898_v32 = vld [vmem:[#allocation11_spill] sm:$0xff] }
 0x71d   :  { %2683 = vmatprep.subr.bf16.mxu0 %v6890_v29  ;;  %2724 = vmatprep.subr.bf16.mxu1 %v6891_v52  ;;  %v6899_v29 = vld [vmem:[#allocation12_spill] sm:$0xff]  ;;  %v6900_v52 = vld [vmem:[#allocation13_spill] sm:$0xff] }
 0x71f   :  { %2562 = vmatmul.mubr.bf16.vlgmr.msra.gmra.mrb[76].mxu0 %v5587_v31  ;;  %2603 = vmatmul.mubr.bf16.vlgmr.msra.gmra.mrb[76].mxu1 %v5587_v31  ;;  %v6902_v31 = vld [vmem:[#allocation15_spill] sm:$0xff] }
 0x720   :  { %2684 = vmatpush1.bf16.msra.mxu0 %v6892_v10  ;;  %2725 = vmatpush1.bf16.msra.mxu1 %v6893_v0  ;;  %v6903_v10 = vld [vmem:[#allocation16_spill] sm:$0xff]  ;;  %v6904_v0 = vld [vmem:[#allocation17_spill] sm:$0xff] }
 0x721   :  { %2685 = vmatprep.subr.bf16.mxu0 %v6894_v21  ;;  %2726 = vmatprep.subr.bf16.mxu1 %v6895_v36  ;;  %v6905_v21 = vld [vmem:[#allocation18_spill] sm:$0xff]  ;;  %v6906_v36 = vld [vmem:[#allocation19_spill] sm:$0xff] }
 0x724   :  { %2686 = vmatpush1.bf16.msra.mxu0 %v6896_v45  ;;  %2727 = vmatpush1.bf16.msra.mxu1 %v6897_v23  ;;  %v6907_v45 = vld [vmem:[#allocation20_spill] sm:$0xff]  ;;  %v6908_v23 = vld [vmem:[#allocation21_spill] sm:$0xff] }
 0x725   :  { %2687 = vmatprep.subr.bf16.mxu0 %v6898_v32  ;;  %2728 = vmatprep.subr.bf16.mxu1 %v6899_v29  ;;  %v6909_v32 = vld [vmem:[#allocation22_spill] sm:$0xff]  ;;  %v6910_v29 = vld [vmem:[#allocation23_spill] sm:$0xff] }
 0x728   :  { %2688 = vmatpush1.bf16.msra.mxu0 %v6900_v52  ;;  %2729 = vmatpush1.bf16.msra.mxu1 %v6901_v28  ;;  %v6911_v52 = vld [vmem:[#allocation24_spill] sm:$0xff]  ;;  %v6912_v28 = vld [vmem:[#allocation25_spill] sm:$0xff] }
 0x729   :  { %2689 = vmatprep.subr.bf16.mxu0 %v6902_v31  ;;  %2730 = vmatprep.subr.bf16.mxu1 %v6903_v10  ;;  %v6913_v31 = vld [vmem:[#allocation26_spill] sm:$0xff]  ;;  %v6914_v10 = vld [vmem:[#allocation27_spill] sm:$0xff] }
 0x72c   :  { %2690 = vmatpush1.bf16.msra.mxu0 %v6904_v0  ;;  %2731 = vmatpush1.bf16.msra.mxu1 %v6905_v21  ;;  %v6915_v0 = vld [vmem:[#allocation28_spill] sm:$0xff]  ;;  %v6916_v21 = vld [vmem:[#allocation29_spill] sm:$0xff] }
 0x72d   :  { %2691 = vmatprep.subr.bf16.mxu0 %v6906_v36  ;;  %2732 = vmatprep.subr.bf16.mxu1 %v6907_v45  ;;  %v6917_v36 = vld [vmem:[#allocation30_spill] sm:$0xff]  ;;  %v6918_v45 = vld [vmem:[#allocation31_spill] sm:$0xff] }
 0x730   :  { %2692 = vmatpush1.bf16.msra.mxu0 %v6908_v23  ;;  %2733 = vmatpush1.bf16.msra.mxu1 %v6909_v32  ;;  %v6919_v23 = vld [vmem:[#allocation32_spill] sm:$0xff]  ;;  %v6920_v32 = vld [vmem:[#allocation33_spill] sm:$0xff] }
 0x731   :  { %2693 = vmatprep.subr.bf16.mxu0 %v6910_v29  ;;  %2734 = vmatprep.subr.bf16.mxu1 %v6911_v52  ;;  %v6921_v29 = vld [vmem:[#allocation34_spill] sm:$0xff]  ;;  %v6922_v52 = vld [vmem:[#allocation35_spill] sm:$0xff] }
 0x734   :  { %2694 = vmatpush1.bf16.msra.mxu0 %v6912_v28  ;;  %2735 = vmatpush1.bf16.msra.mxu1 %v6913_v31  ;;  %v6923_v28 = vld [vmem:[#allocation36_spill] sm:$0xff]  ;;  %v6924_v31 = vld [vmem:[#allocation37_spill] sm:$0xff] }
 0x735   :  { %2695 = vmatprep.subr.bf16.mxu0 %v6914_v10  ;;  %2736 = vmatprep.subr.bf16.mxu1 %v6915_v0  ;;  %v6925_v10 = vld [vmem:[#allocation38_spill] sm:$0xff]  ;;  %v6926_v0 = vld [vmem:[#allocation39_spill] sm:$0xff] }
 0x738   :  { %2696 = vmatpush1.bf16.msra.mxu0 %v6916_v21  ;;  %2737 = vmatpush1.bf16.msra.mxu1 %v6917_v36  ;;  %v6927_v21 = vld [vmem:[#allocation40_spill] sm:$0xff]  ;;  %v6928_v36 = vld [vmem:[#allocation41_spill] sm:$0xff] }
 0x739   :  { %2697 = vmatprep.subr.bf16.mxu0 %v6918_v45  ;;  %2738 = vmatprep.subr.bf16.mxu1 %v6919_v23  ;;  %v6929_v45 = vld [vmem:[#allocation42_spill] sm:$0xff]  ;;  %v6930_v23 = vld [vmem:[#allocation43_spill] sm:$0xff] }
 0x73c   :  { %2698 = vmatpush1.bf16.msra.mxu0 %v6920_v32  ;;  %2739 = vmatpush1.bf16.msra.mxu1 %v6921_v29  ;;  %v6931_v32 = vld [vmem:[#allocation44_spill] sm:$0xff]  ;;  %v6932_v29 = vld [vmem:[#allocation45_spill] sm:$0xff] }
 0x73d   :  { %2699 = vmatprep.subr.bf16.mxu0 %v6922_v52  ;;  %2740 = vmatprep.subr.bf16.mxu1 %v6923_v28  ;;  %v6933_v52 = vld [vmem:[#allocation46_spill] sm:$0xff]  ;;  %v6934_v28 = vld [vmem:[#allocation47_spill] sm:$0xff] }
 0x740   :  { %2700 = vmatpush1.bf16.msra.mxu0 %v6924_v31  ;;  %2741 = vmatpush1.bf16.msra.mxu1 %v6925_v10  ;;  %v6935_v31 = vld [vmem:[#allocation48_spill] sm:$0xff]  ;;  %v6936_v10 = vld [vmem:[#allocation49_spill] sm:$0xff] }
 0x741   :  { %2701 = vmatprep.subr.bf16.mxu0 %v6926_v0  ;;  %2742 = vmatprep.subr.bf16.mxu1 %v6927_v21  ;;  %v6937_v0 = vld [vmem:[#allocation50_spill] sm:$0xff]  ;;  %v6938_v21 = vld [vmem:[#allocation51_spill] sm:$0xff] }
 0x744   :  { %2702 = vmatpush1.bf16.msra.mxu0 %v6928_v36  ;;  %2743 = vmatpush1.bf16.msra.mxu1 %v6929_v45  ;;  %v6939_v36 = vld [vmem:[#allocation52_spill] sm:$0xff]  ;;  %v6940_v45 = vld [vmem:[#allocation53_spill] sm:$0xff] }
 0x745   :  { %2703 = vmatprep.subr.bf16.mxu0 %v6930_v23  ;;  %2744 = vmatprep.subr.bf16.mxu1 %v6931_v32  ;;  %v6941_v23 = vld [vmem:[#allocation54_spill] sm:$0xff]  ;;  %v6942_v32 = vld [vmem:[#allocation55_spill] sm:$0xff] }
 0x748   :  { %2704 = vmatpush1.bf16.msra.mxu0 %v6932_v29  ;;  %2745 = vmatpush1.bf16.msra.mxu1 %v6933_v52  ;;  %v6943_v29 = vld [vmem:[#allocation56_spill] sm:$0xff]  ;;  %v6944_v52 = vld [vmem:[#allocation57_spill] sm:$0xff] }
 0x749   :  { %2705 = vmatprep.subr.bf16.mxu0 %v6934_v28  ;;  %2746 = vmatprep.subr.bf16.mxu1 %v6935_v31  ;;  %v6945_v28 = vld [vmem:[#allocation58_spill] sm:$0xff]  ;;  %v6946_v31 = vld [vmem:[#allocation59_spill] sm:$0xff] }
 0x74c   :  { %2706 = vmatpush1.bf16.msra.mxu0 %v6936_v10  ;;  %2747 = vmatpush1.bf16.msra.mxu1 %v6937_v0  ;;  %v6947_v10 = vld [vmem:[#allocation60_spill] sm:$0xff]  ;;  %v6948_v0 = vld [vmem:[#allocation61_spill] sm:$0xff] }
 0x74d   :  { %2707 = vmatprep.subr.bf16.mxu0 %v6938_v21  ;;  %2748 = vmatprep.subr.bf16.mxu1 %v6939_v36  ;;  %v6949_v21 = vld [vmem:[#allocation62_spill] sm:$0xff]  ;;  %v6950_v36 = vld [vmem:[#allocation63_spill] sm:$0xff] }
 0x750   :  { %2708 = vmatpush1.bf16.msra.mxu0 %v6940_v45  ;;  %2749 = vmatpush1.bf16.msra.mxu1 %v6941_v23  ;;  %v6951_v45 = vld [vmem:[#allocation64_spill] sm:$0xff]  ;;  %v6952_v23 = vld [vmem:[#allocation65_spill] sm:$0xff] }
 0x751   :  { %2709 = vmatprep.subr.bf16.mxu0 %v6942_v32  ;;  %2750 = vmatprep.subr.bf16.mxu1 %v6943_v29  ;;  %v6953_v32 = vld [vmem:[#allocation66_spill] sm:$0xff]  ;;  %v6954_v29 = vld [vmem:[#allocation67_spill] sm:$0xff] }
 0x754   :  { %2710 = vmatpush1.bf16.msra.mxu0 %v6944_v52  ;;  %2751 = vmatpush1.bf16.msra.mxu1 %v6945_v28  ;;  %v6955_v52 = vld [vmem:[#allocation68_spill] sm:$0xff] }
 0x755   :  { %2711 = vmatprep.subr.bf16.mxu0 %v6946_v31  ;;  %2752 = vmatprep.subr.bf16.mxu1 %v6947_v10 }
 0x758   :  { %2712 = vmatpush1.bf16.msra.mxu0 %v6948_v0  ;;  %2753 = vmatpush1.bf16.msra.mxu1 %v6949_v21 }
 0x759   :  { %2713 = vmatprep.subr.bf16.mxu0 %v6950_v36  ;;  %2754 = vmatprep.subr.bf16.mxu1 %v6951_v45 }
 0x75c   :  { %2714 = vmatpush1.bf16.msra.mxu0 %v6952_v23  ;;  %2755 = vmatpush1.bf16.msra.mxu1 %v6953_v32 }
 0x75d   :  { %2765 = vmatprep.subr.bf16.mxu0 %v6954_v29  ;;  %2806 = vmatprep.subr.bf16.mxu1 %v6955_v52 }
 0x7b2   :  { %v2481_v28 = vpop.f32.mrb[72].mxu0  ;;  %v2522_v31 = vpop.f32.mrb[72].mxu1 }
 0x7b3   :  { %v2611_v10 = vadd.f32 %v2481_v28, %v6956_v41  ;;  %v2613_v0 = vadd.f32 %v2522_v31, %v6957_v14  ;;  %v2483_v20 = vpop.f32.mrb[73].mxu0  ;;  %v2524_v21 = vpop.f32.mrb[73].mxu1  ;;  %v6960_v41 = vld [vmem:[#allocation175_spill] sm:$0xff]  ;;  %v6961_v14 = vld [vmem:[#allocation178_spill] sm:$0xff] }
 0x7b4   :  { %v2612_v36 = vadd.f32 %v2483_v20, %v6958_v47  ;;  %v2614_v45 = vadd.f32 %v2524_v21, %v6959_v3  ;;  %v2485_v15 = vpop.f32.mrb[74].mxu0  ;;  %v2526_v23 = vpop.f32.mrb[74].mxu1  ;;  %v6962_v20 = vld [vmem:[#allocation177_spill] sm:$0xff] }
 0x7b5   :  { %v2486_v37 = vpop.f32.mrb[75].mxu0  ;;  %v2527_v32 = vpop.f32.mrb[75].mxu1  ;;  %v3410_v42 = vmul.f32 -1.442695, %v2611_v10  ;;  %v3412_v29 = vmul.f32 -1.442695, %v2613_v0 }
 0x7b6   :  { %v3413_v52 = vmul.f32 -1.442695, %v2614_v45  ;;  %v3411_v47 = vmul.f32 -1.442695, %v2612_v36  ;;  %v6963_v15 = vld [vmem:[#allocation179_spill] sm:$0xff] }
 0x7b7   :  { %3627 = vpow2.f32 %v3410_v42 }
 0x7b8   :  { %3629 = vpow2.f32 %v3412_v29 }
 0x7b9   :  { %3631 = vpow2.f32 %v3413_v52 }
 0x7f2   :  { %v2563_v61 = vpop.f32.mrb[76].mxu0  ;;  %v2604_v4 = vpop.f32.mrb[76].mxu1 }
 0x7f3   :  { %v2615_v28 = vadd.f32 %v2563_v61, %v6960_v41  ;;  %v2617_v31 = vadd.f32 %v2604_v4, %v6961_v14  ;;  %v2565_v62 = vpop.f32.mrb[77].mxu0  ;;  %v2606_v34 = vpop.f32.mrb[77].mxu1 }
 0x7f4   :  { %v2616_v3 = vadd.f32 %v2565_v62, %v6962_v20  ;;  %v2618_v21 = vadd.f32 %v2606_v34, %v6963_v15  ;;  %v2567_v37 = vpop.f32.mrb[78].mxu0  ;;  %v2608_v32 = vpop.f32.mrb[78].mxu1 }
 0x7f5   :  { %v3414_v10 = vmul.f32 -1.442695, %v2615_v28  ;;  %v2568_v0 = vpop.f32.mrb[79].mxu0  ;;  %v2609_v42 = vpop.f32.mrb[79].mxu1  ;;  %v3416_v14 = vmul.f32 -1.442695, %v2617_v31 }
 0x7f6   :  { %v3415_v29 = vmul.f32 -1.442695, %v2616_v3  ;;  %v3628_v61 = vpop.eup %3627  ;;  %v3417_v28 = vmul.f32 -1.442695, %v2618_v21 }
 0x7f7   :  { %3633 = vpow2.f32 %v3414_v10  ;;  %v3630_v45 = vpop.eup %3629  ;;  %v2643_v4 = vadd.f32 1.0, %v3628_v61 }
 0x7f8   :  { %3635 = vpow2.f32 %v3411_v47  ;;  %v2645_v23 = vadd.f32 1.0, %v3630_v45  ;;  %v3632_v41 = vpop.eup %3631 }
 0x7f9   :  { %3637 = vpow2.f32 %v3415_v29  ;;  %v2646_v15 = vadd.f32 1.0, %v3632_v41 }
 0x7fa   :  { %3639 = vrcp.f32 %v2643_v4 }
 0x7fb   :  { %3641 = vrcp.f32 %v2645_v23 }
 0x801   :  { %v3634_v36 = vpop.eup %3633 }
 0x802   :  { %v3636_v62 = vpop.eup %3635  ;;  %v2647_v34 = vadd.f32 1.0, %v3634_v36 }
 0x803   :  { %v3638_v20 = vpop.eup %3637  ;;  %v2644_v3 = vadd.f32 1.0, %v3636_v62 }
 0x804   :  { %3643 = vrcp.f32 %v2647_v34  ;;  %v2648_v52 = vadd.f32 1.0, %v3638_v20  ;;  %v3640_v47 = vpop.eup %3639 }
 0x805   :  { %3645 = vpow2.f32 %v3416_v14  ;;  %v3642_v37 = vpop.eup %3641 }
 0x806   :  { %3647 = vrcp.f32 %v2648_v52  ;;  %v2671_v4 = vmul.f32 %v3642_v37, %v5580_v38 }
 0x807   :  { %3649 = vpow2.f32 %v3417_v28 }
 0x808   :  { %3651 = vrcp.f32 %v2646_v15 }
 0x809   :  { %3653 = vrcp.f32 %v2644_v3 }
 0x80e   :  { %v3644_v32 = vpop.eup %3643 }
 0x80f   :  { %v3646_v10 = vpop.eup %3645  ;;  %v2667_v31 = vmul.f32 2.0, %v3644_v32 }
 0x810   :  { %v3648_v0 = vpop.eup %3647  ;;  %v2649_v21 = vadd.f32 1.0, %v3646_v10 }
 0x811   :  { %v3650_v42 = vpop.eup %3649  ;;  %v3418_v29 = vadd.f32 -1.0, %v2667_v31  ;;  %v2668_v61 = vmul.f32 2.0, %v3648_v0  ;;  %v6965_v31 = vld [vmem:[#allocation109_spill] sm:$0xff]  ;;  %v6966_v0 = vld [vmem:[#allocation110_spill] sm:$0xff] }
 0x812   :  { %v3652_v45 = vpop.eup %3651  ;;  %v2650_v14 = vadd.f32 1.0, %v3650_v42  ;;  %3655 = vrcp.f32 %v2649_v21  ;;  %v6967_v42 = vld [vmem:[#allocation111_spill] sm:$0xff] }
 0x813   :  { %v2673_v23 = vmul.f32 %v3640_v47, %v3418_v29  ;;  %v3419_v41 = vadd.f32 -1.0, %v2668_v61  ;;  %v3654_v36 = vpop.eup %3653  ;;  %v2672_v34 = vmul.f32 %v3652_v45, %v5584_v60  ;;  %v6964_v60 = vld [vmem:[#allocation108_spill] sm:$0xff]  ;;  %v6969_v61 = vld [vmem:[#allocation113_spill] sm:$0xff]  ;;  %v6970_v45 = vld [vmem:[#allocation114_spill] sm:$0xff] }
 0x814   :  { %v6968_v29 = vld [vmem:[#allocation112_spill] sm:$0xff]  ;;  %v6971_v21 = vld [vmem:[#allocation115_spill] sm:$0xff] }
 0x815   :  { %v5730_v62 = vadd.f32 %v2673_v23, %v2671_v4  ;;  %v2674_v20 = vmul.f32 %v3654_v36, %v3419_v41  ;;  %v6972_v4 = vld [vmem:[#allocation116_spill] sm:$0xff]  ;;  %v6973_v23 = vld [vmem:[#allocation117_spill] sm:$0xff]  ;;  %v6974_v41 = vld [vmem:[#allocation118_spill] sm:$0xff] }
 0x816   :  { %v6975_v36 = vld [vmem:[#allocation119_spill] sm:$0xff] }
 0x817   :  { %3657 = vtanh.f32 %v5730_v62  ;;  %v5734_v28 = vadd.f32 %v2674_v20, %v2672_v34  ;;  %v6977_v34 = vld [vmem:[#allocation121_spill] sm:$0xff]  ;;  %v6978_v20 = vld [vmem:[#allocation122_spill] sm:$0xff] }
 0x818   :  { %3659 = vrcp.f32 %v2650_v14  ;;  %v6976_v14 = vld [vmem:[#allocation120_spill] sm:$0xff] }
 0x819   :  { %3661 = vtanh.f32 %v5734_v28 }
 0x81c   :  { %v3656_v15 = vpop.eup %3655 }
 0x821   :  { %v3658_v52 = vpop.eup %3657 }
 0x822   :  { %v3660_v38 = vpop.eup %3659  ;;  %v2679_v47 = vmul.f32 %v3658_v52, %v3656_v15  ;;  %v6979_v15 = vld [vmem:[#allocation123_spill] sm:$0xff]  ;;  %v6980_v52 = vld [vmem:[#allocation124_spill] sm:$0xff] }
 0x823   :  { %v3662_v3 = vpop.eup %3661 }
 0x824   :  { %v2680_v37 = vmul.f32 %v3662_v3, %v3660_v38  ;;  %v5737_v10 = vpack.c.bf16 %v2679_v47, %v2679_v47  ;;  %v6981_v38 = vld [vmem:[#allocation125_spill] sm:$0xff]  ;;  %v6982_v3 = vld [vmem:[#allocation126_spill] sm:$0xff]  ;;  %v6983_v47 = vld [vmem:[#allocation127_spill] sm:$0xff] }
 0x826   :  { %v2682_v32 = vpack.c.bf16 %v2680_v37, %v2680_v37  ;;  %v6984_v37 = vld [vmem:[#allocation128_spill] sm:$0xff] }
 0x828   :  { %2715 = vmatprep.mubr.bf16.mxu0 %v2682_v32  ;;  %2756 = vmatprep.mubr.bf16.mxu1 %v2682_v32 }
 0x829   :  { %2716 = vmatmul.mubr.bf16.vlgmr.msra.gmra.mrb[80].mxu0 %v5737_v10  ;;  %2757 = vmatmul.mubr.bf16.vlgmr.msra.gmra.mrb[80].mxu1 %v5737_v10 }
 0x82a   :  { %2766 = vmatpush1.bf16.msra.mxu0 %v6473_v39  ;;  %2807 = vmatpush1.bf16.msra.mxu1 %v6474_v12 }
 0x82b   :  { %2797 = vmatprep.mubr.bf16.mxu0 %v2682_v32  ;;  %2838 = vmatprep.mubr.bf16.mxu1 %v2682_v32  ;;  %v6985_v32 = vld [vmem:[#allocation129_spill] sm:$0xff] }
 0x82c   :  { %2767 = vmatprep.subr.bf16.mxu0 %v6475_v51  ;;  %2808 = vmatprep.subr.bf16.mxu1 %v6476_v6 }
 0x82e   :  { %2768 = vmatpush1.bf16.msra.mxu0 %v6477_v22  ;;  %2809 = vmatpush1.bf16.msra.mxu1 %v6478_v26 }
 0x82f   :  { %2769 = vmatprep.subr.bf16.mxu0 %v6479_v35  ;;  %2810 = vmatprep.subr.bf16.mxu1 %v6480_v30 }
 0x832   :  { %2770 = vmatpush1.bf16.msra.mxu0 %v6481_v54  ;;  %2811 = vmatpush1.bf16.msra.mxu1 %v6482_v5 }
 0x833   :  { %2771 = vmatprep.subr.bf16.mxu0 %v6483_v43  ;;  %2812 = vmatprep.subr.bf16.mxu1 %v6484_v53 }
 0x836   :  { %2772 = vmatpush1.bf16.msra.mxu0 %v6485_v46  ;;  %2813 = vmatpush1.bf16.msra.mxu1 %v6486_v25 }
 0x837   :  { %2773 = vmatprep.subr.bf16.mxu0 %v6487_v44  ;;  %2814 = vmatprep.subr.bf16.mxu1 %v6488_v33 }
 0x83a   :  { %2774 = vmatpush1.bf16.msra.mxu0 %v6489_v7  ;;  %2815 = vmatpush1.bf16.msra.mxu1 %v6576_v59 }
 0x83b   :  { %2775 = vmatprep.subr.bf16.mxu0 %v6577_v13  ;;  %2816 = vmatprep.subr.bf16.mxu1 %v6578_v8 }
 0x83e   :  { %2776 = vmatpush1.bf16.msra.mxu0 %v6579_v50  ;;  %2817 = vmatpush1.bf16.msra.mxu1 %v6580_v11 }
 0x83f   :  { %2777 = vmatprep.subr.bf16.mxu0 %v6581_v49  ;;  %2818 = vmatprep.subr.bf16.mxu1 %v6582_v17 }
 0x842   :  { %2778 = vmatpush1.bf16.msra.mxu0 %v6583_v9  ;;  %2819 = vmatpush1.bf16.msra.mxu1 %v6584_v48 }
 0x843   :  { %2779 = vmatprep.subr.bf16.mxu0 %v6585_v18  ;;  %2820 = vmatprep.subr.bf16.mxu1 %v6586_v1 }
 0x846   :  { %2780 = vmatpush1.bf16.msra.mxu0 %v6673_v24  ;;  %2821 = vmatpush1.bf16.msra.mxu1 %v6674_v2 }
 0x847   :  { %2781 = vmatprep.subr.bf16.mxu0 %v6589_v40  ;;  %2822 = vmatprep.subr.bf16.mxu1 %v6590_v63 }
 0x84a   :  { %2782 = vmatpush1.bf16.msra.mxu0 %v6591_v56  ;;  %2823 = vmatpush1.bf16.msra.mxu1 %v6592_v19 }
 0x84b   :  { %2783 = vmatprep.subr.bf16.mxu0 %v6593_v27  ;;  %2824 = vmatprep.subr.bf16.mxu1 %v6594_v57 }
 0x84e   :  { %2784 = vmatpush1.bf16.msra.mxu0 %v6595_v58  ;;  %2825 = vmatpush1.bf16.msra.mxu1 %v6596_v55 }
 0x84f   :  { %2785 = vmatprep.subr.bf16.mxu0 %v6597_v16  ;;  %2826 = vmatprep.subr.bf16.mxu1 %v6964_v60 }
 0x852   :  { %2786 = vmatpush1.bf16.msra.mxu0 %v6965_v31  ;;  %2827 = vmatpush1.bf16.msra.mxu1 %v6966_v0 }
 0x853   :  { %2787 = vmatprep.subr.bf16.mxu0 %v6967_v42  ;;  %2828 = vmatprep.subr.bf16.mxu1 %v6968_v29 }
 0x856   :  { %2788 = vmatpush1.bf16.msra.mxu0 %v6969_v61  ;;  %2829 = vmatpush1.bf16.msra.mxu1 %v6970_v45 }
 0x857   :  { %2789 = vmatprep.subr.bf16.mxu0 %v6971_v21  ;;  %2830 = vmatprep.subr.bf16.mxu1 %v6972_v4  ;;  %v7055_v4 = vld [vmem:[#allocation153_spill] sm:$0xff]  ;;  %v7056_v21 = vld [vmem:[#allocation156_spill] sm:$0xff] }
 0x85a   :  { %2790 = vmatpush1.bf16.msra.mxu0 %v6973_v23  ;;  %2831 = vmatpush1.bf16.msra.mxu1 %v6974_v41  ;;  %v7054_v41 = vld [vmem:[#allocation154_spill] sm:$0xff] }
 0x85b   :  { %2791 = vmatprep.subr.bf16.mxu0 %v6975_v36  ;;  %2832 = vmatprep.subr.bf16.mxu1 %v6976_v14  ;;  %v6986_v36 = vld [vmem:[#allocation130_spill] sm:$0xff]  ;;  %v6987_v14 = vld [vmem:[#allocation3_spill] sm:$0xff] }
 0x85e   :  { %2792 = vmatpush1.bf16.msra.mxu0 %v6977_v34  ;;  %2833 = vmatpush1.bf16.msra.mxu1 %v6978_v20  ;;  %v6988_v34 = vld [vmem:[#allocation4_spill] sm:$0xff] }
 0x85f   :  { %2793 = vmatprep.subr.bf16.mxu0 %v6979_v15  ;;  %2834 = vmatprep.subr.bf16.mxu1 %v6980_v52  ;;  %v6989_v52 = vld [vmem:[#allocation5_spill] sm:$0xff]  ;;  %v6998_v15 = vld [vmem:[#allocation14_spill] sm:$0xff]  ;;  %v7053_v20 = vld [vmem:[#allocation152_spill] sm:$0xff] }
 0x862   :  { %2794 = vmatpush1.bf16.msra.mxu0 %v6981_v38  ;;  %2835 = vmatpush1.bf16.msra.mxu1 %v6982_v3  ;;  %v6990_v38 = vld [vmem:[#allocation6_spill] sm:$0xff]  ;;  %v6991_v3 = vld [vmem:[#allocation7_spill] sm:$0xff] }
 0x863   :  { %2795 = vmatprep.subr.bf16.mxu0 %v6983_v47  ;;  %2836 = vmatprep.subr.bf16.mxu1 %v6984_v37  ;;  %v6992_v47 = vld [vmem:[#allocation8_spill] sm:$0xff]  ;;  %v6993_v37 = vld [vmem:[#allocation9_spill] sm:$0xff] }
 0x866   :  { %2796 = vmatpush1.bf16.msra.mxu0 %v6985_v32  ;;  %2837 = vmatpush1.bf16.msra.mxu1 %v6986_v36  ;;  %v6994_v32 = vld [vmem:[#allocation10_spill] sm:$0xff]  ;;  %v6995_v36 = vld [vmem:[#allocation11_spill] sm:$0xff] }
 0x867   :  { %2919 = vmatprep.subr.bf16.mxu0 %v6987_v14  ;;  %2960 = vmatprep.subr.bf16.mxu1 %v6988_v34  ;;  %v6996_v14 = vld [vmem:[#allocation12_spill] sm:$0xff]  ;;  %v6997_v34 = vld [vmem:[#allocation13_spill] sm:$0xff] }
 0x869   :  { %2798 = vmatmul.mubr.bf16.vlgmr.msra.gmra.mrb[84].mxu0 %v5737_v10  ;;  %2839 = vmatmul.mubr.bf16.vlgmr.msra.gmra.mrb[84].mxu1 %v5737_v10  ;;  %v6999_v10 = vld [vmem:[#allocation15_spill] sm:$0xff] }
 0x86a   :  { %2920 = vmatpush1.bf16.msra.mxu0 %v6989_v52  ;;  %2961 = vmatpush1.bf16.msra.mxu1 %v6990_v38  ;;  %v7000_v52 = vld [vmem:[#allocation16_spill] sm:$0xff]  ;;  %v7001_v38 = vld [vmem:[#allocation17_spill] sm:$0xff] }
 0x86b   :  { %2921 = vmatprep.subr.bf16.mxu0 %v6991_v3  ;;  %2962 = vmatprep.subr.bf16.mxu1 %v6992_v47  ;;  %v7002_v3 = vld [vmem:[#allocation18_spill] sm:$0xff]  ;;  %v7003_v47 = vld [vmem:[#allocation19_spill] sm:$0xff] }
 0x86e   :  { %2922 = vmatpush1.bf16.msra.mxu0 %v6993_v37  ;;  %2963 = vmatpush1.bf16.msra.mxu1 %v6994_v32  ;;  %v7004_v37 = vld [vmem:[#allocation20_spill] sm:$0xff]  ;;  %v7005_v32 = vld [vmem:[#allocation21_spill] sm:$0xff] }
 0x86f   :  { %2923 = vmatprep.subr.bf16.mxu0 %v6995_v36  ;;  %2964 = vmatprep.subr.bf16.mxu1 %v6996_v14  ;;  %v7006_v36 = vld [vmem:[#allocation22_spill] sm:$0xff]  ;;  %v7007_v14 = vld [vmem:[#allocation23_spill] sm:$0xff] }
 0x872   :  { %2924 = vmatpush1.bf16.msra.mxu0 %v6997_v34  ;;  %2965 = vmatpush1.bf16.msra.mxu1 %v6998_v15  ;;  %v7008_v34 = vld [vmem:[#allocation24_spill] sm:$0xff]  ;;  %v7009_v15 = vld [vmem:[#allocation25_spill] sm:$0xff] }
 0x873   :  { %2925 = vmatprep.subr.bf16.mxu0 %v6999_v10  ;;  %2966 = vmatprep.subr.bf16.mxu1 %v7000_v52  ;;  %v7010_v10 = vld [vmem:[#allocation26_spill] sm:$0xff]  ;;  %v7011_v52 = vld [vmem:[#allocation27_spill] sm:$0xff] }
 0x876   :  { %2926 = vmatpush1.bf16.msra.mxu0 %v7001_v38  ;;  %2967 = vmatpush1.bf16.msra.mxu1 %v7002_v3  ;;  %v7012_v38 = vld [vmem:[#allocation28_spill] sm:$0xff]  ;;  %v7013_v3 = vld [vmem:[#allocation29_spill] sm:$0xff] }
 0x877   :  { %2927 = vmatprep.subr.bf16.mxu0 %v7003_v47  ;;  %2968 = vmatprep.subr.bf16.mxu1 %v7004_v37  ;;  %v7014_v47 = vld [vmem:[#allocation30_spill] sm:$0xff]  ;;  %v7015_v37 = vld [vmem:[#allocation31_spill] sm:$0xff] }
 0x87a   :  { %2928 = vmatpush1.bf16.msra.mxu0 %v7005_v32  ;;  %2969 = vmatpush1.bf16.msra.mxu1 %v7006_v36  ;;  %v7016_v32 = vld [vmem:[#allocation32_spill] sm:$0xff]  ;;  %v7017_v36 = vld [vmem:[#allocation33_spill] sm:$0xff] }
 0x87b   :  { %2929 = vmatprep.subr.bf16.mxu0 %v7007_v14  ;;  %2970 = vmatprep.subr.bf16.mxu1 %v7008_v34  ;;  %v7018_v14 = vld [vmem:[#allocation34_spill] sm:$0xff]  ;;  %v7019_v34 = vld [vmem:[#allocation35_spill] sm:$0xff] }
 0x87e   :  { %2930 = vmatpush1.bf16.msra.mxu0 %v7009_v15  ;;  %2971 = vmatpush1.bf16.msra.mxu1 %v7010_v10  ;;  %v7020_v15 = vld [vmem:[#allocation36_spill] sm:$0xff]  ;;  %v7021_v10 = vld [vmem:[#allocation37_spill] sm:$0xff] }
 0x87f   :  { %2931 = vmatprep.subr.bf16.mxu0 %v7011_v52  ;;  %2972 = vmatprep.subr.bf16.mxu1 %v7012_v38  ;;  %v7022_v52 = vld [vmem:[#allocation38_spill] sm:$0xff]  ;;  %v7023_v38 = vld [vmem:[#allocation39_spill] sm:$0xff] }
 0x882   :  { %2932 = vmatpush1.bf16.msra.mxu0 %v7013_v3  ;;  %2973 = vmatpush1.bf16.msra.mxu1 %v7014_v47  ;;  %v7024_v3 = vld [vmem:[#allocation40_spill] sm:$0xff]  ;;  %v7025_v47 = vld [vmem:[#allocation41_spill] sm:$0xff] }
 0x883   :  { %2933 = vmatprep.subr.bf16.mxu0 %v7015_v37  ;;  %2974 = vmatprep.subr.bf16.mxu1 %v7016_v32  ;;  %v7026_v37 = vld [vmem:[#allocation42_spill] sm:$0xff]  ;;  %v7027_v32 = vld [vmem:[#allocation43_spill] sm:$0xff] }
 0x886   :  { %2934 = vmatpush1.bf16.msra.mxu0 %v7017_v36  ;;  %2975 = vmatpush1.bf16.msra.mxu1 %v7018_v14  ;;  %v7028_v36 = vld [vmem:[#allocation44_spill] sm:$0xff]  ;;  %v7029_v14 = vld [vmem:[#allocation45_spill] sm:$0xff] }
 0x887   :  { %2935 = vmatprep.subr.bf16.mxu0 %v7019_v34  ;;  %2976 = vmatprep.subr.bf16.mxu1 %v7020_v15  ;;  %v7030_v34 = vld [vmem:[#allocation46_spill] sm:$0xff]  ;;  %v7031_v15 = vld [vmem:[#allocation47_spill] sm:$0xff] }
 0x88a   :  { %2936 = vmatpush1.bf16.msra.mxu0 %v7021_v10  ;;  %2977 = vmatpush1.bf16.msra.mxu1 %v7022_v52  ;;  %v7032_v10 = vld [vmem:[#allocation48_spill] sm:$0xff]  ;;  %v7033_v52 = vld [vmem:[#allocation49_spill] sm:$0xff] }
 0x88b   :  { %2937 = vmatprep.subr.bf16.mxu0 %v7023_v38  ;;  %2978 = vmatprep.subr.bf16.mxu1 %v7024_v3  ;;  %v7034_v38 = vld [vmem:[#allocation50_spill] sm:$0xff]  ;;  %v7035_v3 = vld [vmem:[#allocation51_spill] sm:$0xff] }
 0x88e   :  { %2938 = vmatpush1.bf16.msra.mxu0 %v7025_v47  ;;  %2979 = vmatpush1.bf16.msra.mxu1 %v7026_v37  ;;  %v7036_v47 = vld [vmem:[#allocation52_spill] sm:$0xff]  ;;  %v7037_v37 = vld [vmem:[#allocation53_spill] sm:$0xff] }
 0x88f   :  { %2939 = vmatprep.subr.bf16.mxu0 %v7027_v32  ;;  %2980 = vmatprep.subr.bf16.mxu1 %v7028_v36  ;;  %v7038_v32 = vld [vmem:[#allocation54_spill] sm:$0xff]  ;;  %v7039_v36 = vld [vmem:[#allocation55_spill] sm:$0xff] }
 0x892   :  { %2940 = vmatpush1.bf16.msra.mxu0 %v7029_v14  ;;  %2981 = vmatpush1.bf16.msra.mxu1 %v7030_v34  ;;  %v7040_v14 = vld [vmem:[#allocation56_spill] sm:$0xff]  ;;  %v7041_v34 = vld [vmem:[#allocation57_spill] sm:$0xff] }
 0x893   :  { %2941 = vmatprep.subr.bf16.mxu0 %v7031_v15  ;;  %2982 = vmatprep.subr.bf16.mxu1 %v7032_v10  ;;  %v7042_v15 = vld [vmem:[#allocation58_spill] sm:$0xff]  ;;  %v7043_v10 = vld [vmem:[#allocation59_spill] sm:$0xff] }
 0x896   :  { %2942 = vmatpush1.bf16.msra.mxu0 %v7033_v52  ;;  %2983 = vmatpush1.bf16.msra.mxu1 %v7034_v38  ;;  %v7044_v52 = vld [vmem:[#allocation60_spill] sm:$0xff]  ;;  %v7045_v38 = vld [vmem:[#allocation61_spill] sm:$0xff] }
 0x897   :  { %2943 = vmatprep.subr.bf16.mxu0 %v7035_v3  ;;  %2984 = vmatprep.subr.bf16.mxu1 %v7036_v47  ;;  %v7046_v3 = vld [vmem:[#allocation62_spill] sm:$0xff]  ;;  %v7047_v47 = vld [vmem:[#allocation63_spill] sm:$0xff] }
 0x89a   :  { %2944 = vmatpush1.bf16.msra.mxu0 %v7037_v37  ;;  %2985 = vmatpush1.bf16.msra.mxu1 %v7038_v32  ;;  %v7048_v37 = vld [vmem:[#allocation64_spill] sm:$0xff]  ;;  %v7049_v32 = vld [vmem:[#allocation65_spill] sm:$0xff] }
 0x89b   :  { %2945 = vmatprep.subr.bf16.mxu0 %v7039_v36  ;;  %2986 = vmatprep.subr.bf16.mxu1 %v7040_v14  ;;  %v7050_v36 = vld [vmem:[#allocation66_spill] sm:$0xff]  ;;  %v7051_v14 = vld [vmem:[#allocation67_spill] sm:$0xff] }
 0x89e   :  { %2946 = vmatpush1.bf16.msra.mxu0 %v7041_v34  ;;  %2987 = vmatpush1.bf16.msra.mxu1 %v7042_v15  ;;  %v7052_v34 = vld [vmem:[#allocation68_spill] sm:$0xff] }
 0x89f   :  { %2947 = vmatprep.subr.bf16.mxu0 %v7043_v10  ;;  %2988 = vmatprep.subr.bf16.mxu1 %v7044_v52 }
 0x8a2   :  { %2948 = vmatpush1.bf16.msra.mxu0 %v7045_v38  ;;  %2989 = vmatpush1.bf16.msra.mxu1 %v7046_v3 }
 0x8a3   :  { %2949 = vmatprep.subr.bf16.mxu0 %v7047_v47  ;;  %2990 = vmatprep.subr.bf16.mxu1 %v7048_v37 }
 0x8a6   :  { %2950 = vmatpush1.bf16.msra.mxu0 %v7049_v32  ;;  %2991 = vmatpush1.bf16.msra.mxu1 %v7050_v36 }
 0x8a7   :  { %3001 = vmatprep.subr.bf16.mxu0 %v7051_v14  ;;  %3042 = vmatprep.subr.bf16.mxu1 %v7052_v34 }
 0x8fc   :  { %v2717_v15 = vpop.f32.mrb[80].mxu0  ;;  %v2758_v10 = vpop.f32.mrb[80].mxu1 }
 0x8fd   :  { %v2847_v52 = vadd.f32 %v2717_v15, %v7053_v20  ;;  %v2849_v38 = vadd.f32 %v2758_v10, %v7054_v41  ;;  %v2719_v23 = vpop.f32.mrb[81].mxu0  ;;  %v2760_v3 = vpop.f32.mrb[81].mxu1  ;;  %v7057_v20 = vld [vmem:[#allocation180_spill] sm:$0xff]  ;;  %v7058_v41 = vld [vmem:[#allocation182_spill] sm:$0xff] }
 0x8fe   :  { %v2848_v47 = vadd.f32 %v2719_v23, %v7055_v4  ;;  %v2850_v37 = vadd.f32 %v2760_v3, %v7056_v21  ;;  %v2721_v45 = vpop.f32.mrb[82].mxu0  ;;  %v2762_v32 = vpop.f32.mrb[82].mxu1  ;;  %v7059_v23 = vld [vmem:[#allocation181_spill] sm:$0xff] }
 0x8ff   :  { %v2722_v61 = vpop.f32.mrb[83].mxu0  ;;  %v2763_v36 = vpop.f32.mrb[83].mxu1  ;;  %v3420_v29 = vmul.f32 -1.442695, %v2847_v52  ;;  %v3422_v14 = vmul.f32 -1.442695, %v2849_v38 }
 0x900   :  { %v3423_v34 = vmul.f32 -1.442695, %v2850_v37  ;;  %v3421_v4 = vmul.f32 -1.442695, %v2848_v47  ;;  %v7060_v45 = vld [vmem:[#allocation184_spill] sm:$0xff] }
 0x901   :  { %3663 = vpow2.f32 %v3420_v29 }
 0x902   :  { %3665 = vpow2.f32 %v3422_v14 }
 0x903   :  { %3667 = vpow2.f32 %v3423_v34 }
 0x93c   :  { %v2799_v42 = vpop.f32.mrb[84].mxu0  ;;  %v2840_v0 = vpop.f32.mrb[84].mxu1 }
 0x93d   :  { %v2851_v15 = vadd.f32 %v2799_v42, %v7057_v20  ;;  %v2853_v10 = vadd.f32 %v2840_v0, %v7058_v41  ;;  %v2801_v31 = vpop.f32.mrb[85].mxu0  ;;  %v2842_v60 = vpop.f32.mrb[85].mxu1 }
 0x93e   :  { %v2852_v21 = vadd.f32 %v2801_v31, %v7059_v23  ;;  %v2854_v3 = vadd.f32 %v2842_v60, %v7060_v45  ;;  %v2803_v61 = vpop.f32.mrb[86].mxu0  ;;  %v2844_v32 = vpop.f32.mrb[86].mxu1 }
 0x93f   :  { %v3424_v52 = vmul.f32 -1.442695, %v2851_v15  ;;  %v2804_v38 = vpop.f32.mrb[87].mxu0  ;;  %v2845_v29 = vpop.f32.mrb[87].mxu1  ;;  %v3426_v41 = vmul.f32 -1.442695, %v2853_v10 }
 0x940   :  { %v3425_v37 = vmul.f32 -1.442695, %v2852_v21  ;;  %v3664_v42 = vpop.eup %3663  ;;  %v3427_v15 = vmul.f32 -1.442695, %v2854_v3 }
 0x941   :  { %3669 = vpow2.f32 %v3424_v52  ;;  %v3666_v36 = vpop.eup %3665  ;;  %v2879_v0 = vadd.f32 1.0, %v3664_v42 }
 0x942   :  { %3671 = vpow2.f32 %v3421_v4  ;;  %v2881_v14 = vadd.f32 1.0, %v3666_v36  ;;  %v3668_v20 = vpop.eup %3667 }
 0x943   :  { %3673 = vpow2.f32 %v3425_v37  ;;  %v2882_v45 = vadd.f32 1.0, %v3668_v20 }
 0x944   :  { %3675 = vrcp.f32 %v2879_v0 }
 0x945   :  { %3677 = vrcp.f32 %v2881_v14 }
 0x94b   :  { %v3670_v47 = vpop.eup %3669 }
 0x94c   :  { %v3672_v31 = vpop.eup %3671  ;;  %v2883_v60 = vadd.f32 1.0, %v3670_v47 }
 0x94d   :  { %v3674_v23 = vpop.eup %3673  ;;  %v2880_v21 = vadd.f32 1.0, %v3672_v31 }
 0x94e   :  { %3679 = vrcp.f32 %v2883_v60  ;;  %v2884_v34 = vadd.f32 1.0, %v3674_v23  ;;  %v3676_v4 = vpop.eup %3675 }
 0x94f   :  { %3681 = vpow2.f32 %v3426_v41  ;;  %v3678_v61 = vpop.eup %3677 }
 0x950   :  { %3683 = vrcp.f32 %v2884_v34  ;;  %v2907_v0 = vmul.f32 %v3678_v61, %v5730_v62 }
 0x951   :  { %3685 = vpow2.f32 %v3427_v15 }
 0x952   :  { %3687 = vrcp.f32 %v2882_v45 }
 0x953   :  { %3689 = vrcp.f32 %v2880_v21 }
 0x958   :  { %v3680_v32 = vpop.eup %3679 }
 0x959   :  { %v3682_v52 = vpop.eup %3681  ;;  %v2903_v10 = vmul.f32 2.0, %v3680_v32 }
 0x95a   :  { %v3684_v38 = vpop.eup %3683  ;;  %v2885_v3 = vadd.f32 1.0, %v3682_v52 }
 0x95b   :  { %v3686_v29 = vpop.eup %3685  ;;  %v3428_v37 = vadd.f32 -1.0, %v2903_v10  ;;  %v2904_v42 = vmul.f32 2.0, %v3684_v38 }
 0x95c   :  { %v3688_v36 = vpop.eup %3687  ;;  %v2886_v41 = vadd.f32 1.0, %v3686_v29  ;;  %3691 = vrcp.f32 %v2885_v3 }
 0x95d   :  { %v2909_v14 = vmul.f32 %v3676_v4, %v3428_v37  ;;  %v3429_v20 = vadd.f32 -1.0, %v2904_v42  ;;  %v3690_v47 = vpop.eup %3689  ;;  %v2908_v60 = vmul.f32 %v3688_v36, %v5734_v28  ;;  %v7088_v36 = vld [vmem:[#allocation183_spill] sm:$0xff] }
 0x95f   :  { %v5880_v31 = vadd.f32 %v2909_v14, %v2907_v0  ;;  %v2910_v23 = vmul.f32 %v3690_v47, %v3429_v20  ;;  %v7089_v0 = vld [vmem:[#allocation186_spill] sm:$0xff] }
 0x961   :  { %3693 = vtanh.f32 %v5880_v31  ;;  %v5884_v15 = vadd.f32 %v2910_v23, %v2908_v60  ;;  %v7090_v60 = vld [vmem:[#allocation185_spill] sm:$0xff] }
 0x962   :  { %3695 = vrcp.f32 %v2886_v41 }
 0x963   :  { %3697 = vtanh.f32 %v5884_v15 }
 0x966   :  { %v3692_v45 = vpop.eup %3691 }
 0x96b   :  { %v3694_v34 = vpop.eup %3693 }
 0x96c   :  { %v3696_v62 = vpop.eup %3695  ;;  %v2915_v4 = vmul.f32 %v3694_v34, %v3692_v45  ;;  %v7091_v45 = vld [vmem:[#allocation187_spill] sm:$0xff] }
 0x96d   :  { %v3698_v21 = vpop.eup %3697 }
 0x96e   :  { %v2916_v61 = vmul.f32 %v3698_v21, %v3696_v62  ;;  %v5887_v52 = vpack.c.bf16 %v2915_v4, %v2915_v4 }
 0x970   :  { %v2918_v32 = vpack.c.bf16 %v2916_v61, %v2916_v61 }
 0x972   :  { %2951 = vmatprep.mubr.bf16.mxu0 %v2918_v32  ;;  %2992 = vmatprep.mubr.bf16.mxu1 %v2918_v32 }
 0x973   :  { %2952 = vmatmul.mubr.bf16.vlgmr.msra.gmra.mrb[88].mxu0 %v5887_v52  ;;  %2993 = vmatmul.mubr.bf16.vlgmr.msra.gmra.mrb[88].mxu1 %v5887_v52 }
 0x974   :  { %3002 = vmatpush1.bf16.msra.mxu0 %v6473_v39  ;;  %3043 = vmatpush1.bf16.msra.mxu1 %v6474_v12  ;;  %v7061_v39 = vld [vmem:[#allocation108_spill] sm:$0xff]  ;;  %v7062_v12 = vld [vmem:[#allocation109_spill] sm:$0xff] }
 0x975   :  { %3033 = vmatprep.mubr.bf16.mxu0 %v2918_v32  ;;  %3074 = vmatprep.mubr.bf16.mxu1 %v2918_v32 }
 0x976   :  { %3003 = vmatprep.subr.bf16.mxu0 %v6475_v51  ;;  %3044 = vmatprep.subr.bf16.mxu1 %v6476_v6  ;;  %v7063_v51 = vld [vmem:[#allocation110_spill] sm:$0xff]  ;;  %v7064_v6 = vld [vmem:[#allocation111_spill] sm:$0xff] }
 0x978   :  { %3004 = vmatpush1.bf16.msra.mxu0 %v6477_v22  ;;  %3045 = vmatpush1.bf16.msra.mxu1 %v6478_v26  ;;  %v7065_v22 = vld [vmem:[#allocation112_spill] sm:$0xff]  ;;  %v7066_v26 = vld [vmem:[#allocation113_spill] sm:$0xff] }
 0x979   :  { %3005 = vmatprep.subr.bf16.mxu0 %v6479_v35  ;;  %3046 = vmatprep.subr.bf16.mxu1 %v6480_v30  ;;  %v7067_v35 = vld [vmem:[#allocation114_spill] sm:$0xff]  ;;  %v7068_v30 = vld [vmem:[#allocation115_spill] sm:$0xff] }
 0x97c   :  { %3006 = vmatpush1.bf16.msra.mxu0 %v6481_v54  ;;  %3047 = vmatpush1.bf16.msra.mxu1 %v6482_v5  ;;  %v7069_v54 = vld [vmem:[#allocation116_spill] sm:$0xff]  ;;  %v7070_v5 = vld [vmem:[#allocation117_spill] sm:$0xff] }
 0x97d   :  { %3007 = vmatprep.subr.bf16.mxu0 %v6483_v43  ;;  %3048 = vmatprep.subr.bf16.mxu1 %v6484_v53  ;;  %v7071_v43 = vld [vmem:[#allocation118_spill] sm:$0xff]  ;;  %v7072_v53 = vld [vmem:[#allocation119_spill] sm:$0xff] }
 0x980   :  { %3008 = vmatpush1.bf16.msra.mxu0 %v6485_v46  ;;  %3049 = vmatpush1.bf16.msra.mxu1 %v6486_v25  ;;  %v7073_v46 = vld [vmem:[#allocation120_spill] sm:$0xff]  ;;  %v7074_v25 = vld [vmem:[#allocation121_spill] sm:$0xff] }
 0x981   :  { %3009 = vmatprep.subr.bf16.mxu0 %v6487_v44  ;;  %3050 = vmatprep.subr.bf16.mxu1 %v6488_v33  ;;  %v7075_v44 = vld [vmem:[#allocation122_spill] sm:$0xff]  ;;  %v7076_v33 = vld [vmem:[#allocation123_spill] sm:$0xff] }
 0x984   :  { %3010 = vmatpush1.bf16.msra.mxu0 %v6489_v7  ;;  %3051 = vmatpush1.bf16.msra.mxu1 %v6576_v59  ;;  %v7077_v7 = vld [vmem:[#allocation124_spill] sm:$0xff]  ;;  %v7078_v59 = vld [vmem:[#allocation125_spill] sm:$0xff] }
 0x985   :  { %3011 = vmatprep.subr.bf16.mxu0 %v6577_v13  ;;  %3052 = vmatprep.subr.bf16.mxu1 %v6578_v8  ;;  %v7079_v13 = vld [vmem:[#allocation126_spill] sm:$0xff]  ;;  %v7080_v8 = vld [vmem:[#allocation127_spill] sm:$0xff] }
 0x988   :  { %3012 = vmatpush1.bf16.msra.mxu0 %v6579_v50  ;;  %3053 = vmatpush1.bf16.msra.mxu1 %v6580_v11  ;;  %v7081_v50 = vld [vmem:[#allocation128_spill] sm:$0xff]  ;;  %v7082_v11 = vld [vmem:[#allocation129_spill] sm:$0xff] }
 0x989   :  { %3013 = vmatprep.subr.bf16.mxu0 %v6581_v49  ;;  %3054 = vmatprep.subr.bf16.mxu1 %v6582_v17  ;;  %v7083_v49 = vld [vmem:[#allocation130_spill] sm:$0xff]  ;;  %v13_v17 = vstv %s5988_s5 }
 0x98a   :  { %14 = vst [vmem:[#allocation2] sm:$0x1] %v13_v17 }
 0x98c   :  { %3014 = vmatpush1.bf16.msra.mxu0 %v6583_v9  ;;  %3055 = vmatpush1.bf16.msra.mxu1 %v6584_v48 }
 0x98d   :  { %3015 = vmatprep.subr.bf16.mxu0 %v6585_v18  ;;  %3056 = vmatprep.subr.bf16.mxu1 %v6586_v1  ;;  %v7084_v18 = vld [vmem:[#allocation155_spill] sm:$0xff] }
 0x990   :  { %3016 = vmatpush1.bf16.msra.mxu0 %v6673_v24  ;;  %3057 = vmatpush1.bf16.msra.mxu1 %v6674_v2 }
 0x991   :  { %3017 = vmatprep.subr.bf16.mxu0 %v6589_v40  ;;  %3058 = vmatprep.subr.bf16.mxu1 %v6590_v63  ;;  %v7085_v40 = vld [vmem:[#allocation158_spill] sm:$0xff] }
 0x994   :  { %3018 = vmatpush1.bf16.msra.mxu0 %v6591_v56  ;;  %3059 = vmatpush1.bf16.msra.mxu1 %v6592_v19 }
 0x995   :  { %3019 = vmatprep.subr.bf16.mxu0 %v6593_v27  ;;  %3060 = vmatprep.subr.bf16.mxu1 %v6594_v57  ;;  %v7086_v27 = vld [vmem:[#allocation157_spill] sm:$0xff] }
 0x998   :  { %3020 = vmatpush1.bf16.msra.mxu0 %v6595_v58  ;;  %3061 = vmatpush1.bf16.msra.mxu1 %v6596_v55  ;;  %v7087_v58 = vld [vmem:[#allocation159_spill] sm:$0xff] }
 0x999   :  { %3021 = vmatprep.subr.bf16.mxu0 %v6597_v16  ;;  %3062 = vmatprep.subr.bf16.mxu1 %v7061_v39 }
 0x99c   :  { %3022 = vmatpush1.bf16.msra.mxu0 %v7062_v12  ;;  %3063 = vmatpush1.bf16.msra.mxu1 %v7063_v51 }
 0x99d   :  { %3023 = vmatprep.subr.bf16.mxu0 %v7064_v6  ;;  %3064 = vmatprep.subr.bf16.mxu1 %v7065_v22 }
 0x9a0   :  { %3024 = vmatpush1.bf16.msra.mxu0 %v7066_v26  ;;  %3065 = vmatpush1.bf16.msra.mxu1 %v7067_v35 }
 0x9a1   :  { %3025 = vmatprep.subr.bf16.mxu0 %v7068_v30  ;;  %3066 = vmatprep.subr.bf16.mxu1 %v7069_v54 }
 0x9a4   :  { %3026 = vmatpush1.bf16.msra.mxu0 %v7070_v5  ;;  %3067 = vmatpush1.bf16.msra.mxu1 %v7071_v43 }
 0x9a5   :  { %3027 = vmatprep.subr.bf16.mxu0 %v7072_v53  ;;  %3068 = vmatprep.subr.bf16.mxu1 %v7073_v46 }
 0x9a8   :  { %3028 = vmatpush1.bf16.msra.mxu0 %v7074_v25  ;;  %3069 = vmatpush1.bf16.msra.mxu1 %v7075_v44 }
 0x9a9   :  { %3029 = vmatprep.subr.bf16.mxu0 %v7076_v33  ;;  %3070 = vmatprep.subr.bf16.mxu1 %v7077_v7 }
 0x9ac   :  { %3030 = vmatpush1.bf16.msra.mxu0 %v7078_v59  ;;  %3071 = vmatpush1.bf16.msra.mxu1 %v7079_v13 }
 0x9ad   :  { %3031 = vmatprep.subr.bf16.mxu0 %v7080_v8  ;;  %3072 = vmatprep.subr.bf16.mxu1 %v7081_v50 }
 0x9b0   :  { %3032 = vmatpush1.bf16.msra.mxu0 %v7082_v11  ;;  %3073 = vmatpush1.bf16.msra.mxu1 %v7083_v49 }
 0x9b3   :  { %3034 = vmatmul.mubr.bf16.vlgmr.msra.gmra.mrb[92].mxu0 %v5887_v52  ;;  %3075 = vmatmul.mubr.bf16.vlgmr.msra.gmra.mrb[92].mxu1 %v5887_v52 }
 0xa46   :  { %v2953_v9 = vpop.f32.mrb[88].mxu0  ;;  %v2994_v48 = vpop.f32.mrb[88].mxu1 }
 0xa47   :  { %v3083_v1 = vadd.f32 %v2953_v9, %v7084_v18  ;;  %v3085_v63 = vadd.f32 %v2994_v48, %v7085_v40  ;;  %v2955_v56 = vpop.f32.mrb[89].mxu0  ;;  %v2996_v19 = vpop.f32.mrb[89].mxu1 }
 0xa48   :  { %v3084_v57 = vadd.f32 %v2955_v56, %v7086_v27  ;;  %v3086_v55 = vadd.f32 %v2996_v19, %v7087_v58  ;;  %v2957_v16 = vpop.f32.mrb[90].mxu0  ;;  %v2998_v24 = vpop.f32.mrb[90].mxu1  ;;  %v3155_v58 = vld [vmem:[%s5989_s4] sm:$0x3] }
 0xa49   :  { %v2958_v2 = vpop.f32.mrb[91].mxu0  ;;  %v2999_v28 = vpop.f32.mrb[91].mxu1  ;;  %v3430_v10 = vmul.f32 -1.442695, %v3083_v1  ;;  %v3432_v38 = vmul.f32 -1.442695, %v3085_v63 }
 0xa4a   :  { %v3433_v29 = vmul.f32 -1.442695, %v3086_v55  ;;  %v3431_v41 = vmul.f32 -1.442695, %v3084_v57  ;;  %v7092_v16 = vld [vmem:[#allocation131_spill] sm:$0xff] }
 0xa4b   :  { %3699 = vpow2.f32 %v3430_v10 }
 0xa4c   :  { %3701 = vpow2.f32 %v3432_v38  ;;  %v7094_v38 = vsub.s32 1, %v7092_v16 }
 0xa4d   :  { %3703 = vpow2.f32 %v3433_v29 }
 0xa55   :  { %v3700_v39 = vpop.eup %3699 }
 0xa56   :  { %v3702_v12 = vpop.eup %3701  ;;  %v3115_v51 = vadd.f32 1.0, %v3700_v39 }
 0xa57   :  { %v3117_v6 = vadd.f32 1.0, %v3702_v12  ;;  %v3704_v22 = vpop.eup %3703 }
 0xa58   :  { %v3118_v53 = vadd.f32 1.0, %v3704_v22 }
 0xa86   :  { %v3035_v37 = vpop.f32.mrb[92].mxu0  ;;  %v3076_v42 = vpop.f32.mrb[92].mxu1 }
 0xa87   :  { %v3087_v3 = vadd.f32 %v3035_v37, %v7088_v36  ;;  %v3089_v14 = vadd.f32 %v3076_v42, %v7089_v0  ;;  %v3037_v20 = vpop.f32.mrb[93].mxu0  ;;  %v3078_v47 = vpop.f32.mrb[93].mxu1  ;;  %v3440_v0 = vld [vmem:[#allocation2] ss:$0 sm:$0xff] }
 0xa88   :  { %v3088_v23 = vadd.f32 %v3037_v20, %v7090_v60  ;;  %v3090_v34 = vadd.f32 %v3078_v47, %v7091_v45  ;;  %v3039_v62 = vpop.f32.mrb[94].mxu0  ;;  %v3080_v21 = vpop.f32.mrb[94].mxu1 }
 0xa89   :  { %v3434_v4 = vmul.f32 -1.442695, %v3087_v3  ;;  %v3040_v61 = vpop.f32.mrb[95].mxu0  ;;  %v3081_v32 = vpop.f32.mrb[95].mxu1  ;;  %v3436_v35 = vmul.f32 -1.442695, %v3089_v14 }
 0xa8a   :  { %v3435_v52 = vmul.f32 -1.442695, %v3088_v23  ;;  %v3437_v43 = vmul.f32 -1.442695, %v3090_v34 }
 0xa8b   :  { %3705 = vpow2.f32 %v3434_v4 }
 0xa8c   :  { %3707 = vpow2.f32 %v3431_v41 }
 0xa8d   :  { %3709 = vpow2.f32 %v3435_v52 }
 0xa8e   :  { %3711 = vrcp.f32 %v3115_v51 }
 0xa8f   :  { %3713 = vrcp.f32 %v3117_v6 }
 0xa95   :  { %v3706_v26 = vpop.eup %3705 }
 0xa96   :  { %v3708_v30 = vpop.eup %3707  ;;  %v3119_v54 = vadd.f32 1.0, %v3706_v26 }
 0xa97   :  { %v3710_v5 = vpop.eup %3709  ;;  %v3116_v25 = vadd.f32 1.0, %v3708_v30 }
 0xa98   :  { %3715 = vrcp.f32 %v3119_v54  ;;  %v3120_v46 = vadd.f32 1.0, %v3710_v5  ;;  %v3712_v44 = vpop.eup %3711 }
 0xa99   :  { %3717 = vpow2.f32 %v3436_v35  ;;  %v3714_v33 = vpop.eup %3713 }
 0xa9a   :  { %3719 = vrcp.f32 %v3120_v46  ;;  %v3143_v48 = vmul.f32 %v3714_v33, %v5880_v31  ;;  %v7093_v31 = vsub.s32 0, %v7092_v16 }
 0xa9b   :  { %3721 = vpow2.f32 %v3437_v43 }
 0xa9c   :  { %3723 = vrcp.f32 %v3118_v53  ;;  %v3160_v24 = vrot.slane %v3155_v58, %v7093_v31 }
 0xa9d   :  { %3725 = vrcp.f32 %v3116_v25 }
 0xaa2   :  { %v3716_v7 = vpop.eup %3715 }
 0xaa3   :  { %v3718_v59 = vpop.eup %3717  ;;  %v3139_v13 = vmul.f32 2.0, %v3716_v7 }
 0xaa4   :  { %v3720_v8 = vpop.eup %3719  ;;  %v3121_v9 = vadd.f32 1.0, %v3718_v59 }
 0xaa5   :  { %v3722_v50 = vpop.eup %3721  ;;  %v3438_v11 = vadd.f32 -1.0, %v3139_v13  ;;  %v3140_v49 = vmul.f32 2.0, %v3720_v8 }
 0xaa6   :  { %v3724_v17 = vpop.eup %3723  ;;  %v3122_v63 = vadd.f32 1.0, %v3722_v50  ;;  %3727 = vrcp.f32 %v3121_v9 }
 0xaa7   :  { %v3145_v18 = vmul.f32 %v3712_v44, %v3438_v11  ;;  %v3439_v1 = vadd.f32 -1.0, %v3140_v49  ;;  %v3726_v40 = vpop.eup %3725  ;;  %v3144_v19 = vmul.f32 %v3724_v17, %v5884_v15  ;;  %v3164_v15 = vrot.slane %v3155_v58, %v7094_v38 }
 0xaa9   :  { %v3147_v56 = vadd.f32 %v3145_v18, %v3143_v48  ;;  %v3146_v27 = vmul.f32 %v3726_v40, %v3439_v1 }
 0xaab   :  { %3729 = vtanh.f32 %v3147_v56  ;;  %v3148_v57 = vadd.f32 %v3146_v27, %v3144_v19 }
 0xaac   :  { %3731 = vrcp.f32 %v3122_v63 }
 0xaad   :  { %3733 = vtanh.f32 %v3148_v57 }
 0xab0   :  { %v3728_v55 = vpop.eup %3727 }
 0xab5   :  { %v3730_v2 = vpop.eup %3729 }
 0xab6   :  { %v3732_v28 = vpop.eup %3731  ;;  %v3151_v10 = vmul.f32 %v3730_v2, %v3728_v55 }
 0xab7   :  { %v3734_v29 = vpop.eup %3733 }
 0xab8   :  { %v3152_v37 = vmul.f32 %v3734_v29, %v3732_v28  ;;  %3153 = vst [vmem:[%s5990_s7] sm:$0xff] %v3151_v10  ;;  %v3167_v42 = vmul.f32 %v3160_v24, %v3151_v10 }
 0xaba   :  { %3154 = vst [vmem:[%s5990_s7 + $0x8] sm:$0xff] %v3152_v37  ;;  %v3168_v36 = vmul.f32 %v3164_v15, %v3152_v37 }
 0xabc   :  { %v3169_v3 = vadd.f32 %v3168_v36, %v3167_v42 }
 0xabe   :  { %3170 = vadd.xlane.f32.xlu0 %v3169_v3 }
 0xb4b   :  { %v3171_v14 = vpop.xlane.xlu0 %3170 }
 0xb4c   :  { %v3179_v20 = vadd.f32 %v3440_v0, %v3171_v14 }
 0xb4e   :  { %v3441_v47 = vmul.f32 -1.442695, %v3179_v20 }
 0xb50   :  { %3735 = vpow2.f32 %v3441_v47 }
 0xb5a   :  { %v3736_v41 = vpop.eup %3735 }
 0xb5b   :  { %v3183_v60 = vadd.f32 1.0, %v3736_v41 }
 0xb5d   :  { %3737 = vrcp.f32 %v3183_v60 }
 0xb67   :  { %v3738_v23 = vpop.eup %3737 }
 0xb68   :  { %3187 = vst.msk [vmem:[%s5991_s6] sm:$0xff] %vm3186_vm1, %v3738_v23 }

</bundles_post_ra>
